<compile_context>
chip_gen: v7x
topology: tpu7x:2x2x1
jax: 0.10.0
libtpu: 0.0.40
codegen_flags: <defaults>
</compile_context>

<pallas_src>
import functools
import math

import jax
import jax.numpy as jnp
from jax import lax
from jax.experimental import pallas as pl
from jax.experimental.pallas import tpu as pltpu

CLS_OUT = 2                 # cls_out_channels (module default)
LOC_OUT = 4                 # loc_output (fixed in the module)
NT = CLS_OUT + LOC_OUT      # total number of correlation filters
MXU_DTYPE = jnp.bfloat16    # bf16 inputs for the big search conv, f32 accumulation


# ----------------------------- Pallas kernel -------------------------------- #

def _upchannel_ban_kernel(zp_ref, xt_ref, wz_ref, bz_ref, wx_ref, bx_ref, badj_ref,
                          cls_ref, loc_ref, feat_scr,
                          *, C, Wx, Hk, Wk, Hf, Wf, Ho, Wo):
    """One grid step = one sample.  Computes the four 3x3 convs and both up-channel
    cross-correlations (loc_adjust already folded into the template loc weights)."""
    Cs = 2 * C
    Pz = Hk * Wk
    Lx = (Hf - 1) * Wx + Wf      # search-feature extent in Wx-strided flat coordinates
    L2 = (Ho - 1) * Wx + Wo      # correlation-output extent in the same coordinates

    # ---- fused search convs (cls ++ loc, Cout = 2C): per-tap matmul + shifted add ----
    x_all = xt_ref[0]                                           # (C, Hx*Wx) bf16
    for t in range(9):
        ky, kx = divmod(t, 3)
        s = ky * Wx + kx
        q = jnp.dot(wx_ref[t], x_all[:, s:s + Lx],
                    preferred_element_type=jnp.float32)         # (Cs, Lx) f32
        if t == 0:
            feat_scr[...] = q
        else:
            feat_scr[...] += q
    feat_scr[...] += bx_ref[...]                                 # conv bias, (Cs,1) bcast

    fc = feat_scr[:C, :]                                         # (C, Lx) cls features f32
    fl = feat_scr[C:, :]                                         # (C, Lx) loc features f32

    # ---- template convs + up-channel xcorr, one correlation filter at a time --------
    zp = zp_ref[0]                                               # (Pz, 9C) f32
    for o in range(NT):
        # template 3x3 conv restricted to this filter's C output channels
        filt = jnp.dot(zp, wz_ref[o],
                       preferred_element_type=jnp.float32) + bz_ref[o]   # (Pz, C)
        feat = fc if o < CLS_OUT else fl
        # dense correlation map over every feature position (positions on lanes)
        g = jnp.dot(filt, feat, preferred_element_type=jnp.float32)      # (Pz, Lx)
        # shifted accumulation over the Hk x Wk correlation taps
        acc = None
        for p in range(Pz):
            dy, dx = divmod(p, Wk)
            s = dy * Wx + dx
            seg = g[p:p + 1, s:s + L2]                           # (1, L2)
            acc = seg if acc is None else acc + seg
        if o >= CLS_OUT:                                         # folded loc_adjust bias
            i = o - CLS_OUT
            acc = acc + badj_ref[i:i + 1, :]
        # crop the Wo-wide valid runs out of the Wx-strided accumulator
        out_ref = cls_ref if o < CLS_OUT else loc_ref
        oo = o if o < CLS_OUT else o - CLS_OUT
        for oy in range(Ho):
            out_ref[0, pl.ds(oo, 1), pl.ds(oy * Wo, Wo)] = acc[:, oy * Wx:oy * Wx + Wo]


# ------------------------------ host-side glue ------------------------------ #

def _im2col_3x3(x_nhwc):
    """(B, H, W, C) -> (B, (H-2)*(W-2), 9*C); columns ordered (kh, kw, cin)."""
    B, H, W, C = x_nhwc.shape
    Ho, Wo = H - 2, W - 2
    cols = [x_nhwc[:, dy:dy + Ho, dx:dx + Wo, :]
            for dy in range(3) for dx in range(3)]
    return jnp.concatenate(cols, axis=-1).reshape(B, Ho * Wo, 9 * C)


def prepare_params(raw):
    """Fold PyTorch-layout weights into the fused kernel operand layout."""
    C = raw["s_cls_w"].shape[1]

    # Fold the 1x1 loc_adjust conv into the template loc conv (both are linear):
    #   adjust(xcorr(x, k))[o'] = xcorr(x, sum_o adj_w[o', o] * k[o]) + adj_b[o'].
    adj = raw["adj_w"][:, :, 0, 0]                                    # (4, 4)
    tl_w = raw["t_loc_w"].reshape(LOC_OUT, C, C, 3, 3)
    tl_b = raw["t_loc_b"].reshape(LOC_OUT, C)
    tl_w_m = jnp.einsum("po,ocikl->pcikl", adj, tl_w).reshape(LOC_OUT * C, C, 3, 3)
    tl_b_m = jnp.einsum("po,oc->pc", adj, tl_b).reshape(LOC_OUT * C)

    # Fused template conv weights grouped per correlation filter:
    #   wz3[o] : (9C, C) im2col matrix for that filter's C output channels,
    #   rows ordered (kh, kw, cin) to match _im2col_3x3's column order.
    w_t = jnp.concatenate([raw["t_cls_w"], tl_w_m], axis=0)           # (6C, C, 3, 3)
    b_t = jnp.concatenate([raw["t_cls_b"], tl_b_m], axis=0)           # (6C,)
    wmat = jnp.transpose(w_t, (2, 3, 1, 0)).reshape(9 * C, NT * C)    # cols j = o*C + c
    wz3 = jnp.transpose(wmat.reshape(9 * C, NT, C), (1, 0, 2))        # (NT, 9C, C)
    bz3 = b_t.reshape(NT, 1, C)

    # Fused search conv weights per 3x3 tap: wx3[ky*3+kx] : (2C, C).
    w_s = jnp.concatenate([raw["s_cls_w"], raw["s_loc_w"]], axis=0)   # (2C, C, 3, 3)
    wx3 = jnp.transpose(w_s, (2, 3, 0, 1)).reshape(9, 2 * C, C)
    bx = jnp.concatenate([raw["s_cls_b"], raw["s_loc_b"]]).reshape(2 * C, 1)
    badj = raw["adj_b"].reshape(LOC_OUT, 1)

    return {"wz3": wz3.astype(jnp.float32), "bz3": bz3.astype(jnp.float32),
            "wx3": wx3.astype(MXU_DTYPE), "bx": bx.astype(jnp.float32),
            "badj": badj.astype(jnp.float32)}


# ------------------------------ model forward ------------------------------- #

def upchannel_ban_forward(params, z_f, x_f):
    B, C, Hz, Wz = z_f.shape
    _, _, Hx, Wx = x_f.shape
    Hk, Wk = Hz - 2, Wz - 2               # correlation kernel spatial size
    Hf, Wf = Hx - 2, Wx - 2               # search feature spatial size
    Ho, Wo = Hf - Hk + 1, Wf - Wk + 1     # correlation output spatial size
    Pz, Px, Po = Hk * Wk, Hx * Wx, Ho * Wo
    Cs = 2 * C
    Lx = (Hf - 1) * Wx + Wf

    # template branch: tiny, keep the host-side im2col (f32; no extra quantization)
    zp = _im2col_3x3(jnp.transpose(z_f, (0, 2, 3, 1)).astype(jnp.float32))  # (B, Pz, 9C)
    # search branch: raw channel-major slab, no im2col blow-up
    xt = x_f.reshape(B, C, Px).astype(MXU_DTYPE)                            # (B, C, Px)

    kernel = functools.partial(
        _upchannel_ban_kernel,
        C=C, Wx=Wx, Hk=Hk, Wk=Wk, Hf=Hf, Wf=Wf, Ho=Ho, Wo=Wo)

    cost = pl.CostEstimate(
        flops=2 * B * (Pz * 9 * C * NT * C        # template convs
                       + 9 * Cs * C * Lx          # search convs
                       + NT * Pz * C * Lx),       # cross-correlations
        transcendentals=0,
        bytes_accessed=(zp.size * 4 + xt.size * 2
                        + params["wz3"].size * 4 + params["wx3"].size * 2
                        + params["bz3"].size * 4 + params["bx"].size * 4
                        + params["badj"].size * 4
                        + B * NT * Po * 4))

    cls, loc = pl.pallas_call(
        kernel,
        grid=(B,),
        in_specs=[
            pl.BlockSpec((1, Pz, 9 * C), lambda b: (b, 0, 0)),
            pl.BlockSpec((1, C, Px), lambda b: (b, 0, 0)),
            pl.BlockSpec((NT, 9 * C, C), lambda b: (0, 0, 0)),
            pl.BlockSpec((NT, 1, C), lambda b: (0, 0, 0)),
            pl.BlockSpec((9, Cs, C), lambda b: (0, 0, 0)),
            pl.BlockSpec((Cs, 1), lambda b: (0, 0)),
            pl.BlockSpec((LOC_OUT, 1), lambda b: (0, 0)),
        ],
        out_specs=(pl.BlockSpec((1, CLS_OUT, Po), lambda b: (b, 0, 0)),
                   pl.BlockSpec((1, LOC_OUT, Po), lambda b: (b, 0, 0))),
        out_shape=(jax.ShapeDtypeStruct((B, CLS_OUT, Po), jnp.float32),
                   jax.ShapeDtypeStruct((B, LOC_OUT, Po), jnp.float32)),
        scratch_shapes=[pltpu.VMEM((Cs, Lx), jnp.float32)],
        compiler_params=pltpu.CompilerParams(
            dimension_semantics=("parallel",),
            # demo sizes need < 2 MiB; raise per-chip (64-96 MiB on v5e/v6e) at C=256
            vmem_limit_bytes=32 * 1024 * 1024),
        cost_estimate=cost,
    )(zp, xt, params["wz3"], params["bz3"], params["wx3"], params["bx"], params["badj"])

    # outputs are already NCHW-flat: (B, n, Ho*Wo) -> (B, n, Ho, Wo) is a free reshape
    return (cls.reshape(B, CLS_OUT, Ho, Wo), loc.reshape(B, LOC_OUT, Ho, Wo))


# ------------------------- deterministic parameter init --------------------- #

def init_torch_params(key, feature_in):
    """PyTorch-layout (OIHW) weights with nn.Conv2d's default uniform init."""
    C = feature_in

    def conv_init(k, cout, cin, kh, kw):
        kw_, kb_ = jax.random.split(k)
        bound = 1.0 / math.sqrt(cin * kh * kw)
        w = jax.random.uniform(kw_, (cout, cin, kh, kw), jnp.float32, -bound, bound)
        b = jax.random.uniform(kb_, (cout,), jnp.float32, -bound, bound)
        return w, b

    ks = jax.random.split(key, 5)
    p = {}
    p["t_cls_w"], p["t_cls_b"] = conv_init(ks[0], C * CLS_OUT, C, 3, 3)
    p["t_loc_w"], p["t_loc_b"] = conv_init(ks[1], C * LOC_OUT, C, 3, 3)
    p["s_cls_w"], p["s_cls_b"] = conv_init(ks[2], C, C, 3, 3)
    p["s_loc_w"], p["s_loc_b"] = conv_init(ks[3], C, C, 3, 3)
    p["adj_w"], p["adj_b"] = conv_init(ks[4], LOC_OUT, LOC_OUT, 1, 1)
    return p


# --------------------------- pure-JAX reference ----------------------------- #

def _ref_forward(raw, z_f, x_f):
    def conv(x, w, b):
        y = lax.conv_general_dilated(x, w, (1, 1), "VALID",
                                     dimension_numbers=("NCHW", "OIHW", "NCHW"))
        return y + b[None, :, None, None]

    def xcorr_fast(x, kernel):
        B, C, H, W = x.shape
        n = kernel.shape[1] // C
        pk = kernel.reshape(B * n, C, kernel.shape[2], kernel.shape[3])
        px = x.reshape(1, B * C, H, W)
        po = lax.conv_general_dilated(px, pk, (1, 1), "VALID",
                                      dimension_numbers=("NCHW", "OIHW", "NCHW"),
                                      feature_group_count=B)
        return po.reshape(B, n, po.shape[2], po.shape[3])

    cls_kernel = conv(z_f, raw["t_cls_w"], raw["t_cls_b"])
    loc_kernel = conv(z_f, raw["t_loc_w"], raw["t_loc_b"])
    cls_feature = conv(x_f, raw["s_cls_w"], raw["s_cls_b"])
    loc_feature = conv(x_f, raw["s_loc_w"], raw["s_loc_b"])
    cls = xcorr_fast(cls_feature, cls_kernel)
    loc = conv(xcorr_fast(loc_feature, loc_kernel), raw["adj_w"], raw["adj_b"])
    return cls, loc


# ----------------------------------- main ----------------------------------- #

if __name__ == "__main__":
    root = jax.random.PRNGKey(0)
    pkey, zkey, xkey = jax.random.split(root, 3)

    B, C = 2, 32            # feature_in=32 (small stand-in for the real 256)
    Hz = Wz = 6             # template features -> 4x4 correlation kernel
    Hx = Wx = 14            # search features   -> 12x12 feature -> 9x9 output

    raw = init_torch_params(pkey, feature_in=C)
    params = prepare_params(raw)
    z_f = jax.random.normal(zkey, (B, C, Hz, Wz), jnp.float32)
    x_f = jax.random.normal(xkey, (B, C, Hx, Wx), jnp.float32)

    fwd = jax.jit(upchannel_ban_forward)
    cls_out, loc_out = fwd(params, z_f, x_f)
    jax.block_until_ready((cls_out, loc_out))

    Ho = Hx - Hz + 1
    assert cls_out.shape == (B, CLS_OUT, Ho, Ho), cls_out.shape
    assert loc_out.shape == (B, LOC_OUT, Ho, Ho), loc_out.shape

    # correctness vs. a pure-JAX (f32) reference; tolerance covers the bf16 search conv
    cls_ref, loc_ref = _ref_forward(raw, z_f, x_f)
    for name, got, ref in (("cls", cls_out, cls_ref), ("loc", loc_out, loc_ref)):
        err = float(jnp.max(jnp.abs(got - ref)))
        scale = float(jnp.max(jnp.abs(ref))) + 1e-6
        assert err <= 5e-2 * scale + 5e-2, f"{name}: err={err:.4f}, scale={scale:.4f}"

    print("KERNEL_OK")
</pallas_src>

<mosaic_0001>
module attributes {stable_mosaic.version = 11 : i64} {
  func.func @_upchannel_ban_kernel(%arg0: i32, %arg1: memref<1x16x288xf32, #tpu.memory_space<vmem>>, %arg2: memref<1x32x196xbf16, #tpu.memory_space<vmem>>, %arg3: memref<6x288x32xf32, #tpu.memory_space<vmem>>, %arg4: memref<6x1x32xf32, #tpu.memory_space<vmem>>, %arg5: memref<9x64x32xbf16, #tpu.memory_space<vmem>>, %arg6: memref<64x1xf32, #tpu.memory_space<vmem>>, %arg7: memref<4x1xf32, #tpu.memory_space<vmem>>, %arg8: memref<1x2x81xf32, #tpu.memory_space<vmem>>, %arg9: memref<1x4x81xf32, #tpu.memory_space<vmem>>, %arg10: memref<64x166xf32, #tpu.memory_space<vmem>>) attributes {dimension_semantics = [#tpu.dimension_semantics<parallel>], iteration_bounds = array<i64: 2>, scalar_prefetch = 0 : i64, scratch_operands = 1 : i64, tpu.core_type = #tpu.core_type<tc>, window_params = [{transform_indices = @transform_0, window_bounds = array<i64: 1, 16, 288>}, {transform_indices = @transform_1, window_bounds = array<i64: 1, 32, 196>}, {pipeline_mode = #tpu.pipeline_mode<synchronous>, transform_indices = @transform_2, window_bounds = array<i64: 6, 288, 32>}, {pipeline_mode = #tpu.pipeline_mode<synchronous>, transform_indices = @transform_3, window_bounds = array<i64: 6, 1, 32>}, {pipeline_mode = #tpu.pipeline_mode<synchronous>, transform_indices = @transform_4, window_bounds = array<i64: 9, 64, 32>}, {pipeline_mode = #tpu.pipeline_mode<synchronous>, transform_indices = @transform_5, window_bounds = array<i64: 64, 1>}, {pipeline_mode = #tpu.pipeline_mode<synchronous>, transform_indices = @transform_6, window_bounds = array<i64: 4, 1>}, {transform_indices = @transform_7, window_bounds = array<i64: 1, 2, 81>}, {transform_indices = @transform_8, window_bounds = array<i64: 1, 4, 81>}]} {
    %c0 = arith.constant 0 : index
    %c0_0 = arith.constant 0 : index
    %c0_1 = arith.constant 0 : index
    %0 = vector.load %arg2[%c0, %c0_0, %c0_1] : memref<1x32x196xbf16, #tpu.memory_space<vmem>>, vector<1x32x196xbf16>
    %1 = vector.shape_cast %0 : vector<1x32x196xbf16> to vector<32x196xbf16>
    %c0_2 = arith.constant 0 : index
    %c0_3 = arith.constant 0 : index
    %c0_4 = arith.constant 0 : index
    %2 = vector.load %arg5[%c0_2, %c0_3, %c0_4] : memref<9x64x32xbf16, #tpu.memory_space<vmem>>, vector<1x64x32xbf16>
    %3 = vector.shape_cast %2 : vector<1x64x32xbf16> to vector<64x32xbf16>
    %4 = vector.extract_strided_slice %1 {offsets = [0, 0], sizes = [32, 166], strides = [1, 1]} : vector<32x196xbf16> to vector<32x166xbf16>
    %cst = arith.constant dense<0.000000e+00> : vector<64x166xf32>
    %5 = tpu.matmul %3, %4, %cst {dimension_numbers = #tpu.dot_dimension_numbers<[1], [0], [0], [1], [0, 0, 1, 1], [], []>} : vector<64x32xbf16>, vector<32x166xbf16>, vector<64x166xf32> -> vector<64x166xf32>
    %c0_5 = arith.constant 0 : index
    %c0_6 = arith.constant 0 : index
    %6 = vector.load %arg10[%c0_5, %c0_6] : memref<64x166xf32, #tpu.memory_space<vmem>>, vector<64x166xf32>
    tpu.vector_store %arg10[%c0_5, %c0_6], %5 {strides = array<i32>} : memref<64x166xf32, #tpu.memory_space<vmem>>, vector<64x166xf32>,
    %c1 = arith.constant 1 : index
    %c0_7 = arith.constant 0 : index
    %c0_8 = arith.constant 0 : index
    %7 = vector.load %arg5[%c1, %c0_7, %c0_8] : memref<9x64x32xbf16, #tpu.memory_space<vmem>>, vector<1x64x32xbf16>
    %8 = vector.shape_cast %7 : vector<1x64x32xbf16> to vector<64x32xbf16>
    %9 = vector.extract_strided_slice %1 {offsets = [0, 1], sizes = [32, 166], strides = [1, 1]} : vector<32x196xbf16> to vector<32x166xbf16>
    %cst_9 = arith.constant dense<0.000000e+00> : vector<64x166xf32>
    %10 = tpu.matmul %8, %9, %cst_9 {dimension_numbers = #tpu.dot_dimension_numbers<[1], [0], [0], [1], [0, 0, 1, 1], [], []>} : vector<64x32xbf16>, vector<32x166xbf16>, vector<64x166xf32> -> vector<64x166xf32>
    %c0_10 = arith.constant 0 : index
    %c0_11 = arith.constant 0 : index
    %11 = vector.load %arg10[%c0_10, %c0_11] : memref<64x166xf32, #tpu.memory_space<vmem>>, vector<64x166xf32>
    %12 = arith.addf %11, %10 : vector<64x166xf32>
    %c0_12 = arith.constant 0 : index
    %c0_13 = arith.constant 0 : index
    %13 = vector.load %arg10[%c0_12, %c0_13] : memref<64x166xf32, #tpu.memory_space<vmem>>, vector<64x166xf32>
    tpu.vector_store %arg10[%c0_12, %c0_13], %12 {strides = array<i32>} : memref<64x166xf32, #tpu.memory_space<vmem>>, vector<64x166xf32>,
    %c2 = arith.constant 2 : index
    %c0_14 = arith.constant 0 : index
    %c0_15 = arith.constant 0 : index
    %14 = vector.load %arg5[%c2, %c0_14, %c0_15] : memref<9x64x32xbf16, #tpu.memory_space<vmem>>, vector<1x64x32xbf16>
    %15 = vector.shape_cast %14 : vector<1x64x32xbf16> to vector<64x32xbf16>
    %16 = vector.extract_strided_slice %1 {offsets = [0, 2], sizes = [32, 166], strides = [1, 1]} : vector<32x196xbf16> to vector<32x166xbf16>
    %cst_16 = arith.constant dense<0.000000e+00> : vector<64x166xf32>
    %17 = tpu.matmul %15, %16, %cst_16 {dimension_numbers = #tpu.dot_dimension_numbers<[1], [0], [0], [1], [0, 0, 1, 1], [], []>} : vector<64x32xbf16>, vector<32x166xbf16>, vector<64x166xf32> -> vector<64x166xf32>
    %c0_17 = arith.constant 0 : index
    %c0_18 = arith.constant 0 : index
    %18 = vector.load %arg10[%c0_17, %c0_18] : memref<64x166xf32, #tpu.memory_space<vmem>>, vector<64x166xf32>
    %19 = arith.addf %18, %17 : vector<64x166xf32>
    %c0_19 = arith.constant 0 : index
    %c0_20 = arith.constant 0 : index
    %20 = vector.load %arg10[%c0_19, %c0_20] : memref<64x166xf32, #tpu.memory_space<vmem>>, vector<64x166xf32>
    tpu.vector_store %arg10[%c0_19, %c0_20], %19 {strides = array<i32>} : memref<64x166xf32, #tpu.memory_space<vmem>>, vector<64x166xf32>,
    %c3 = arith.constant 3 : index
    %c0_21 = arith.constant 0 : index
    %c0_22 = arith.constant 0 : index
    %21 = vector.load %arg5[%c3, %c0_21, %c0_22] : memref<9x64x32xbf16, #tpu.memory_space<vmem>>, vector<1x64x32xbf16>
    %22 = vector.shape_cast %21 : vector<1x64x32xbf16> to vector<64x32xbf16>
    %23 = vector.extract_strided_slice %1 {offsets = [0, 14], sizes = [32, 166], strides = [1, 1]} : vector<32x196xbf16> to vector<32x166xbf16>
    %cst_23 = arith.constant dense<0.000000e+00> : vector<64x166xf32>
    %24 = tpu.matmul %22, %23, %cst_23 {dimension_numbers = #tpu.dot_dimension_numbers<[1], [0], [0], [1], [0, 0, 1, 1], [], []>} : vector<64x32xbf16>, vector<32x166xbf16>, vector<64x166xf32> -> vector<64x166xf32>
    %c0_24 = arith.constant 0 : index
    %c0_25 = arith.constant 0 : index
    %25 = vector.load %arg10[%c0_24, %c0_25] : memref<64x166xf32, #tpu.memory_space<vmem>>, vector<64x166xf32>
    %26 = arith.addf %25, %24 : vector<64x166xf32>
    %c0_26 = arith.constant 0 : index
    %c0_27 = arith.constant 0 : index
    %27 = vector.load %arg10[%c0_26, %c0_27] : memref<64x166xf32, #tpu.memory_space<vmem>>, vector<64x166xf32>
    tpu.vector_store %arg10[%c0_26, %c0_27], %26 {strides = array<i32>} : memref<64x166xf32, #tpu.memory_space<vmem>>, vector<64x166xf32>,
    %c4 = arith.constant 4 : index
    %c0_28 = arith.constant 0 : index
    %c0_29 = arith.constant 0 : index
    %28 = vector.load %arg5[%c4, %c0_28, %c0_29] : memref<9x64x32xbf16, #tpu.memory_space<vmem>>, vector<1x64x32xbf16>
    %29 = vector.shape_cast %28 : vector<1x64x32xbf16> to vector<64x32xbf16>
    %30 = vector.extract_strided_slice %1 {offsets = [0, 15], sizes = [32, 166], strides = [1, 1]} : vector<32x196xbf16> to vector<32x166xbf16>
    %cst_30 = arith.constant dense<0.000000e+00> : vector<64x166xf32>
    %31 = tpu.matmul %29, %30, %cst_30 {dimension_numbers = #tpu.dot_dimension_numbers<[1], [0], [0], [1], [0, 0, 1, 1], [], []>} : vector<64x32xbf16>, vector<32x166xbf16>, vector<64x166xf32> -> vector<64x166xf32>
    %c0_31 = arith.constant 0 : index
    %c0_32 = arith.constant 0 : index
    %32 = vector.load %arg10[%c0_31, %c0_32] : memref<64x166xf32, #tpu.memory_space<vmem>>, vector<64x166xf32>
    %33 = arith.addf %32, %31 : vector<64x166xf32>
    %c0_33 = arith.constant 0 : index
    %c0_34 = arith.constant 0 : index
    %34 = vector.load %arg10[%c0_33, %c0_34] : memref<64x166xf32, #tpu.memory_space<vmem>>, vector<64x166xf32>
    tpu.vector_store %arg10[%c0_33, %c0_34], %33 {strides = array<i32>} : memref<64x166xf32, #tpu.memory_space<vmem>>, vector<64x166xf32>,
    %c5 = arith.constant 5 : index
    %c0_35 = arith.constant 0 : index
    %c0_36 = arith.constant 0 : index
    %35 = vector.load %arg5[%c5, %c0_35, %c0_36] : memref<9x64x32xbf16, #tpu.memory_space<vmem>>, vector<1x64x32xbf16>
    %36 = vector.shape_cast %35 : vector<1x64x32xbf16> to vector<64x32xbf16>
    %37 = vector.extract_strided_slice %1 {offsets = [0, 16], sizes = [32, 166], strides = [1, 1]} : vector<32x196xbf16> to vector<32x166xbf16>
    %cst_37 = arith.constant dense<0.000000e+00> : vector<64x166xf32>
    %38 = tpu.matmul %36, %37, %cst_37 {dimension_numbers = #tpu.dot_dimension_numbers<[1], [0], [0], [1], [0, 0, 1, 1], [], []>} : vector<64x32xbf16>, vector<32x166xbf16>, vector<64x166xf32> -> vector<64x166xf32>
    %c0_38 = arith.constant 0 : index
    %c0_39 = arith.constant 0 : index
    %39 = vector.load %arg10[%c0_38, %c0_39] : memref<64x166xf32, #tpu.memory_space<vmem>>, vector<64x166xf32>
    %40 = arith.addf %39, %38 : vector<64x166xf32>
    %c0_40 = arith.constant 0 : index
    %c0_41 = arith.constant 0 : index
    %41 = vector.load %arg10[%c0_40, %c0_41] : memref<64x166xf32, #tpu.memory_space<vmem>>, vector<64x166xf32>
    tpu.vector_store %arg10[%c0_40, %c0_41], %40 {strides = array<i32>} : memref<64x166xf32, #tpu.memory_space<vmem>>, vector<64x166xf32>,
    %c6 = arith.constant 6 : index
    %c0_42 = arith.constant 0 : index
    %c0_43 = arith.constant 0 : index
    %42 = vector.load %arg5[%c6, %c0_42, %c0_43] : memref<9x64x32xbf16, #tpu.memory_space<vmem>>, vector<1x64x32xbf16>
    %43 = vector.shape_cast %42 : vector<1x64x32xbf16> to vector<64x32xbf16>
    %44 = vector.extract_strided_slice %1 {offsets = [0, 28], sizes = [32, 166], strides = [1, 1]} : vector<32x196xbf16> to vector<32x166xbf16>
    %cst_44 = arith.constant dense<0.000000e+00> : vector<64x166xf32>
    %45 = tpu.matmul %43, %44, %cst_44 {dimension_numbers = #tpu.dot_dimension_numbers<[1], [0], [0], [1], [0, 0, 1, 1], [], []>} : vector<64x32xbf16>, vector<32x166xbf16>, vector<64x166xf32> -> vector<64x166xf32>
    %c0_45 = arith.constant 0 : index
    %c0_46 = arith.constant 0 : index
    %46 = vector.load %arg10[%c0_45, %c0_46] : memref<64x166xf32, #tpu.memory_space<vmem>>, vector<64x166xf32>
    %47 = arith.addf %46, %45 : vector<64x166xf32>
    %c0_47 = arith.constant 0 : index
    %c0_48 = arith.constant 0 : index
    %48 = vector.load %arg10[%c0_47, %c0_48] : memref<64x166xf32, #tpu.memory_space<vmem>>, vector<64x166xf32>
    tpu.vector_store %arg10[%c0_47, %c0_48], %47 {strides = array<i32>} : memref<64x166xf32, #tpu.memory_space<vmem>>, vector<64x166xf32>,
    %c7 = arith.constant 7 : index
    %c0_49 = arith.constant 0 : index
    %c0_50 = arith.constant 0 : index
    %49 = vector.load %arg5[%c7, %c0_49, %c0_50] : memref<9x64x32xbf16, #tpu.memory_space<vmem>>, vector<1x64x32xbf16>
    %50 = vector.shape_cast %49 : vector<1x64x32xbf16> to vector<64x32xbf16>
    %51 = vector.extract_strided_slice %1 {offsets = [0, 29], sizes = [32, 166], strides = [1, 1]} : vector<32x196xbf16> to vector<32x166xbf16>
    %cst_51 = arith.constant dense<0.000000e+00> : vector<64x166xf32>
    %52 = tpu.matmul %50, %51, %cst_51 {dimension_numbers = #tpu.dot_dimension_numbers<[1], [0], [0], [1], [0, 0, 1, 1], [], []>} : vector<64x32xbf16>, vector<32x166xbf16>, vector<64x166xf32> -> vector<64x166xf32>
    %c0_52 = arith.constant 0 : index
    %c0_53 = arith.constant 0 : index
    %53 = vector.load %arg10[%c0_52, %c0_53] : memref<64x166xf32, #tpu.memory_space<vmem>>, vector<64x166xf32>
    %54 = arith.addf %53, %52 : vector<64x166xf32>
    %c0_54 = arith.constant 0 : index
    %c0_55 = arith.constant 0 : index
    %55 = vector.load %arg10[%c0_54, %c0_55] : memref<64x166xf32, #tpu.memory_space<vmem>>, vector<64x166xf32>
    tpu.vector_store %arg10[%c0_54, %c0_55], %54 {strides = array<i32>} : memref<64x166xf32, #tpu.memory_space<vmem>>, vector<64x166xf32>,
    %c8 = arith.constant 8 : index
    %c0_56 = arith.constant 0 : index
    %c0_57 = arith.constant 0 : index
    %56 = vector.load %arg5[%c8, %c0_56, %c0_57] : memref<9x64x32xbf16, #tpu.memory_space<vmem>>, vector<1x64x32xbf16>
    %57 = vector.shape_cast %56 : vector<1x64x32xbf16> to vector<64x32xbf16>
    %58 = vector.extract_strided_slice %1 {offsets = [0, 30], sizes = [32, 166], strides = [1, 1]} : vector<32x196xbf16> to vector<32x166xbf16>
    %cst_58 = arith.constant dense<0.000000e+00> : vector<64x166xf32>
    %59 = tpu.matmul %57, %58, %cst_58 {dimension_numbers = #tpu.dot_dimension_numbers<[1], [0], [0], [1], [0, 0, 1, 1], [], []>} : vector<64x32xbf16>, vector<32x166xbf16>, vector<64x166xf32> -> vector<64x166xf32>
    %c0_59 = arith.constant 0 : index
    %c0_60 = arith.constant 0 : index
    %60 = vector.load %arg10[%c0_59, %c0_60] : memref<64x166xf32, #tpu.memory_space<vmem>>, vector<64x166xf32>
    %61 = arith.addf %60, %59 : vector<64x166xf32>
    %c0_61 = arith.constant 0 : index
    %c0_62 = arith.constant 0 : index
    %62 = vector.load %arg10[%c0_61, %c0_62] : memref<64x166xf32, #tpu.memory_space<vmem>>, vector<64x166xf32>
    tpu.vector_store %arg10[%c0_61, %c0_62], %61 {strides = array<i32>} : memref<64x166xf32, #tpu.memory_space<vmem>>, vector<64x166xf32>,
    %c0_63 = arith.constant 0 : index
    %c0_64 = arith.constant 0 : index
    %63 = vector.load %arg10[%c0_63, %c0_64] : memref<64x166xf32, #tpu.memory_space<vmem>>, vector<64x166xf32>
    %c0_65 = arith.constant 0 : index
    %c0_66 = arith.constant 0 : index
    %64 = vector.load %arg6[%c0_65, %c0_66] : memref<64x1xf32, #tpu.memory_space<vmem>>, vector<64x1xf32>
    %65 = vector.broadcast %64 : vector<64x1xf32> to vector<64x166xf32>
    %66 = arith.addf %63, %65 : vector<64x166xf32>
    %c0_67 = arith.constant 0 : index
    %c0_68 = arith.constant 0 : index
    %67 = vector.load %arg10[%c0_67, %c0_68] : memref<64x166xf32, #tpu.memory_space<vmem>>, vector<64x166xf32>
    tpu.vector_store %arg10[%c0_67, %c0_68], %66 {strides = array<i32>} : memref<64x166xf32, #tpu.memory_space<vmem>>, vector<64x166xf32>,
    %c0_69 = arith.constant 0 : index
    %c0_70 = arith.constant 0 : index
    %68 = vector.load %arg10[%c0_69, %c0_70] : memref<64x166xf32, #tpu.memory_space<vmem>>, vector<32x166xf32>
    %c32 = arith.constant 32 : index
    %c0_71 = arith.constant 0 : index
    %69 = vector.load %arg10[%c32, %c0_71] : memref<64x166xf32, #tpu.memory_space<vmem>>, vector<32x166xf32>
    %c0_72 = arith.constant 0 : index
    %c0_73 = arith.constant 0 : index
    %c0_74 = arith.constant 0 : index
    %70 = vector.load %arg1[%c0_72, %c0_73, %c0_74] : memref<1x16x288xf32, #tpu.memory_space<vmem>>, vector<1x16x288xf32>
    %71 = vector.shape_cast %70 : vector<1x16x288xf32> to vector<16x288xf32>
    %c0_75 = arith.constant 0 : index
    %c0_76 = arith.constant 0 : index
    %c0_77 = arith.constant 0 : index
    %72 = vector.load %arg3[%c0_75, %c0_76, %c0_77] : memref<6x288x32xf32, #tpu.memory_space<vmem>>, vector<1x288x32xf32>
    %73 = vector.shape_cast %72 : vector<1x288x32xf32> to vector<288x32xf32>
    %cst_78 = arith.constant dense<0.000000e+00> : vector<16x32xf32>
    %74 = tpu.matmul %71, %73, %cst_78 {dimension_numbers = #tpu.dot_dimension_numbers<[1], [0], [0], [1], [0, 0, 1, 1], [], []>} : vector<16x288xf32>, vector<288x32xf32>, vector<16x32xf32> -> vector<16x32xf32>
    %c0_79 = arith.constant 0 : index
    %c0_80 = arith.constant 0 : index
    %c0_81 = arith.constant 0 : index
    %75 = vector.load %arg4[%c0_79, %c0_80, %c0_81] : memref<6x1x32xf32, #tpu.memory_space<vmem>>, vector<1x1x32xf32>
    %76 = vector.shape_cast %75 : vector<1x1x32xf32> to vector<1x32xf32>
    %77 = vector.broadcast %76 : vector<1x32xf32> to vector<16x32xf32>
    %78 = arith.addf %74, %77 : vector<16x32xf32>
    %cst_82 = arith.constant dense<0.000000e+00> : vector<16x166xf32>
    %79 = tpu.matmul %78, %68, %cst_82 {dimension_numbers = #tpu.dot_dimension_numbers<[1], [0], [0], [1], [0, 0, 1, 1], [], []>} : vector<16x32xf32>, vector<32x166xf32>, vector<16x166xf32> -> vector<16x166xf32>
    %80 = vector.extract_strided_slice %79 {offsets = [0, 0], sizes = [1, 121], strides = [1, 1]} : vector<16x166xf32> to vector<1x121xf32>
    %81 = vector.extract_strided_slice %79 {offsets = [1, 1], sizes = [1, 121], strides = [1, 1]} : vector<16x166xf32> to vector<1x121xf32>
    %82 = arith.addf %80, %81 : vector<1x121xf32>
    %83 = vector.extract_strided_slice %79 {offsets = [2, 2], sizes = [1, 121], strides = [1, 1]} : vector<16x166xf32> to vector<1x121xf32>
    %84 = arith.addf %82, %83 : vector<1x121xf32>
    %85 = vector.extract_strided_slice %79 {offsets = [3, 3], sizes = [1, 121], strides = [1, 1]} : vector<16x166xf32> to vector<1x121xf32>
    %86 = arith.addf %84, %85 : vector<1x121xf32>
    %87 = vector.extract_strided_slice %79 {offsets = [4, 14], sizes = [1, 121], strides = [1, 1]} : vector<16x166xf32> to vector<1x121xf32>
    %88 = arith.addf %86, %87 : vector<1x121xf32>
    %89 = vector.extract_strided_slice %79 {offsets = [5, 15], sizes = [1, 121], strides = [1, 1]} : vector<16x166xf32> to vector<1x121xf32>
    %90 = arith.addf %88, %89 : vector<1x121xf32>
    %91 = vector.extract_strided_slice %79 {offsets = [6, 16], sizes = [1, 121], strides = [1, 1]} : vector<16x166xf32> to vector<1x121xf32>
    %92 = arith.addf %90, %91 : vector<1x121xf32>
    %93 = vector.extract_strided_slice %79 {offsets = [7, 17], sizes = [1, 121], strides = [1, 1]} : vector<16x166xf32> to vector<1x121xf32>
    %94 = arith.addf %92, %93 : vector<1x121xf32>
    %95 = vector.extract_strided_slice %79 {offsets = [8, 28], sizes = [1, 121], strides = [1, 1]} : vector<16x166xf32> to vector<1x121xf32>
    %96 = arith.addf %94, %95 : vector<1x121xf32>
    %97 = vector.extract_strided_slice %79 {offsets = [9, 29], sizes = [1, 121], strides = [1, 1]} : vector<16x166xf32> to vector<1x121xf32>
    %98 = arith.addf %96, %97 : vector<1x121xf32>
    %99 = vector.extract_strided_slice %79 {offsets = [10, 30], sizes = [1, 121], strides = [1, 1]} : vector<16x166xf32> to vector<1x121xf32>
    %100 = arith.addf %98, %99 : vector<1x121xf32>
    %101 = vector.extract_strided_slice %79 {offsets = [11, 31], sizes = [1, 121], strides = [1, 1]} : vector<16x166xf32> to vector<1x121xf32>
    %102 = arith.addf %100, %101 : vector<1x121xf32>
    %103 = vector.extract_strided_slice %79 {offsets = [12, 42], sizes = [1, 121], strides = [1, 1]} : vector<16x166xf32> to vector<1x121xf32>
    %104 = arith.addf %102, %103 : vector<1x121xf32>
    %105 = vector.extract_strided_slice %79 {offsets = [13, 43], sizes = [1, 121], strides = [1, 1]} : vector<16x166xf32> to vector<1x121xf32>
    %106 = arith.addf %104, %105 : vector<1x121xf32>
    %107 = vector.extract_strided_slice %79 {offsets = [14, 44], sizes = [1, 121], strides = [1, 1]} : vector<16x166xf32> to vector<1x121xf32>
    %108 = arith.addf %106, %107 : vector<1x121xf32>
    %109 = vector.extract_strided_slice %79 {offsets = [15, 45], sizes = [1, 121], strides = [1, 1]} : vector<16x166xf32> to vector<1x121xf32>
    %110 = arith.addf %108, %109 : vector<1x121xf32>
    %111 = vector.extract_strided_slice %110 {offsets = [0, 0], sizes = [1, 9], strides = [1, 1]} : vector<1x121xf32> to vector<1x9xf32>
    %c0_83 = arith.constant 0 : index
    %c0_84 = arith.constant 0 : index
    %c0_85 = arith.constant 0 : index
    %112 = vector.load %arg8[%c0_83, %c0_84, %c0_85] : memref<1x2x81xf32, #tpu.memory_space<vmem>>, vector<1x1x9xf32>
    %113 = vector.shape_cast %112 : vector<1x1x9xf32> to vector<1x9xf32>
    %114 = vector.shape_cast %111 : vector<1x9xf32> to vector<1x1x9xf32>
    tpu.vector_store %arg8[%c0_83, %c0_84, %c0_85], %114 {strides = array<i32>} : memref<1x2x81xf32, #tpu.memory_space<vmem>>, vector<1x1x9xf32>,
    %115 = vector.extract_strided_slice %110 {offsets = [0, 14], sizes = [1, 9], strides = [1, 1]} : vector<1x121xf32> to vector<1x9xf32>
    %c0_86 = arith.constant 0 : index
    %c0_87 = arith.constant 0 : index
    %c9 = arith.constant 9 : index
    %116 = vector.load %arg8[%c0_86, %c0_87, %c9] : memref<1x2x81xf32, #tpu.memory_space<vmem>>, vector<1x1x9xf32>
    %117 = vector.shape_cast %116 : vector<1x1x9xf32> to vector<1x9xf32>
    %118 = vector.shape_cast %115 : vector<1x9xf32> to vector<1x1x9xf32>
    tpu.vector_store %arg8[%c0_86, %c0_87, %c9], %118 {strides = array<i32>} : memref<1x2x81xf32, #tpu.memory_space<vmem>>, vector<1x1x9xf32>,
    %119 = vector.extract_strided_slice %110 {offsets = [0, 28], sizes = [1, 9], strides = [1, 1]} : vector<1x121xf32> to vector<1x9xf32>
    %c0_88 = arith.constant 0 : index
    %c0_89 = arith.constant 0 : index
    %c18 = arith.constant 18 : index
    %120 = vector.load %arg8[%c0_88, %c0_89, %c18] : memref<1x2x81xf32, #tpu.memory_space<vmem>>, vector<1x1x9xf32>
    %121 = vector.shape_cast %120 : vector<1x1x9xf32> to vector<1x9xf32>
    %122 = vector.shape_cast %119 : vector<1x9xf32> to vector<1x1x9xf32>
    tpu.vector_store %arg8[%c0_88, %c0_89, %c18], %122 {strides = array<i32>} : memref<1x2x81xf32, #tpu.memory_space<vmem>>, vector<1x1x9xf32>,
    %123 = vector.extract_strided_slice %110 {offsets = [0, 42], sizes = [1, 9], strides = [1, 1]} : vector<1x121xf32> to vector<1x9xf32>
    %c0_90 = arith.constant 0 : index
    %c0_91 = arith.constant 0 : index
    %c27 = arith.constant 27 : index
    %124 = vector.load %arg8[%c0_90, %c0_91, %c27] : memref<1x2x81xf32, #tpu.memory_space<vmem>>, vector<1x1x9xf32>
    %125 = vector.shape_cast %124 : vector<1x1x9xf32> to vector<1x9xf32>
    %126 = vector.shape_cast %123 : vector<1x9xf32> to vector<1x1x9xf32>
    tpu.vector_store %arg8[%c0_90, %c0_91, %c27], %126 {strides = array<i32>} : memref<1x2x81xf32, #tpu.memory_space<vmem>>, vector<1x1x9xf32>,
    %127 = vector.extract_strided_slice %110 {offsets = [0, 56], sizes = [1, 9], strides = [1, 1]} : vector<1x121xf32> to vector<1x9xf32>
    %c0_92 = arith.constant 0 : index
    %c0_93 = arith.constant 0 : index
    %c36 = arith.constant 36 : index
    %128 = vector.load %arg8[%c0_92, %c0_93, %c36] : memref<1x2x81xf32, #tpu.memory_space<vmem>>, vector<1x1x9xf32>
    %129 = vector.shape_cast %128 : vector<1x1x9xf32> to vector<1x9xf32>
    %130 = vector.shape_cast %127 : vector<1x9xf32> to vector<1x1x9xf32>
    tpu.vector_store %arg8[%c0_92, %c0_93, %c36], %130 {strides = array<i32>} : memref<1x2x81xf32, #tpu.memory_space<vmem>>, vector<1x1x9xf32>,
    %131 = vector.extract_strided_slice %110 {offsets = [0, 70], sizes = [1, 9], strides = [1, 1]} : vector<1x121xf32> to vector<1x9xf32>
    %c0_94 = arith.constant 0 : index
    %c0_95 = arith.constant 0 : index
    %c45 = arith.constant 45 : index
    %132 = vector.load %arg8[%c0_94, %c0_95, %c45] : memref<1x2x81xf32, #tpu.memory_space<vmem>>, vector<1x1x9xf32>
    %133 = vector.shape_cast %132 : vector<1x1x9xf32> to vector<1x9xf32>
    %134 = vector.shape_cast %131 : vector<1x9xf32> to vector<1x1x9xf32>
    tpu.vector_store %arg8[%c0_94, %c0_95, %c45], %134 {strides = array<i32>} : memref<1x2x81xf32, #tpu.memory_space<vmem>>, vector<1x1x9xf32>,
    %135 = vector.extract_strided_slice %110 {offsets = [0, 84], sizes = [1, 9], strides = [1, 1]} : vector<1x121xf32> to vector<1x9xf32>
    %c0_96 = arith.constant 0 : index
    %c0_97 = arith.constant 0 : index
    %c54 = arith.constant 54 : index
    %136 = vector.load %arg8[%c0_96, %c0_97, %c54] : memref<1x2x81xf32, #tpu.memory_space<vmem>>, vector<1x1x9xf32>
    %137 = vector.shape_cast %136 : vector<1x1x9xf32> to vector<1x9xf32>
    %138 = vector.shape_cast %135 : vector<1x9xf32> to vector<1x1x9xf32>
    tpu.vector_store %arg8[%c0_96, %c0_97, %c54], %138 {strides = array<i32>} : memref<1x2x81xf32, #tpu.memory_space<vmem>>, vector<1x1x9xf32>,
    %139 = vector.extract_strided_slice %110 {offsets = [0, 98], sizes = [1, 9], strides = [1, 1]} : vector<1x121xf32> to vector<1x9xf32>
    %c0_98 = arith.constant 0 : index
    %c0_99 = arith.constant 0 : index
    %c63 = arith.constant 63 : index
    %140 = vector.load %arg8[%c0_98, %c0_99, %c63] : memref<1x2x81xf32, #tpu.memory_space<vmem>>, vector<1x1x9xf32>
    %141 = vector.shape_cast %140 : vector<1x1x9xf32> to vector<1x9xf32>
    %142 = vector.shape_cast %139 : vector<1x9xf32> to vector<1x1x9xf32>
    tpu.vector_store %arg8[%c0_98, %c0_99, %c63], %142 {strides = array<i32>} : memref<1x2x81xf32, #tpu.memory_space<vmem>>, vector<1x1x9xf32>,
    %143 = vector.extract_strided_slice %110 {offsets = [0, 112], sizes = [1, 9], strides = [1, 1]} : vector<1x121xf32> to vector<1x9xf32>
    %c0_100 = arith.constant 0 : index
    %c0_101 = arith.constant 0 : index
    %c72 = arith.constant 72 : index
    %144 = vector.load %arg8[%c0_100, %c0_101, %c72] : memref<1x2x81xf32, #tpu.memory_space<vmem>>, vector<1x1x9xf32>
    %145 = vector.shape_cast %144 : vector<1x1x9xf32> to vector<1x9xf32>
    %146 = vector.shape_cast %143 : vector<1x9xf32> to vector<1x1x9xf32>
    tpu.vector_store %arg8[%c0_100, %c0_101, %c72], %146 {strides = array<i32>} : memref<1x2x81xf32, #tpu.memory_space<vmem>>, vector<1x1x9xf32>,
    %c1_102 = arith.constant 1 : index
    %c0_103 = arith.constant 0 : index
    %c0_104 = arith.constant 0 : index
    %147 = vector.load %arg3[%c1_102, %c0_103, %c0_104] : memref<6x288x32xf32, #tpu.memory_space<vmem>>, vector<1x288x32xf32>
    %148 = vector.shape_cast %147 : vector<1x288x32xf32> to vector<288x32xf32>
    %cst_105 = arith.constant dense<0.000000e+00> : vector<16x32xf32>
    %149 = tpu.matmul %71, %148, %cst_105 {dimension_numbers = #tpu.dot_dimension_numbers<[1], [0], [0], [1], [0, 0, 1, 1], [], []>} : vector<16x288xf32>, vector<288x32xf32>, vector<16x32xf32> -> vector<16x32xf32>
    %c1_106 = arith.constant 1 : index
    %c0_107 = arith.constant 0 : index
    %c0_108 = arith.constant 0 : index
    %150 = vector.load %arg4[%c1_106, %c0_107, %c0_108] : memref<6x1x32xf32, #tpu.memory_space<vmem>>, vector<1x1x32xf32>
    %151 = vector.shape_cast %150 : vector<1x1x32xf32> to vector<1x32xf32>
    %152 = vector.broadcast %151 : vector<1x32xf32> to vector<16x32xf32>
    %153 = arith.addf %149, %152 : vector<16x32xf32>
    %cst_109 = arith.constant dense<0.000000e+00> : vector<16x166xf32>
    %154 = tpu.matmul %153, %68, %cst_109 {dimension_numbers = #tpu.dot_dimension_numbers<[1], [0], [0], [1], [0, 0, 1, 1], [], []>} : vector<16x32xf32>, vector<32x166xf32>, vector<16x166xf32> -> vector<16x166xf32>
    %155 = vector.extract_strided_slice %154 {offsets = [0, 0], sizes = [1, 121], strides = [1, 1]} : vector<16x166xf32> to vector<1x121xf32>
    %156 = vector.extract_strided_slice %154 {offsets = [1, 1], sizes = [1, 121], strides = [1, 1]} : vector<16x166xf32> to vector<1x121xf32>
    %157 = arith.addf %155, %156 : vector<1x121xf32>
    %158 = vector.extract_strided_slice %154 {offsets = [2, 2], sizes = [1, 121], strides = [1, 1]} : vector<16x166xf32> to vector<1x121xf32>
    %159 = arith.addf %157, %158 : vector<1x121xf32>
    %160 = vector.extract_strided_slice %154 {offsets = [3, 3], sizes = [1, 121], strides = [1, 1]} : vector<16x166xf32> to vector<1x121xf32>
    %161 = arith.addf %159, %160 : vector<1x121xf32>
    %162 = vector.extract_strided_slice %154 {offsets = [4, 14], sizes = [1, 121], strides = [1, 1]} : vector<16x166xf32> to vector<1x121xf32>
    %163 = arith.addf %161, %162 : vector<1x121xf32>
    %164 = vector.extract_strided_slice %154 {offsets = [5, 15], sizes = [1, 121], strides = [1, 1]} : vector<16x166xf32> to vector<1x121xf32>
    %165 = arith.addf %163, %164 : vector<1x121xf32>
    %166 = vector.extract_strided_slice %154 {offsets = [6, 16], sizes = [1, 121], strides = [1, 1]} : vector<16x166xf32> to vector<1x121xf32>
    %167 = arith.addf %165, %166 : vector<1x121xf32>
    %168 = vector.extract_strided_slice %154 {offsets = [7, 17], sizes = [1, 121], strides = [1, 1]} : vector<16x166xf32> to vector<1x121xf32>
    %169 = arith.addf %167, %168 : vector<1x121xf32>
    %170 = vector.extract_strided_slice %154 {offsets = [8, 28], sizes = [1, 121], strides = [1, 1]} : vector<16x166xf32> to vector<1x121xf32>
    %171 = arith.addf %169, %170 : vector<1x121xf32>
    %172 = vector.extract_strided_slice %154 {offsets = [9, 29], sizes = [1, 121], strides = [1, 1]} : vector<16x166xf32> to vector<1x121xf32>
    %173 = arith.addf %171, %172 : vector<1x121xf32>
    %174 = vector.extract_strided_slice %154 {offsets = [10, 30], sizes = [1, 121], strides = [1, 1]} : vector<16x166xf32> to vector<1x121xf32>
    %175 = arith.addf %173, %174 : vector<1x121xf32>
    %176 = vector.extract_strided_slice %154 {offsets = [11, 31], sizes = [1, 121], strides = [1, 1]} : vector<16x166xf32> to vector<1x121xf32>
    %177 = arith.addf %175, %176 : vector<1x121xf32>
    %178 = vector.extract_strided_slice %154 {offsets = [12, 42], sizes = [1, 121], strides = [1, 1]} : vector<16x166xf32> to vector<1x121xf32>
    %179 = arith.addf %177, %178 : vector<1x121xf32>
    %180 = vector.extract_strided_slice %154 {offsets = [13, 43], sizes = [1, 121], strides = [1, 1]} : vector<16x166xf32> to vector<1x121xf32>
    %181 = arith.addf %179, %180 : vector<1x121xf32>
    %182 = vector.extract_strided_slice %154 {offsets = [14, 44], sizes = [1, 121], strides = [1, 1]} : vector<16x166xf32> to vector<1x121xf32>
    %183 = arith.addf %181, %182 : vector<1x121xf32>
    %184 = vector.extract_strided_slice %154 {offsets = [15, 45], sizes = [1, 121], strides = [1, 1]} : vector<16x166xf32> to vector<1x121xf32>
    %185 = arith.addf %183, %184 : vector<1x121xf32>
    %186 = vector.extract_strided_slice %185 {offsets = [0, 0], sizes = [1, 9], strides = [1, 1]} : vector<1x121xf32> to vector<1x9xf32>
    %c0_110 = arith.constant 0 : index
    %c1_111 = arith.constant 1 : index
    %c0_112 = arith.constant 0 : index
    %187 = vector.load %arg8[%c0_110, %c1_111, %c0_112] : memref<1x2x81xf32, #tpu.memory_space<vmem>>, vector<1x1x9xf32>
    %188 = vector.shape_cast %187 : vector<1x1x9xf32> to vector<1x9xf32>
    %189 = vector.shape_cast %186 : vector<1x9xf32> to vector<1x1x9xf32>
    tpu.vector_store %arg8[%c0_110, %c1_111, %c0_112], %189 {strides = array<i32>} : memref<1x2x81xf32, #tpu.memory_space<vmem>>, vector<1x1x9xf32>,
    %190 = vector.extract_strided_slice %185 {offsets = [0, 14], sizes = [1, 9], strides = [1, 1]} : vector<1x121xf32> to vector<1x9xf32>
    %c0_113 = arith.constant 0 : index
    %c1_114 = arith.constant 1 : index
    %c9_115 = arith.constant 9 : index
    %191 = vector.load %arg8[%c0_113, %c1_114, %c9_115] : memref<1x2x81xf32, #tpu.memory_space<vmem>>, vector<1x1x9xf32>
    %192 = vector.shape_cast %191 : vector<1x1x9xf32> to vector<1x9xf32>
    %193 = vector.shape_cast %190 : vector<1x9xf32> to vector<1x1x9xf32>
    tpu.vector_store %arg8[%c0_113, %c1_114, %c9_115], %193 {strides = array<i32>} : memref<1x2x81xf32, #tpu.memory_space<vmem>>, vector<1x1x9xf32>,
    %194 = vector.extract_strided_slice %185 {offsets = [0, 28], sizes = [1, 9], strides = [1, 1]} : vector<1x121xf32> to vector<1x9xf32>
    %c0_116 = arith.constant 0 : index
    %c1_117 = arith.constant 1 : index
    %c18_118 = arith.constant 18 : index
    %195 = vector.load %arg8[%c0_116, %c1_117, %c18_118] : memref<1x2x81xf32, #tpu.memory_space<vmem>>, vector<1x1x9xf32>
    %196 = vector.shape_cast %195 : vector<1x1x9xf32> to vector<1x9xf32>
    %197 = vector.shape_cast %194 : vector<1x9xf32> to vector<1x1x9xf32>
    tpu.vector_store %arg8[%c0_116, %c1_117, %c18_118], %197 {strides = array<i32>} : memref<1x2x81xf32, #tpu.memory_space<vmem>>, vector<1x1x9xf32>,
    %198 = vector.extract_strided_slice %185 {offsets = [0, 42], sizes = [1, 9], strides = [1, 1]} : vector<1x121xf32> to vector<1x9xf32>
    %c0_119 = arith.constant 0 : index
    %c1_120 = arith.constant 1 : index
    %c27_121 = arith.constant 27 : index
    %199 = vector.load %arg8[%c0_119, %c1_120, %c27_121] : memref<1x2x81xf32, #tpu.memory_space<vmem>>, vector<1x1x9xf32>
    %200 = vector.shape_cast %199 : vector<1x1x9xf32> to vector<1x9xf32>
    %201 = vector.shape_cast %198 : vector<1x9xf32> to vector<1x1x9xf32>
    tpu.vector_store %arg8[%c0_119, %c1_120, %c27_121], %201 {strides = array<i32>} : memref<1x2x81xf32, #tpu.memory_space<vmem>>, vector<1x1x9xf32>,
    %202 = vector.extract_strided_slice %185 {offsets = [0, 56], sizes = [1, 9], strides = [1, 1]} : vector<1x121xf32> to vector<1x9xf32>
    %c0_122 = arith.constant 0 : index
    %c1_123 = arith.constant 1 : index
    %c36_124 = arith.constant 36 : index
    %203 = vector.load %arg8[%c0_122, %c1_123, %c36_124] : memref<1x2x81xf32, #tpu.memory_space<vmem>>, vector<1x1x9xf32>
    %204 = vector.shape_cast %203 : vector<1x1x9xf32> to vector<1x9xf32>
    %205 = vector.shape_cast %202 : vector<1x9xf32> to vector<1x1x9xf32>
    tpu.vector_store %arg8[%c0_122, %c1_123, %c36_124], %205 {strides = array<i32>} : memref<1x2x81xf32, #tpu.memory_space<vmem>>, vector<1x1x9xf32>,
    %206 = vector.extract_strided_slice %185 {offsets = [0, 70], sizes = [1, 9], strides = [1, 1]} : vector<1x121xf32> to vector<1x9xf32>
    %c0_125 = arith.constant 0 : index
    %c1_126 = arith.constant 1 : index
    %c45_127 = arith.constant 45 : index
    %207 = vector.load %arg8[%c0_125, %c1_126, %c45_127] : memref<1x2x81xf32, #tpu.memory_space<vmem>>, vector<1x1x9xf32>
    %208 = vector.shape_cast %207 : vector<1x1x9xf32> to vector<1x9xf32>
    %209 = vector.shape_cast %206 : vector<1x9xf32> to vector<1x1x9xf32>
    tpu.vector_store %arg8[%c0_125, %c1_126, %c45_127], %209 {strides = array<i32>} : memref<1x2x81xf32, #tpu.memory_space<vmem>>, vector<1x1x9xf32>,
    %210 = vector.extract_strided_slice %185 {offsets = [0, 84], sizes = [1, 9], strides = [1, 1]} : vector<1x121xf32> to vector<1x9xf32>
    %c0_128 = arith.constant 0 : index
    %c1_129 = arith.constant 1 : index
    %c54_130 = arith.constant 54 : index
    %211 = vector.load %arg8[%c0_128, %c1_129, %c54_130] : memref<1x2x81xf32, #tpu.memory_space<vmem>>, vector<1x1x9xf32>
    %212 = vector.shape_cast %211 : vector<1x1x9xf32> to vector<1x9xf32>
    %213 = vector.shape_cast %210 : vector<1x9xf32> to vector<1x1x9xf32>
    tpu.vector_store %arg8[%c0_128, %c1_129, %c54_130], %213 {strides = array<i32>} : memref<1x2x81xf32, #tpu.memory_space<vmem>>, vector<1x1x9xf32>,
    %214 = vector.extract_strided_slice %185 {offsets = [0, 98], sizes = [1, 9], strides = [1, 1]} : vector<1x121xf32> to vector<1x9xf32>
    %c0_131 = arith.constant 0 : index
    %c1_132 = arith.constant 1 : index
    %c63_133 = arith.constant 63 : index
    %215 = vector.load %arg8[%c0_131, %c1_132, %c63_133] : memref<1x2x81xf32, #tpu.memory_space<vmem>>, vector<1x1x9xf32>
    %216 = vector.shape_cast %215 : vector<1x1x9xf32> to vector<1x9xf32>
    %217 = vector.shape_cast %214 : vector<1x9xf32> to vector<1x1x9xf32>
    tpu.vector_store %arg8[%c0_131, %c1_132, %c63_133], %217 {strides = array<i32>} : memref<1x2x81xf32, #tpu.memory_space<vmem>>, vector<1x1x9xf32>,
    %218 = vector.extract_strided_slice %185 {offsets = [0, 112], sizes = [1, 9], strides = [1, 1]} : vector<1x121xf32> to vector<1x9xf32>
    %c0_134 = arith.constant 0 : index
    %c1_135 = arith.constant 1 : index
    %c72_136 = arith.constant 72 : index
    %219 = vector.load %arg8[%c0_134, %c1_135, %c72_136] : memref<1x2x81xf32, #tpu.memory_space<vmem>>, vector<1x1x9xf32>
    %220 = vector.shape_cast %219 : vector<1x1x9xf32> to vector<1x9xf32>
    %221 = vector.shape_cast %218 : vector<1x9xf32> to vector<1x1x9xf32>
    tpu.vector_store %arg8[%c0_134, %c1_135, %c72_136], %221 {strides = array<i32>} : memref<1x2x81xf32, #tpu.memory_space<vmem>>, vector<1x1x9xf32>,
    %c2_137 = arith.constant 2 : index
    %c0_138 = arith.constant 0 : index
    %c0_139 = arith.constant 0 : index
    %222 = vector.load %arg3[%c2_137, %c0_138, %c0_139] : memref<6x288x32xf32, #tpu.memory_space<vmem>>, vector<1x288x32xf32>
    %223 = vector.shape_cast %222 : vector<1x288x32xf32> to vector<288x32xf32>
    %cst_140 = arith.constant dense<0.000000e+00> : vector<16x32xf32>
    %224 = tpu.matmul %71, %223, %cst_140 {dimension_numbers = #tpu.dot_dimension_numbers<[1], [0], [0], [1], [0, 0, 1, 1], [], []>} : vector<16x288xf32>, vector<288x32xf32>, vector<16x32xf32> -> vector<16x32xf32>
    %c2_141 = arith.constant 2 : index
    %c0_142 = arith.constant 0 : index
    %c0_143 = arith.constant 0 : index
    %225 = vector.load %arg4[%c2_141, %c0_142, %c0_143] : memref<6x1x32xf32, #tpu.memory_space<vmem>>, vector<1x1x32xf32>
    %226 = vector.shape_cast %225 : vector<1x1x32xf32> to vector<1x32xf32>
    %227 = vector.broadcast %226 : vector<1x32xf32> to vector<16x32xf32>
    %228 = arith.addf %224, %227 : vector<16x32xf32>
    %cst_144 = arith.constant dense<0.000000e+00> : vector<16x166xf32>
    %229 = tpu.matmul %228, %69, %cst_144 {dimension_numbers = #tpu.dot_dimension_numbers<[1], [0], [0], [1], [0, 0, 1, 1], [], []>} : vector<16x32xf32>, vector<32x166xf32>, vector<16x166xf32> -> vector<16x166xf32>
    %230 = vector.extract_strided_slice %229 {offsets = [0, 0], sizes = [1, 121], strides = [1, 1]} : vector<16x166xf32> to vector<1x121xf32>
    %231 = vector.extract_strided_slice %229 {offsets = [1, 1], sizes = [1, 121], strides = [1, 1]} : vector<16x166xf32> to vector<1x121xf32>
    %232 = arith.addf %230, %231 : vector<1x121xf32>
    %233 = vector.extract_strided_slice %229 {offsets = [2, 2], sizes = [1, 121], strides = [1, 1]} : vector<16x166xf32> to vector<1x121xf32>
    %234 = arith.addf %232, %233 : vector<1x121xf32>
    %235 = vector.extract_strided_slice %229 {offsets = [3, 3], sizes = [1, 121], strides = [1, 1]} : vector<16x166xf32> to vector<1x121xf32>
    %236 = arith.addf %234, %235 : vector<1x121xf32>
    %237 = vector.extract_strided_slice %229 {offsets = [4, 14], sizes = [1, 121], strides = [1, 1]} : vector<16x166xf32> to vector<1x121xf32>
    %238 = arith.addf %236, %237 : vector<1x121xf32>
    %239 = vector.extract_strided_slice %229 {offsets = [5, 15], sizes = [1, 121], strides = [1, 1]} : vector<16x166xf32> to vector<1x121xf32>
    %240 = arith.addf %238, %239 : vector<1x121xf32>
    %241 = vector.extract_strided_slice %229 {offsets = [6, 16], sizes = [1, 121], strides = [1, 1]} : vector<16x166xf32> to vector<1x121xf32>
    %242 = arith.addf %240, %241 : vector<1x121xf32>
    %243 = vector.extract_strided_slice %229 {offsets = [7, 17], sizes = [1, 121], strides = [1, 1]} : vector<16x166xf32> to vector<1x121xf32>
    %244 = arith.addf %242, %243 : vector<1x121xf32>
    %245 = vector.extract_strided_slice %229 {offsets = [8, 28], sizes = [1, 121], strides = [1, 1]} : vector<16x166xf32> to vector<1x121xf32>
    %246 = arith.addf %244, %245 : vector<1x121xf32>
    %247 = vector.extract_strided_slice %229 {offsets = [9, 29], sizes = [1, 121], strides = [1, 1]} : vector<16x166xf32> to vector<1x121xf32>
    %248 = arith.addf %246, %247 : vector<1x121xf32>
    %249 = vector.extract_strided_slice %229 {offsets = [10, 30], sizes = [1, 121], strides = [1, 1]} : vector<16x166xf32> to vector<1x121xf32>
    %250 = arith.addf %248, %249 : vector<1x121xf32>
    %251 = vector.extract_strided_slice %229 {offsets = [11, 31], sizes = [1, 121], strides = [1, 1]} : vector<16x166xf32> to vector<1x121xf32>
    %252 = arith.addf %250, %251 : vector<1x121xf32>
    %253 = vector.extract_strided_slice %229 {offsets = [12, 42], sizes = [1, 121], strides = [1, 1]} : vector<16x166xf32> to vector<1x121xf32>
    %254 = arith.addf %252, %253 : vector<1x121xf32>
    %255 = vector.extract_strided_slice %229 {offsets = [13, 43], sizes = [1, 121], strides = [1, 1]} : vector<16x166xf32> to vector<1x121xf32>
    %256 = arith.addf %254, %255 : vector<1x121xf32>
    %257 = vector.extract_strided_slice %229 {offsets = [14, 44], sizes = [1, 121], strides = [1, 1]} : vector<16x166xf32> to vector<1x121xf32>
    %258 = arith.addf %256, %257 : vector<1x121xf32>
    %259 = vector.extract_strided_slice %229 {offsets = [15, 45], sizes = [1, 121], strides = [1, 1]} : vector<16x166xf32> to vector<1x121xf32>
    %260 = arith.addf %258, %259 : vector<1x121xf32>
    %c0_145 = arith.constant 0 : index
    %c0_146 = arith.constant 0 : index
    %261 = vector.load %arg7[%c0_145, %c0_146] : memref<4x1xf32, #tpu.memory_space<vmem>>, vector<1x1xf32>
    %262 = vector.broadcast %261 : vector<1x1xf32> to vector<1x121xf32>
    %263 = arith.addf %260, %262 : vector<1x121xf32>
    %264 = vector.extract_strided_slice %263 {offsets = [0, 0], sizes = [1, 9], strides = [1, 1]} : vector<1x121xf32> to vector<1x9xf32>
    %c0_147 = arith.constant 0 : index
    %c0_148 = arith.constant 0 : index
    %c0_149 = arith.constant 0 : index
    %265 = vector.load %arg9[%c0_147, %c0_148, %c0_149] : memref<1x4x81xf32, #tpu.memory_space<vmem>>, vector<1x1x9xf32>
    %266 = vector.shape_cast %265 : vector<1x1x9xf32> to vector<1x9xf32>
    %267 = vector.shape_cast %264 : vector<1x9xf32> to vector<1x1x9xf32>
    tpu.vector_store %arg9[%c0_147, %c0_148, %c0_149], %267 {strides = array<i32>} : memref<1x4x81xf32, #tpu.memory_space<vmem>>, vector<1x1x9xf32>,
    %268 = vector.extract_strided_slice %263 {offsets = [0, 14], sizes = [1, 9], strides = [1, 1]} : vector<1x121xf32> to vector<1x9xf32>
    %c0_150 = arith.constant 0 : index
    %c0_151 = arith.constant 0 : index
    %c9_152 = arith.constant 9 : index
    %269 = vector.load %arg9[%c0_150, %c0_151, %c9_152] : memref<1x4x81xf32, #tpu.memory_space<vmem>>, vector<1x1x9xf32>
    %270 = vector.shape_cast %269 : vector<1x1x9xf32> to vector<1x9xf32>
    %271 = vector.shape_cast %268 : vector<1x9xf32> to vector<1x1x9xf32>
    tpu.vector_store %arg9[%c0_150, %c0_151, %c9_152], %271 {strides = array<i32>} : memref<1x4x81xf32, #tpu.memory_space<vmem>>, vector<1x1x9xf32>,
    %272 = vector.extract_strided_slice %263 {offsets = [0, 28], sizes = [1, 9], strides = [1, 1]} : vector<1x121xf32> to vector<1x9xf32>
    %c0_153 = arith.constant 0 : index
    %c0_154 = arith.constant 0 : index
    %c18_155 = arith.constant 18 : index
    %273 = vector.load %arg9[%c0_153, %c0_154, %c18_155] : memref<1x4x81xf32, #tpu.memory_space<vmem>>, vector<1x1x9xf32>
    %274 = vector.shape_cast %273 : vector<1x1x9xf32> to vector<1x9xf32>
    %275 = vector.shape_cast %272 : vector<1x9xf32> to vector<1x1x9xf32>
    tpu.vector_store %arg9[%c0_153, %c0_154, %c18_155], %275 {strides = array<i32>} : memref<1x4x81xf32, #tpu.memory_space<vmem>>, vector<1x1x9xf32>,
    %276 = vector.extract_strided_slice %263 {offsets = [0, 42], sizes = [1, 9], strides = [1, 1]} : vector<1x121xf32> to vector<1x9xf32>
    %c0_156 = arith.constant 0 : index
    %c0_157 = arith.constant 0 : index
    %c27_158 = arith.constant 27 : index
    %277 = vector.load %arg9[%c0_156, %c0_157, %c27_158] : memref<1x4x81xf32, #tpu.memory_space<vmem>>, vector<1x1x9xf32>
    %278 = vector.shape_cast %277 : vector<1x1x9xf32> to vector<1x9xf32>
    %279 = vector.shape_cast %276 : vector<1x9xf32> to vector<1x1x9xf32>
    tpu.vector_store %arg9[%c0_156, %c0_157, %c27_158], %279 {strides = array<i32>} : memref<1x4x81xf32, #tpu.memory_space<vmem>>, vector<1x1x9xf32>,
    %280 = vector.extract_strided_slice %263 {offsets = [0, 56], sizes = [1, 9], strides = [1, 1]} : vector<1x121xf32> to vector<1x9xf32>
    %c0_159 = arith.constant 0 : index
    %c0_160 = arith.constant 0 : index
    %c36_161 = arith.constant 36 : index
    %281 = vector.load %arg9[%c0_159, %c0_160, %c36_161] : memref<1x4x81xf32, #tpu.memory_space<vmem>>, vector<1x1x9xf32>
    %282 = vector.shape_cast %281 : vector<1x1x9xf32> to vector<1x9xf32>
    %283 = vector.shape_cast %280 : vector<1x9xf32> to vector<1x1x9xf32>
    tpu.vector_store %arg9[%c0_159, %c0_160, %c36_161], %283 {strides = array<i32>} : memref<1x4x81xf32, #tpu.memory_space<vmem>>, vector<1x1x9xf32>,
    %284 = vector.extract_strided_slice %263 {offsets = [0, 70], sizes = [1, 9], strides = [1, 1]} : vector<1x121xf32> to vector<1x9xf32>
    %c0_162 = arith.constant 0 : index
    %c0_163 = arith.constant 0 : index
    %c45_164 = arith.constant 45 : index
    %285 = vector.load %arg9[%c0_162, %c0_163, %c45_164] : memref<1x4x81xf32, #tpu.memory_space<vmem>>, vector<1x1x9xf32>
    %286 = vector.shape_cast %285 : vector<1x1x9xf32> to vector<1x9xf32>
    %287 = vector.shape_cast %284 : vector<1x9xf32> to vector<1x1x9xf32>
    tpu.vector_store %arg9[%c0_162, %c0_163, %c45_164], %287 {strides = array<i32>} : memref<1x4x81xf32, #tpu.memory_space<vmem>>, vector<1x1x9xf32>,
    %288 = vector.extract_strided_slice %263 {offsets = [0, 84], sizes = [1, 9], strides = [1, 1]} : vector<1x121xf32> to vector<1x9xf32>
    %c0_165 = arith.constant 0 : index
    %c0_166 = arith.constant 0 : index
    %c54_167 = arith.constant 54 : index
    %289 = vector.load %arg9[%c0_165, %c0_166, %c54_167] : memref<1x4x81xf32, #tpu.memory_space<vmem>>, vector<1x1x9xf32>
    %290 = vector.shape_cast %289 : vector<1x1x9xf32> to vector<1x9xf32>
    %291 = vector.shape_cast %288 : vector<1x9xf32> to vector<1x1x9xf32>
    tpu.vector_store %arg9[%c0_165, %c0_166, %c54_167], %291 {strides = array<i32>} : memref<1x4x81xf32, #tpu.memory_space<vmem>>, vector<1x1x9xf32>,
    %292 = vector.extract_strided_slice %263 {offsets = [0, 98], sizes = [1, 9], strides = [1, 1]} : vector<1x121xf32> to vector<1x9xf32>
    %c0_168 = arith.constant 0 : index
    %c0_169 = arith.constant 0 : index
    %c63_170 = arith.constant 63 : index
    %293 = vector.load %arg9[%c0_168, %c0_169, %c63_170] : memref<1x4x81xf32, #tpu.memory_space<vmem>>, vector<1x1x9xf32>
    %294 = vector.shape_cast %293 : vector<1x1x9xf32> to vector<1x9xf32>
    %295 = vector.shape_cast %292 : vector<1x9xf32> to vector<1x1x9xf32>
    tpu.vector_store %arg9[%c0_168, %c0_169, %c63_170], %295 {strides = array<i32>} : memref<1x4x81xf32, #tpu.memory_space<vmem>>, vector<1x1x9xf32>,
    %296 = vector.extract_strided_slice %263 {offsets = [0, 112], sizes = [1, 9], strides = [1, 1]} : vector<1x121xf32> to vector<1x9xf32>
    %c0_171 = arith.constant 0 : index
    %c0_172 = arith.constant 0 : index
    %c72_173 = arith.constant 72 : index
    %297 = vector.load %arg9[%c0_171, %c0_172, %c72_173] : memref<1x4x81xf32, #tpu.memory_space<vmem>>, vector<1x1x9xf32>
    %298 = vector.shape_cast %297 : vector<1x1x9xf32> to vector<1x9xf32>
    %299 = vector.shape_cast %296 : vector<1x9xf32> to vector<1x1x9xf32>
    tpu.vector_store %arg9[%c0_171, %c0_172, %c72_173], %299 {strides = array<i32>} : memref<1x4x81xf32, #tpu.memory_space<vmem>>, vector<1x1x9xf32>,
    %c3_174 = arith.constant 3 : index
    %c0_175 = arith.constant 0 : index
    %c0_176 = arith.constant 0 : index
    %300 = vector.load %arg3[%c3_174, %c0_175, %c0_176] : memref<6x288x32xf32, #tpu.memory_space<vmem>>, vector<1x288x32xf32>
    %301 = vector.shape_cast %300 : vector<1x288x32xf32> to vector<288x32xf32>
    %cst_177 = arith.constant dense<0.000000e+00> : vector<16x32xf32>
    %302 = tpu.matmul %71, %301, %cst_177 {dimension_numbers = #tpu.dot_dimension_numbers<[1], [0], [0], [1], [0, 0, 1, 1], [], []>} : vector<16x288xf32>, vector<288x32xf32>, vector<16x32xf32> -> vector<16x32xf32>
    %c3_178 = arith.constant 3 : index
    %c0_179 = arith.constant 0 : index
    %c0_180 = arith.constant 0 : index
    %303 = vector.load %arg4[%c3_178, %c0_179, %c0_180] : memref<6x1x32xf32, #tpu.memory_space<vmem>>, vector<1x1x32xf32>
    %304 = vector.shape_cast %303 : vector<1x1x32xf32> to vector<1x32xf32>
    %305 = vector.broadcast %304 : vector<1x32xf32> to vector<16x32xf32>
    %306 = arith.addf %302, %305 : vector<16x32xf32>
    %cst_181 = arith.constant dense<0.000000e+00> : vector<16x166xf32>
    %307 = tpu.matmul %306, %69, %cst_181 {dimension_numbers = #tpu.dot_dimension_numbers<[1], [0], [0], [1], [0, 0, 1, 1], [], []>} : vector<16x32xf32>, vector<32x166xf32>, vector<16x166xf32> -> vector<16x166xf32>
    %308 = vector.extract_strided_slice %307 {offsets = [0, 0], sizes = [1, 121], strides = [1, 1]} : vector<16x166xf32> to vector<1x121xf32>
    %309 = vector.extract_strided_slice %307 {offsets = [1, 1], sizes = [1, 121], strides = [1, 1]} : vector<16x166xf32> to vector<1x121xf32>
    %310 = arith.addf %308, %309 : vector<1x121xf32>
    %311 = vector.extract_strided_slice %307 {offsets = [2, 2], sizes = [1, 121], strides = [1, 1]} : vector<16x166xf32> to vector<1x121xf32>
    %312 = arith.addf %310, %311 : vector<1x121xf32>
    %313 = vector.extract_strided_slice %307 {offsets = [3, 3], sizes = [1, 121], strides = [1, 1]} : vector<16x166xf32> to vector<1x121xf32>
    %314 = arith.addf %312, %313 : vector<1x121xf32>
    %315 = vector.extract_strided_slice %307 {offsets = [4, 14], sizes = [1, 121], strides = [1, 1]} : vector<16x166xf32> to vector<1x121xf32>
    %316 = arith.addf %314, %315 : vector<1x121xf32>
    %317 = vector.extract_strided_slice %307 {offsets = [5, 15], sizes = [1, 121], strides = [1, 1]} : vector<16x166xf32> to vector<1x121xf32>
    %318 = arith.addf %316, %317 : vector<1x121xf32>
    %319 = vector.extract_strided_slice %307 {offsets = [6, 16], sizes = [1, 121], strides = [1, 1]} : vector<16x166xf32> to vector<1x121xf32>
    %320 = arith.addf %318, %319 : vector<1x121xf32>
    %321 = vector.extract_strided_slice %307 {offsets = [7, 17], sizes = [1, 121], strides = [1, 1]} : vector<16x166xf32> to vector<1x121xf32>
    %322 = arith.addf %320, %321 : vector<1x121xf32>
    %323 = vector.extract_strided_slice %307 {offsets = [8, 28], sizes = [1, 121], strides = [1, 1]} : vector<16x166xf32> to vector<1x121xf32>
    %324 = arith.addf %322, %323 : vector<1x121xf32>
    %325 = vector.extract_strided_slice %307 {offsets = [9, 29], sizes = [1, 121], strides = [1, 1]} : vector<16x166xf32> to vector<1x121xf32>
    %326 = arith.addf %324, %325 : vector<1x121xf32>
    %327 = vector.extract_strided_slice %307 {offsets = [10, 30], sizes = [1, 121], strides = [1, 1]} : vector<16x166xf32> to vector<1x121xf32>
    %328 = arith.addf %326, %327 : vector<1x121xf32>
    %329 = vector.extract_strided_slice %307 {offsets = [11, 31], sizes = [1, 121], strides = [1, 1]} : vector<16x166xf32> to vector<1x121xf32>
    %330 = arith.addf %328, %329 : vector<1x121xf32>
    %331 = vector.extract_strided_slice %307 {offsets = [12, 42], sizes = [1, 121], strides = [1, 1]} : vector<16x166xf32> to vector<1x121xf32>
    %332 = arith.addf %330, %331 : vector<1x121xf32>
    %333 = vector.extract_strided_slice %307 {offsets = [13, 43], sizes = [1, 121], strides = [1, 1]} : vector<16x166xf32> to vector<1x121xf32>
    %334 = arith.addf %332, %333 : vector<1x121xf32>
    %335 = vector.extract_strided_slice %307 {offsets = [14, 44], sizes = [1, 121], strides = [1, 1]} : vector<16x166xf32> to vector<1x121xf32>
    %336 = arith.addf %334, %335 : vector<1x121xf32>
    %337 = vector.extract_strided_slice %307 {offsets = [15, 45], sizes = [1, 121], strides = [1, 1]} : vector<16x166xf32> to vector<1x121xf32>
    %338 = arith.addf %336, %337 : vector<1x121xf32>
    %c1_182 = arith.constant 1 : index
    %c0_183 = arith.constant 0 : index
    %339 = vector.load %arg7[%c1_182, %c0_183] : memref<4x1xf32, #tpu.memory_space<vmem>>, vector<1x1xf32>
    %340 = vector.broadcast %339 : vector<1x1xf32> to vector<1x121xf32>
    %341 = arith.addf %338, %340 : vector<1x121xf32>
    %342 = vector.extract_strided_slice %341 {offsets = [0, 0], sizes = [1, 9], strides = [1, 1]} : vector<1x121xf32> to vector<1x9xf32>
    %c0_184 = arith.constant 0 : index
    %c1_185 = arith.constant 1 : index
    %c0_186 = arith.constant 0 : index
    %343 = vector.load %arg9[%c0_184, %c1_185, %c0_186] : memref<1x4x81xf32, #tpu.memory_space<vmem>>, vector<1x1x9xf32>
    %344 = vector.shape_cast %343 : vector<1x1x9xf32> to vector<1x9xf32>
    %345 = vector.shape_cast %342 : vector<1x9xf32> to vector<1x1x9xf32>
    tpu.vector_store %arg9[%c0_184, %c1_185, %c0_186], %345 {strides = array<i32>} : memref<1x4x81xf32, #tpu.memory_space<vmem>>, vector<1x1x9xf32>,
    %346 = vector.extract_strided_slice %341 {offsets = [0, 14], sizes = [1, 9], strides = [1, 1]} : vector<1x121xf32> to vector<1x9xf32>
    %c0_187 = arith.constant 0 : index
    %c1_188 = arith.constant 1 : index
    %c9_189 = arith.constant 9 : index
    %347 = vector.load %arg9[%c0_187, %c1_188, %c9_189] : memref<1x4x81xf32, #tpu.memory_space<vmem>>, vector<1x1x9xf32>
    %348 = vector.shape_cast %347 : vector<1x1x9xf32> to vector<1x9xf32>
    %349 = vector.shape_cast %346 : vector<1x9xf32> to vector<1x1x9xf32>
    tpu.vector_store %arg9[%c0_187, %c1_188, %c9_189], %349 {strides = array<i32>} : memref<1x4x81xf32, #tpu.memory_space<vmem>>, vector<1x1x9xf32>,
    %350 = vector.extract_strided_slice %341 {offsets = [0, 28], sizes = [1, 9], strides = [1, 1]} : vector<1x121xf32> to vector<1x9xf32>
    %c0_190 = arith.constant 0 : index
    %c1_191 = arith.constant 1 : index
    %c18_192 = arith.constant 18 : index
    %351 = vector.load %arg9[%c0_190, %c1_191, %c18_192] : memref<1x4x81xf32, #tpu.memory_space<vmem>>, vector<1x1x9xf32>
    %352 = vector.shape_cast %351 : vector<1x1x9xf32> to vector<1x9xf32>
    %353 = vector.shape_cast %350 : vector<1x9xf32> to vector<1x1x9xf32>
    tpu.vector_store %arg9[%c0_190, %c1_191, %c18_192], %353 {strides = array<i32>} : memref<1x4x81xf32, #tpu.memory_space<vmem>>, vector<1x1x9xf32>,
    %354 = vector.extract_strided_slice %341 {offsets = [0, 42], sizes = [1, 9], strides = [1, 1]} : vector<1x121xf32> to vector<1x9xf32>
    %c0_193 = arith.constant 0 : index
    %c1_194 = arith.constant 1 : index
    %c27_195 = arith.constant 27 : index
    %355 = vector.load %arg9[%c0_193, %c1_194, %c27_195] : memref<1x4x81xf32, #tpu.memory_space<vmem>>, vector<1x1x9xf32>
    %356 = vector.shape_cast %355 : vector<1x1x9xf32> to vector<1x9xf32>
    %357 = vector.shape_cast %354 : vector<1x9xf32> to vector<1x1x9xf32>
    tpu.vector_store %arg9[%c0_193, %c1_194, %c27_195], %357 {strides = array<i32>} : memref<1x4x81xf32, #tpu.memory_space<vmem>>, vector<1x1x9xf32>,
    %358 = vector.extract_strided_slice %341 {offsets = [0, 56], sizes = [1, 9], strides = [1, 1]} : vector<1x121xf32> to vector<1x9xf32>
    %c0_196 = arith.constant 0 : index
    %c1_197 = arith.constant 1 : index
    %c36_198 = arith.constant 36 : index
    %359 = vector.load %arg9[%c0_196, %c1_197, %c36_198] : memref<1x4x81xf32, #tpu.memory_space<vmem>>, vector<1x1x9xf32>
    %360 = vector.shape_cast %359 : vector<1x1x9xf32> to vector<1x9xf32>
    %361 = vector.shape_cast %358 : vector<1x9xf32> to vector<1x1x9xf32>
    tpu.vector_store %arg9[%c0_196, %c1_197, %c36_198], %361 {strides = array<i32>} : memref<1x4x81xf32, #tpu.memory_space<vmem>>, vector<1x1x9xf32>,
    %362 = vector.extract_strided_slice %341 {offsets = [0, 70], sizes = [1, 9], strides = [1, 1]} : vector<1x121xf32> to vector<1x9xf32>
    %c0_199 = arith.constant 0 : index
    %c1_200 = arith.constant 1 : index
    %c45_201 = arith.constant 45 : index
    %363 = vector.load %arg9[%c0_199, %c1_200, %c45_201] : memref<1x4x81xf32, #tpu.memory_space<vmem>>, vector<1x1x9xf32>
    %364 = vector.shape_cast %363 : vector<1x1x9xf32> to vector<1x9xf32>
    %365 = vector.shape_cast %362 : vector<1x9xf32> to vector<1x1x9xf32>
    tpu.vector_store %arg9[%c0_199, %c1_200, %c45_201], %365 {strides = array<i32>} : memref<1x4x81xf32, #tpu.memory_space<vmem>>, vector<1x1x9xf32>,
    %366 = vector.extract_strided_slice %341 {offsets = [0, 84], sizes = [1, 9], strides = [1, 1]} : vector<1x121xf32> to vector<1x9xf32>
    %c0_202 = arith.constant 0 : index
    %c1_203 = arith.constant 1 : index
    %c54_204 = arith.constant 54 : index
    %367 = vector.load %arg9[%c0_202, %c1_203, %c54_204] : memref<1x4x81xf32, #tpu.memory_space<vmem>>, vector<1x1x9xf32>
    %368 = vector.shape_cast %367 : vector<1x1x9xf32> to vector<1x9xf32>
    %369 = vector.shape_cast %366 : vector<1x9xf32> to vector<1x1x9xf32>
    tpu.vector_store %arg9[%c0_202, %c1_203, %c54_204], %369 {strides = array<i32>} : memref<1x4x81xf32, #tpu.memory_space<vmem>>, vector<1x1x9xf32>,
    %370 = vector.extract_strided_slice %341 {offsets = [0, 98], sizes = [1, 9], strides = [1, 1]} : vector<1x121xf32> to vector<1x9xf32>
    %c0_205 = arith.constant 0 : index
    %c1_206 = arith.constant 1 : index
    %c63_207 = arith.constant 63 : index
    %371 = vector.load %arg9[%c0_205, %c1_206, %c63_207] : memref<1x4x81xf32, #tpu.memory_space<vmem>>, vector<1x1x9xf32>
    %372 = vector.shape_cast %371 : vector<1x1x9xf32> to vector<1x9xf32>
    %373 = vector.shape_cast %370 : vector<1x9xf32> to vector<1x1x9xf32>
    tpu.vector_store %arg9[%c0_205, %c1_206, %c63_207], %373 {strides = array<i32>} : memref<1x4x81xf32, #tpu.memory_space<vmem>>, vector<1x1x9xf32>,
    %374 = vector.extract_strided_slice %341 {offsets = [0, 112], sizes = [1, 9], strides = [1, 1]} : vector<1x121xf32> to vector<1x9xf32>
    %c0_208 = arith.constant 0 : index
    %c1_209 = arith.constant 1 : index
    %c72_210 = arith.constant 72 : index
    %375 = vector.load %arg9[%c0_208, %c1_209, %c72_210] : memref<1x4x81xf32, #tpu.memory_space<vmem>>, vector<1x1x9xf32>
    %376 = vector.shape_cast %375 : vector<1x1x9xf32> to vector<1x9xf32>
    %377 = vector.shape_cast %374 : vector<1x9xf32> to vector<1x1x9xf32>
    tpu.vector_store %arg9[%c0_208, %c1_209, %c72_210], %377 {strides = array<i32>} : memref<1x4x81xf32, #tpu.memory_space<vmem>>, vector<1x1x9xf32>,
    %c4_211 = arith.constant 4 : index
    %c0_212 = arith.constant 0 : index
    %c0_213 = arith.constant 0 : index
    %378 = vector.load %arg3[%c4_211, %c0_212, %c0_213] : memref<6x288x32xf32, #tpu.memory_space<vmem>>, vector<1x288x32xf32>
    %379 = vector.shape_cast %378 : vector<1x288x32xf32> to vector<288x32xf32>
    %cst_214 = arith.constant dense<0.000000e+00> : vector<16x32xf32>
    %380 = tpu.matmul %71, %379, %cst_214 {dimension_numbers = #tpu.dot_dimension_numbers<[1], [0], [0], [1], [0, 0, 1, 1], [], []>} : vector<16x288xf32>, vector<288x32xf32>, vector<16x32xf32> -> vector<16x32xf32>
    %c4_215 = arith.constant 4 : index
    %c0_216 = arith.constant 0 : index
    %c0_217 = arith.constant 0 : index
    %381 = vector.load %arg4[%c4_215, %c0_216, %c0_217] : memref<6x1x32xf32, #tpu.memory_space<vmem>>, vector<1x1x32xf32>
    %382 = vector.shape_cast %381 : vector<1x1x32xf32> to vector<1x32xf32>
    %383 = vector.broadcast %382 : vector<1x32xf32> to vector<16x32xf32>
    %384 = arith.addf %380, %383 : vector<16x32xf32>
    %cst_218 = arith.constant dense<0.000000e+00> : vector<16x166xf32>
    %385 = tpu.matmul %384, %69, %cst_218 {dimension_numbers = #tpu.dot_dimension_numbers<[1], [0], [0], [1], [0, 0, 1, 1], [], []>} : vector<16x32xf32>, vector<32x166xf32>, vector<16x166xf32> -> vector<16x166xf32>
    %386 = vector.extract_strided_slice %385 {offsets = [0, 0], sizes = [1, 121], strides = [1, 1]} : vector<16x166xf32> to vector<1x121xf32>
    %387 = vector.extract_strided_slice %385 {offsets = [1, 1], sizes = [1, 121], strides = [1, 1]} : vector<16x166xf32> to vector<1x121xf32>
    %388 = arith.addf %386, %387 : vector<1x121xf32>
    %389 = vector.extract_strided_slice %385 {offsets = [2, 2], sizes = [1, 121], strides = [1, 1]} : vector<16x166xf32> to vector<1x121xf32>
    %390 = arith.addf %388, %389 : vector<1x121xf32>
    %391 = vector.extract_strided_slice %385 {offsets = [3, 3], sizes = [1, 121], strides = [1, 1]} : vector<16x166xf32> to vector<1x121xf32>
    %392 = arith.addf %390, %391 : vector<1x121xf32>
    %393 = vector.extract_strided_slice %385 {offsets = [4, 14], sizes = [1, 121], strides = [1, 1]} : vector<16x166xf32> to vector<1x121xf32>
    %394 = arith.addf %392, %393 : vector<1x121xf32>
    %395 = vector.extract_strided_slice %385 {offsets = [5, 15], sizes = [1, 121], strides = [1, 1]} : vector<16x166xf32> to vector<1x121xf32>
    %396 = arith.addf %394, %395 : vector<1x121xf32>
    %397 = vector.extract_strided_slice %385 {offsets = [6, 16], sizes = [1, 121], strides = [1, 1]} : vector<16x166xf32> to vector<1x121xf32>
    %398 = arith.addf %396, %397 : vector<1x121xf32>
    %399 = vector.extract_strided_slice %385 {offsets = [7, 17], sizes = [1, 121], strides = [1, 1]} : vector<16x166xf32> to vector<1x121xf32>
    %400 = arith.addf %398, %399 : vector<1x121xf32>
    %401 = vector.extract_strided_slice %385 {offsets = [8, 28], sizes = [1, 121], strides = [1, 1]} : vector<16x166xf32> to vector<1x121xf32>
    %402 = arith.addf %400, %401 : vector<1x121xf32>
    %403 = vector.extract_strided_slice %385 {offsets = [9, 29], sizes = [1, 121], strides = [1, 1]} : vector<16x166xf32> to vector<1x121xf32>
    %404 = arith.addf %402, %403 : vector<1x121xf32>
    %405 = vector.extract_strided_slice %385 {offsets = [10, 30], sizes = [1, 121], strides = [1, 1]} : vector<16x166xf32> to vector<1x121xf32>
    %406 = arith.addf %404, %405 : vector<1x121xf32>
    %407 = vector.extract_strided_slice %385 {offsets = [11, 31], sizes = [1, 121], strides = [1, 1]} : vector<16x166xf32> to vector<1x121xf32>
    %408 = arith.addf %406, %407 : vector<1x121xf32>
    %409 = vector.extract_strided_slice %385 {offsets = [12, 42], sizes = [1, 121], strides = [1, 1]} : vector<16x166xf32> to vector<1x121xf32>
    %410 = arith.addf %408, %409 : vector<1x121xf32>
    %411 = vector.extract_strided_slice %385 {offsets = [13, 43], sizes = [1, 121], strides = [1, 1]} : vector<16x166xf32> to vector<1x121xf32>
    %412 = arith.addf %410, %411 : vector<1x121xf32>
    %413 = vector.extract_strided_slice %385 {offsets = [14, 44], sizes = [1, 121], strides = [1, 1]} : vector<16x166xf32> to vector<1x121xf32>
    %414 = arith.addf %412, %413 : vector<1x121xf32>
    %415 = vector.extract_strided_slice %385 {offsets = [15, 45], sizes = [1, 121], strides = [1, 1]} : vector<16x166xf32> to vector<1x121xf32>
    %416 = arith.addf %414, %415 : vector<1x121xf32>
    %c2_219 = arith.constant 2 : index
    %c0_220 = arith.constant 0 : index
    %417 = vector.load %arg7[%c2_219, %c0_220] : memref<4x1xf32, #tpu.memory_space<vmem>>, vector<1x1xf32>
    %418 = vector.broadcast %417 : vector<1x1xf32> to vector<1x121xf32>
    %419 = arith.addf %416, %418 : vector<1x121xf32>
    %420 = vector.extract_strided_slice %419 {offsets = [0, 0], sizes = [1, 9], strides = [1, 1]} : vector<1x121xf32> to vector<1x9xf32>
    %c0_221 = arith.constant 0 : index
    %c2_222 = arith.constant 2 : index
    %c0_223 = arith.constant 0 : index
    %421 = vector.load %arg9[%c0_221, %c2_222, %c0_223] : memref<1x4x81xf32, #tpu.memory_space<vmem>>, vector<1x1x9xf32>
    %422 = vector.shape_cast %421 : vector<1x1x9xf32> to vector<1x9xf32>
    %423 = vector.shape_cast %420 : vector<1x9xf32> to vector<1x1x9xf32>
    tpu.vector_store %arg9[%c0_221, %c2_222, %c0_223], %423 {strides = array<i32>} : memref<1x4x81xf32, #tpu.memory_space<vmem>>, vector<1x1x9xf32>,
    %424 = vector.extract_strided_slice %419 {offsets = [0, 14], sizes = [1, 9], strides = [1, 1]} : vector<1x121xf32> to vector<1x9xf32>
    %c0_224 = arith.constant 0 : index
    %c2_225 = arith.constant 2 : index
    %c9_226 = arith.constant 9 : index
    %425 = vector.load %arg9[%c0_224, %c2_225, %c9_226] : memref<1x4x81xf32, #tpu.memory_space<vmem>>, vector<1x1x9xf32>
    %426 = vector.shape_cast %425 : vector<1x1x9xf32> to vector<1x9xf32>
    %427 = vector.shape_cast %424 : vector<1x9xf32> to vector<1x1x9xf32>
    tpu.vector_store %arg9[%c0_224, %c2_225, %c9_226], %427 {strides = array<i32>} : memref<1x4x81xf32, #tpu.memory_space<vmem>>, vector<1x1x9xf32>,
    %428 = vector.extract_strided_slice %419 {offsets = [0, 28], sizes = [1, 9], strides = [1, 1]} : vector<1x121xf32> to vector<1x9xf32>
    %c0_227 = arith.constant 0 : index
    %c2_228 = arith.constant 2 : index
    %c18_229 = arith.constant 18 : index
    %429 = vector.load %arg9[%c0_227, %c2_228, %c18_229] : memref<1x4x81xf32, #tpu.memory_space<vmem>>, vector<1x1x9xf32>
    %430 = vector.shape_cast %429 : vector<1x1x9xf32> to vector<1x9xf32>
    %431 = vector.shape_cast %428 : vector<1x9xf32> to vector<1x1x9xf32>
    tpu.vector_store %arg9[%c0_227, %c2_228, %c18_229], %431 {strides = array<i32>} : memref<1x4x81xf32, #tpu.memory_space<vmem>>, vector<1x1x9xf32>,
    %432 = vector.extract_strided_slice %419 {offsets = [0, 42], sizes = [1, 9], strides = [1, 1]} : vector<1x121xf32> to vector<1x9xf32>
    %c0_230 = arith.constant 0 : index
    %c2_231 = arith.constant 2 : index
    %c27_232 = arith.constant 27 : index
    %433 = vector.load %arg9[%c0_230, %c2_231, %c27_232] : memref<1x4x81xf32, #tpu.memory_space<vmem>>, vector<1x1x9xf32>
    %434 = vector.shape_cast %433 : vector<1x1x9xf32> to vector<1x9xf32>
    %435 = vector.shape_cast %432 : vector<1x9xf32> to vector<1x1x9xf32>
    tpu.vector_store %arg9[%c0_230, %c2_231, %c27_232], %435 {strides = array<i32>} : memref<1x4x81xf32, #tpu.memory_space<vmem>>, vector<1x1x9xf32>,
    %436 = vector.extract_strided_slice %419 {offsets = [0, 56], sizes = [1, 9], strides = [1, 1]} : vector<1x121xf32> to vector<1x9xf32>
    %c0_233 = arith.constant 0 : index
    %c2_234 = arith.constant 2 : index
    %c36_235 = arith.constant 36 : index
    %437 = vector.load %arg9[%c0_233, %c2_234, %c36_235] : memref<1x4x81xf32, #tpu.memory_space<vmem>>, vector<1x1x9xf32>
    %438 = vector.shape_cast %437 : vector<1x1x9xf32> to vector<1x9xf32>
    %439 = vector.shape_cast %436 : vector<1x9xf32> to vector<1x1x9xf32>
    tpu.vector_store %arg9[%c0_233, %c2_234, %c36_235], %439 {strides = array<i32>} : memref<1x4x81xf32, #tpu.memory_space<vmem>>, vector<1x1x9xf32>,
    %440 = vector.extract_strided_slice %419 {offsets = [0, 70], sizes = [1, 9], strides = [1, 1]} : vector<1x121xf32> to vector<1x9xf32>
    %c0_236 = arith.constant 0 : index
    %c2_237 = arith.constant 2 : index
    %c45_238 = arith.constant 45 : index
    %441 = vector.load %arg9[%c0_236, %c2_237, %c45_238] : memref<1x4x81xf32, #tpu.memory_space<vmem>>, vector<1x1x9xf32>
    %442 = vector.shape_cast %441 : vector<1x1x9xf32> to vector<1x9xf32>
    %443 = vector.shape_cast %440 : vector<1x9xf32> to vector<1x1x9xf32>
    tpu.vector_store %arg9[%c0_236, %c2_237, %c45_238], %443 {strides = array<i32>} : memref<1x4x81xf32, #tpu.memory_space<vmem>>, vector<1x1x9xf32>,
    %444 = vector.extract_strided_slice %419 {offsets = [0, 84], sizes = [1, 9], strides = [1, 1]} : vector<1x121xf32> to vector<1x9xf32>
    %c0_239 = arith.constant 0 : index
    %c2_240 = arith.constant 2 : index
    %c54_241 = arith.constant 54 : index
    %445 = vector.load %arg9[%c0_239, %c2_240, %c54_241] : memref<1x4x81xf32, #tpu.memory_space<vmem>>, vector<1x1x9xf32>
    %446 = vector.shape_cast %445 : vector<1x1x9xf32> to vector<1x9xf32>
    %447 = vector.shape_cast %444 : vector<1x9xf32> to vector<1x1x9xf32>
    tpu.vector_store %arg9[%c0_239, %c2_240, %c54_241], %447 {strides = array<i32>} : memref<1x4x81xf32, #tpu.memory_space<vmem>>, vector<1x1x9xf32>,
    %448 = vector.extract_strided_slice %419 {offsets = [0, 98], sizes = [1, 9], strides = [1, 1]} : vector<1x121xf32> to vector<1x9xf32>
    %c0_242 = arith.constant 0 : index
    %c2_243 = arith.constant 2 : index
    %c63_244 = arith.constant 63 : index
    %449 = vector.load %arg9[%c0_242, %c2_243, %c63_244] : memref<1x4x81xf32, #tpu.memory_space<vmem>>, vector<1x1x9xf32>
    %450 = vector.shape_cast %449 : vector<1x1x9xf32> to vector<1x9xf32>
    %451 = vector.shape_cast %448 : vector<1x9xf32> to vector<1x1x9xf32>
    tpu.vector_store %arg9[%c0_242, %c2_243, %c63_244], %451 {strides = array<i32>} : memref<1x4x81xf32, #tpu.memory_space<vmem>>, vector<1x1x9xf32>,
    %452 = vector.extract_strided_slice %419 {offsets = [0, 112], sizes = [1, 9], strides = [1, 1]} : vector<1x121xf32> to vector<1x9xf32>
    %c0_245 = arith.constant 0 : index
    %c2_246 = arith.constant 2 : index
    %c72_247 = arith.constant 72 : index
    %453 = vector.load %arg9[%c0_245, %c2_246, %c72_247] : memref<1x4x81xf32, #tpu.memory_space<vmem>>, vector<1x1x9xf32>
    %454 = vector.shape_cast %453 : vector<1x1x9xf32> to vector<1x9xf32>
    %455 = vector.shape_cast %452 : vector<1x9xf32> to vector<1x1x9xf32>
    tpu.vector_store %arg9[%c0_245, %c2_246, %c72_247], %455 {strides = array<i32>} : memref<1x4x81xf32, #tpu.memory_space<vmem>>, vector<1x1x9xf32>,
    %c5_248 = arith.constant 5 : index
    %c0_249 = arith.constant 0 : index
    %c0_250 = arith.constant 0 : index
    %456 = vector.load %arg3[%c5_248, %c0_249, %c0_250] : memref<6x288x32xf32, #tpu.memory_space<vmem>>, vector<1x288x32xf32>
    %457 = vector.shape_cast %456 : vector<1x288x32xf32> to vector<288x32xf32>
    %cst_251 = arith.constant dense<0.000000e+00> : vector<16x32xf32>
    %458 = tpu.matmul %71, %457, %cst_251 {dimension_numbers = #tpu.dot_dimension_numbers<[1], [0], [0], [1], [0, 0, 1, 1], [], []>} : vector<16x288xf32>, vector<288x32xf32>, vector<16x32xf32> -> vector<16x32xf32>
    %c5_252 = arith.constant 5 : index
    %c0_253 = arith.constant 0 : index
    %c0_254 = arith.constant 0 : index
    %459 = vector.load %arg4[%c5_252, %c0_253, %c0_254] : memref<6x1x32xf32, #tpu.memory_space<vmem>>, vector<1x1x32xf32>
    %460 = vector.shape_cast %459 : vector<1x1x32xf32> to vector<1x32xf32>
    %461 = vector.broadcast %460 : vector<1x32xf32> to vector<16x32xf32>
    %462 = arith.addf %458, %461 : vector<16x32xf32>
    %cst_255 = arith.constant dense<0.000000e+00> : vector<16x166xf32>
    %463 = tpu.matmul %462, %69, %cst_255 {dimension_numbers = #tpu.dot_dimension_numbers<[1], [0], [0], [1], [0, 0, 1, 1], [], []>} : vector<16x32xf32>, vector<32x166xf32>, vector<16x166xf32> -> vector<16x166xf32>
    %464 = vector.extract_strided_slice %463 {offsets = [0, 0], sizes = [1, 121], strides = [1, 1]} : vector<16x166xf32> to vector<1x121xf32>
    %465 = vector.extract_strided_slice %463 {offsets = [1, 1], sizes = [1, 121], strides = [1, 1]} : vector<16x166xf32> to vector<1x121xf32>
    %466 = arith.addf %464, %465 : vector<1x121xf32>
    %467 = vector.extract_strided_slice %463 {offsets = [2, 2], sizes = [1, 121], strides = [1, 1]} : vector<16x166xf32> to vector<1x121xf32>
    %468 = arith.addf %466, %467 : vector<1x121xf32>
    %469 = vector.extract_strided_slice %463 {offsets = [3, 3], sizes = [1, 121], strides = [1, 1]} : vector<16x166xf32> to vector<1x121xf32>
    %470 = arith.addf %468, %469 : vector<1x121xf32>
    %471 = vector.extract_strided_slice %463 {offsets = [4, 14], sizes = [1, 121], strides = [1, 1]} : vector<16x166xf32> to vector<1x121xf32>
    %472 = arith.addf %470, %471 : vector<1x121xf32>
    %473 = vector.extract_strided_slice %463 {offsets = [5, 15], sizes = [1, 121], strides = [1, 1]} : vector<16x166xf32> to vector<1x121xf32>
    %474 = arith.addf %472, %473 : vector<1x121xf32>
    %475 = vector.extract_strided_slice %463 {offsets = [6, 16], sizes = [1, 121], strides = [1, 1]} : vector<16x166xf32> to vector<1x121xf32>
    %476 = arith.addf %474, %475 : vector<1x121xf32>
    %477 = vector.extract_strided_slice %463 {offsets = [7, 17], sizes = [1, 121], strides = [1, 1]} : vector<16x166xf32> to vector<1x121xf32>
    %478 = arith.addf %476, %477 : vector<1x121xf32>
    %479 = vector.extract_strided_slice %463 {offsets = [8, 28], sizes = [1, 121], strides = [1, 1]} : vector<16x166xf32> to vector<1x121xf32>
    %480 = arith.addf %478, %479 : vector<1x121xf32>
    %481 = vector.extract_strided_slice %463 {offsets = [9, 29], sizes = [1, 121], strides = [1, 1]} : vector<16x166xf32> to vector<1x121xf32>
    %482 = arith.addf %480, %481 : vector<1x121xf32>
    %483 = vector.extract_strided_slice %463 {offsets = [10, 30], sizes = [1, 121], strides = [1, 1]} : vector<16x166xf32> to vector<1x121xf32>
    %484 = arith.addf %482, %483 : vector<1x121xf32>
    %485 = vector.extract_strided_slice %463 {offsets = [11, 31], sizes = [1, 121], strides = [1, 1]} : vector<16x166xf32> to vector<1x121xf32>
    %486 = arith.addf %484, %485 : vector<1x121xf32>
    %487 = vector.extract_strided_slice %463 {offsets = [12, 42], sizes = [1, 121], strides = [1, 1]} : vector<16x166xf32> to vector<1x121xf32>
    %488 = arith.addf %486, %487 : vector<1x121xf32>
    %489 = vector.extract_strided_slice %463 {offsets = [13, 43], sizes = [1, 121], strides = [1, 1]} : vector<16x166xf32> to vector<1x121xf32>
    %490 = arith.addf %488, %489 : vector<1x121xf32>
    %491 = vector.extract_strided_slice %463 {offsets = [14, 44], sizes = [1, 121], strides = [1, 1]} : vector<16x166xf32> to vector<1x121xf32>
    %492 = arith.addf %490, %491 : vector<1x121xf32>
    %493 = vector.extract_strided_slice %463 {offsets = [15, 45], sizes = [1, 121], strides = [1, 1]} : vector<16x166xf32> to vector<1x121xf32>
    %494 = arith.addf %492, %493 : vector<1x121xf32>
    %c3_256 = arith.constant 3 : index
    %c0_257 = arith.constant 0 : index
    %495 = vector.load %arg7[%c3_256, %c0_257] : memref<4x1xf32, #tpu.memory_space<vmem>>, vector<1x1xf32>
    %496 = vector.broadcast %495 : vector<1x1xf32> to vector<1x121xf32>
    %497 = arith.addf %494, %496 : vector<1x121xf32>
    %498 = vector.extract_strided_slice %497 {offsets = [0, 0], sizes = [1, 9], strides = [1, 1]} : vector<1x121xf32> to vector<1x9xf32>
    %c0_258 = arith.constant 0 : index
    %c3_259 = arith.constant 3 : index
    %c0_260 = arith.constant 0 : index
    %499 = vector.load %arg9[%c0_258, %c3_259, %c0_260] : memref<1x4x81xf32, #tpu.memory_space<vmem>>, vector<1x1x9xf32>
    %500 = vector.shape_cast %499 : vector<1x1x9xf32> to vector<1x9xf32>
    %501 = vector.shape_cast %498 : vector<1x9xf32> to vector<1x1x9xf32>
    tpu.vector_store %arg9[%c0_258, %c3_259, %c0_260], %501 {strides = array<i32>} : memref<1x4x81xf32, #tpu.memory_space<vmem>>, vector<1x1x9xf32>,
    %502 = vector.extract_strided_slice %497 {offsets = [0, 14], sizes = [1, 9], strides = [1, 1]} : vector<1x121xf32> to vector<1x9xf32>
    %c0_261 = arith.constant 0 : index
    %c3_262 = arith.constant 3 : index
    %c9_263 = arith.constant 9 : index
    %503 = vector.load %arg9[%c0_261, %c3_262, %c9_263] : memref<1x4x81xf32, #tpu.memory_space<vmem>>, vector<1x1x9xf32>
    %504 = vector.shape_cast %503 : vector<1x1x9xf32> to vector<1x9xf32>
    %505 = vector.shape_cast %502 : vector<1x9xf32> to vector<1x1x9xf32>
    tpu.vector_store %arg9[%c0_261, %c3_262, %c9_263], %505 {strides = array<i32>} : memref<1x4x81xf32, #tpu.memory_space<vmem>>, vector<1x1x9xf32>,
    %506 = vector.extract_strided_slice %497 {offsets = [0, 28], sizes = [1, 9], strides = [1, 1]} : vector<1x121xf32> to vector<1x9xf32>
    %c0_264 = arith.constant 0 : index
    %c3_265 = arith.constant 3 : index
    %c18_266 = arith.constant 18 : index
    %507 = vector.load %arg9[%c0_264, %c3_265, %c18_266] : memref<1x4x81xf32, #tpu.memory_space<vmem>>, vector<1x1x9xf32>
    %508 = vector.shape_cast %507 : vector<1x1x9xf32> to vector<1x9xf32>
    %509 = vector.shape_cast %506 : vector<1x9xf32> to vector<1x1x9xf32>
    tpu.vector_store %arg9[%c0_264, %c3_265, %c18_266], %509 {strides = array<i32>} : memref<1x4x81xf32, #tpu.memory_space<vmem>>, vector<1x1x9xf32>,
    %510 = vector.extract_strided_slice %497 {offsets = [0, 42], sizes = [1, 9], strides = [1, 1]} : vector<1x121xf32> to vector<1x9xf32>
    %c0_267 = arith.constant 0 : index
    %c3_268 = arith.constant 3 : index
    %c27_269 = arith.constant 27 : index
    %511 = vector.load %arg9[%c0_267, %c3_268, %c27_269] : memref<1x4x81xf32, #tpu.memory_space<vmem>>, vector<1x1x9xf32>
    %512 = vector.shape_cast %511 : vector<1x1x9xf32> to vector<1x9xf32>
    %513 = vector.shape_cast %510 : vector<1x9xf32> to vector<1x1x9xf32>
    tpu.vector_store %arg9[%c0_267, %c3_268, %c27_269], %513 {strides = array<i32>} : memref<1x4x81xf32, #tpu.memory_space<vmem>>, vector<1x1x9xf32>,
    %514 = vector.extract_strided_slice %497 {offsets = [0, 56], sizes = [1, 9], strides = [1, 1]} : vector<1x121xf32> to vector<1x9xf32>
    %c0_270 = arith.constant 0 : index
    %c3_271 = arith.constant 3 : index
    %c36_272 = arith.constant 36 : index
    %515 = vector.load %arg9[%c0_270, %c3_271, %c36_272] : memref<1x4x81xf32, #tpu.memory_space<vmem>>, vector<1x1x9xf32>
    %516 = vector.shape_cast %515 : vector<1x1x9xf32> to vector<1x9xf32>
    %517 = vector.shape_cast %514 : vector<1x9xf32> to vector<1x1x9xf32>
    tpu.vector_store %arg9[%c0_270, %c3_271, %c36_272], %517 {strides = array<i32>} : memref<1x4x81xf32, #tpu.memory_space<vmem>>, vector<1x1x9xf32>,
    %518 = vector.extract_strided_slice %497 {offsets = [0, 70], sizes = [1, 9], strides = [1, 1]} : vector<1x121xf32> to vector<1x9xf32>
    %c0_273 = arith.constant 0 : index
    %c3_274 = arith.constant 3 : index
    %c45_275 = arith.constant 45 : index
    %519 = vector.load %arg9[%c0_273, %c3_274, %c45_275] : memref<1x4x81xf32, #tpu.memory_space<vmem>>, vector<1x1x9xf32>
    %520 = vector.shape_cast %519 : vector<1x1x9xf32> to vector<1x9xf32>
    %521 = vector.shape_cast %518 : vector<1x9xf32> to vector<1x1x9xf32>
    tpu.vector_store %arg9[%c0_273, %c3_274, %c45_275], %521 {strides = array<i32>} : memref<1x4x81xf32, #tpu.memory_space<vmem>>, vector<1x1x9xf32>,
    %522 = vector.extract_strided_slice %497 {offsets = [0, 84], sizes = [1, 9], strides = [1, 1]} : vector<1x121xf32> to vector<1x9xf32>
    %c0_276 = arith.constant 0 : index
    %c3_277 = arith.constant 3 : index
    %c54_278 = arith.constant 54 : index
    %523 = vector.load %arg9[%c0_276, %c3_277, %c54_278] : memref<1x4x81xf32, #tpu.memory_space<vmem>>, vector<1x1x9xf32>
    %524 = vector.shape_cast %523 : vector<1x1x9xf32> to vector<1x9xf32>
    %525 = vector.shape_cast %522 : vector<1x9xf32> to vector<1x1x9xf32>
    tpu.vector_store %arg9[%c0_276, %c3_277, %c54_278], %525 {strides = array<i32>} : memref<1x4x81xf32, #tpu.memory_space<vmem>>, vector<1x1x9xf32>,
    %526 = vector.extract_strided_slice %497 {offsets = [0, 98], sizes = [1, 9], strides = [1, 1]} : vector<1x121xf32> to vector<1x9xf32>
    %c0_279 = arith.constant 0 : index
    %c3_280 = arith.constant 3 : index
    %c63_281 = arith.constant 63 : index
    %527 = vector.load %arg9[%c0_279, %c3_280, %c63_281] : memref<1x4x81xf32, #tpu.memory_space<vmem>>, vector<1x1x9xf32>
    %528 = vector.shape_cast %527 : vector<1x1x9xf32> to vector<1x9xf32>
    %529 = vector.shape_cast %526 : vector<1x9xf32> to vector<1x1x9xf32>
    tpu.vector_store %arg9[%c0_279, %c3_280, %c63_281], %529 {strides = array<i32>} : memref<1x4x81xf32, #tpu.memory_space<vmem>>, vector<1x1x9xf32>,
    %530 = vector.extract_strided_slice %497 {offsets = [0, 112], sizes = [1, 9], strides = [1, 1]} : vector<1x121xf32> to vector<1x9xf32>
    %c0_282 = arith.constant 0 : index
    %c3_283 = arith.constant 3 : index
    %c72_284 = arith.constant 72 : index
    %531 = vector.load %arg9[%c0_282, %c3_283, %c72_284] : memref<1x4x81xf32, #tpu.memory_space<vmem>>, vector<1x1x9xf32>
    %532 = vector.shape_cast %531 : vector<1x1x9xf32> to vector<1x9xf32>
    %533 = vector.shape_cast %530 : vector<1x9xf32> to vector<1x1x9xf32>
    tpu.vector_store %arg9[%c0_282, %c3_283, %c72_284], %533 {strides = array<i32>} : memref<1x4x81xf32, #tpu.memory_space<vmem>>, vector<1x1x9xf32>,
    return
  }
  func.func @transform_0(%arg0: i32) -> (i32, i32, i32) {
    %c0_i32 = arith.constant 0 : i32
    %c0_i32_0 = arith.constant 0 : i32
    %c0_i32_1 = arith.constant 0 : i32
    return %arg0, %c0_i32, %c0_i32_0 : i32, i32, i32
  }
  func.func @transform_1(%arg0: i32) -> (i32, i32, i32) {
    %c0_i32 = arith.constant 0 : i32
    %c0_i32_0 = arith.constant 0 : i32
    %c0_i32_1 = arith.constant 0 : i32
    return %arg0, %c0_i32, %c0_i32_0 : i32, i32, i32
  }
  func.func @transform_2(%arg0: i32) -> (i32, i32, i32) {
    %c0_i32 = arith.constant 0 : i32
    %c0_i32_0 = arith.constant 0 : i32
    %c0_i32_1 = arith.constant 0 : i32
    %c0_i32_2 = arith.constant 0 : i32
    return %c0_i32, %c0_i32_0, %c0_i32_1 : i32, i32, i32
  }
  func.func @transform_3(%arg0: i32) -> (i32, i32, i32) {
    %c0_i32 = arith.constant 0 : i32
    %c0_i32_0 = arith.constant 0 : i32
    %c0_i32_1 = arith.constant 0 : i32
    %c0_i32_2 = arith.constant 0 : i32
    return %c0_i32, %c0_i32_0, %c0_i32_1 : i32, i32, i32
  }
  func.func @transform_4(%arg0: i32) -> (i32, i32, i32) {
    %c0_i32 = arith.constant 0 : i32
    %c0_i32_0 = arith.constant 0 : i32
    %c0_i32_1 = arith.constant 0 : i32
    %c0_i32_2 = arith.constant 0 : i32
    return %c0_i32, %c0_i32_0, %c0_i32_1 : i32, i32, i32
  }
  func.func @transform_5(%arg0: i32) -> (i32, i32) {
    %c0_i32 = arith.constant 0 : i32
    %c0_i32_0 = arith.constant 0 : i32
    %c0_i32_1 = arith.constant 0 : i32
    return %c0_i32, %c0_i32_0 : i32, i32
  }
  func.func @transform_6(%arg0: i32) -> (i32, i32) {
    %c0_i32 = arith.constant 0 : i32
    %c0_i32_0 = arith.constant 0 : i32
    %c0_i32_1 = arith.constant 0 : i32
    return %c0_i32, %c0_i32_0 : i32, i32
  }
  func.func @transform_7(%arg0: i32) -> (i32, i32, i32) {
    %c0_i32 = arith.constant 0 : i32
    %c0_i32_0 = arith.constant 0 : i32
    %c0_i32_1 = arith.constant 0 : i32
    return %arg0, %c0_i32, %c0_i32_0 : i32, i32, i32
  }
  func.func @transform_8(%arg0: i32) -> (i32, i32, i32) {
    %c0_i32 = arith.constant 0 : i32
    %c0_i32_0 = arith.constant 0 : i32
    %c0_i32_1 = arith.constant 0 : i32
    return %arg0, %c0_i32, %c0_i32_0 : i32, i32, i32
  }
}

</mosaic_0001>

<bundles_post_ra>
// kernel: upchannel_ban_forward.1
= control target key start
LH: loop header
LB: loop body
LE: loop exit
PB: predicated region body
PF: predicated region fallthrough
CT: control target
= control target key end

     0   :  { %s5943_s27 = smov 0   ;;  %s7852_s0 = inlined_call_operand.vmem [shape: f32[2,16,288], index: 0, kind: input, shape index: {}]   ;;  %s7853_s1 = inlined_call_operand.vmem [shape: bf16[2,32,196], index: 1, kind: input, shape index: {}]   ;;  %s7854_s2 = inlined_call_operand.vmem [shape: f32[6,288,32], index: 2, kind: input, shape index: {}]   ;;  %s7855_s3 = inlined_call_operand.vmem [shape: f32[6,1,32], index: 3, kind: input, shape index: {}]   ;;  %s7856_s4 = inlined_call_operand.vmem [shape: bf16[9,64,32], index: 4, kind: input, shape index: {}]   ;;  %s7857_s5 = inlined_call_operand.vmem [shape: f32[64,1], index: 5, kind: input, shape index: {}]   ;;  %s7858_s6 = inlined_call_operand.vmem [shape: f32[4,1], index: 6, kind: input, shape index: {}]   ;;  %s7859_s7 = inlined_call_operand.vmem [shape: f32[2,2,81], index: 7, kind: output, shape index: {0}]   ;;  %s7860_s8 = inlined_call_operand.vmem [shape: f32[2,4,81], index: 8, kind: output, shape index: {1}]  }
   0x1   :  { %7917 = sst [smem:[#allocation4_spill]] %s7852_s0 }
   0x2   :  { %7918 = sst [smem:[#allocation5_spill]] %s7853_s1 }
   0x3   :  { %7919 = sst [smem:[#allocation6_spill]] %s7856_s4 }
   0x4   :  { %7920 = sst [smem:[#allocation7_spill]] %s7857_s5 }
   0x5   :  { %7921 = sst [smem:[#allocation8_spill]] %s7858_s6 }
   0x6   :  { %7922 = sst [smem:[#allocation9_spill]] %s7859_s7 }
   0x7   :  { %7923 = sst [smem:[#allocation10_spill]] %s7860_s8 }
   0x8 LB: > { %7924 = sst [smem:[#allocation3_spill]] %s5873_s27  ;;  %s4796_s28 = sadd.s32 4294967295, %s5873_s27   ;;  %s5873_s27 = sphi %s5943_s27, %s19_s27  }
   0x9   : > { %p4800_p0 = scmp.ge.s32.totalorder %s5873_s27, 1  ;;  %p275_p1 = scmp.lt.s32.totalorder %s5873_s27, 3 }
   0xb   : > { %p276_p2 = pnand %p4800_p0, %p275_p1 }
   0xc   : > { %p317_p3 = scmp.lt.s32.totalorder (!%p276_p2), %s4796_s28, 1  ;;  %v5875_v0 = vmov (!%p276_p2), 0   ;;  %s7925_s1 = sld [smem:[#allocation5_spill]] (!%p276_p2)  ;;  %vm7885_vm0 = vcmask (!%p276_p2), 261120   ;;  %vm528_vm1 = vcmask (!%p276_p2), 1039360   ;;  %vm705_vm2 = vcmask (!%p276_p2), 1031168  }
   0xd   : > { %279 = sbr.rel (%p276_p2) target bundleno = 2235 (0x8bb), region = 48  ;;  %433 = vmatprep.mubr.bf16.mxu0 (!%p276_p2), %v5875_v0  ;;  %579 = vmatprep.mubr.bf16.mxu1 (!%p276_p2), %v5875_v0  ;;  %s7877_s11 = smov (!%p276_p2), 127   ;;  %vm882_vm3 = vcmask (!%p276_p2), 932864   ;;  %vm1059_vm4 = vcmask (!%p276_p2), 924672   ;;  %vm1236_vm5 = vcmask (!%p276_p2), 916480   ;;  %vm1413_vm6 = vcmask (!%p276_p2), 818176  }
   0xe   : > { %5814 = vset.pattern.permute.xlu0 (!%p276_p2), %v5875_v0  ;;  %5815 = vset.pattern.permute.xlu1 (!%p276_p2), %v5875_v0  ;;  %s7926_s4 = sld [smem:[#allocation6_spill]] (!%p276_p2)  ;;  %s7879_s14 = smov (!%p276_p2), 126   ;;  %vm7892_vm7 = vcmask (!%p276_p2), 809984   ;;  %vm7893_vm8 = vcmask (!%p276_p2), 801792   ;;  %vm475_vm9 = vcmask (!%p276_p2), 310272   ;;  %vm7891_vm10 = vcmask (!%p276_p2), 908288  }
   0xf   : > { %s7909_s17 = smov (!%p276_p2), 114   ;;  %s7911_s20 = smov (!%p276_p2), 113   ;;  %vm7894_vm11 = vcmask (!%p276_p2), 793600   ;;  %vm2410_vm12 = vcmask (!%p276_p2), 703488   ;;  %vm7889_vm13 = vcmask (!%p276_p2), 695296   ;;  %vm7888_vm14 = vcmask (!%p276_p2), 687104  }
  0x10   : > { %s7905_s23 = smov (!%p276_p2), 112   ;;  %s7907_s24 = smov (!%p276_p2), 100   ;;  %vm7887_vm15 = vcmask (!%p276_p2), 678912  }
  0x11   : > { %s7899_s25 = smov (!%p276_p2), 99   ;;  %s7861_s26 = smov (!%p276_p2), 98  }
  0x12   : > { %s7927_s5 = sld [smem:[#allocation7_spill]] (!%p276_p2)  ;;  %s7928_s6 = sld [smem:[#allocation8_spill]] (!%p276_p2) }
  0x13   : > { %s7929_s0 = sld [smem:[#allocation4_spill]] (!%p276_p2)  ;;  %s7903_s18 = smov (!%p276_p2), 111  }
  0x14   : > { %s8005_s28 = smov (!%p317_p3, %s4796_s28), 1  ;;  %v5822_v5 = vld [vmem:[%s7926_s4] sm:$0xff]   ;;  %v5823_v6 = vld [vmem:[%s7926_s4 + $0x8] sm:$0xff]   ;;  %v5824_v7 = vld [vmem:[%s7926_s4 + $0x10] sm:$0xff]   ;;  %s7897_s19 = smov 97  }
  0x15   : > { %s5163_s29 = sshll.u32 %s8005_s28, 5  ;;  %v5826_v8 = vld [vmem:[%s7926_s4 + $0x18] sm:$0xff]   ;;  %v5825_v18 = vld [vmem:[%s7926_s4 + $0x20] sm:$0xff]   ;;  %v5827_v25 = vld [vmem:[%s7926_s4 + $0x28] sm:$0xff]   ;;  %s5782_s9 = smul.u32 48, %s8005_s28 }
  0x16   : > { %s326_s10 = scalar_lea.vmem %s7925_s1, %s5163_s29  ;;  %v5828_v22 = vld [vmem:[%s7926_s4 + $0x40] sm:$0xff]   ;;  %v5830_v29 = vld [vmem:[%s7926_s4 + $0x48] sm:$0xff]   ;;  %v5829_v37 = vld [vmem:[%s7926_s4 + $0x30] sm:$0xff]   ;;  %s7895_s21 = smov 86  }
  0x17   : > { %v5816_v1 = vld [vmem:[%s326_s10 + $0x10] ss:$8 sps:$4 sm:$0xff]   ;;  %v5818_v2 = vld [vmem:[%s326_s10] ss:$8 sps:$4 sm:$0xff]   ;;  %v5820_v3 = vld [vmem:[%s326_s10 + $0x14] ss:$8 sps:$4 sm:$0xff]  }
  0x18   : > { %524 = vrot.lane.b32.xlu1 %v5816_v1, %s7877_s11  ;;  %v5821_v4 = vld [vmem:[%s326_s10 + $0x4] ss:$8 sps:$4 sm:$0xff]   ;;  %520 = vrot.lane.b32.xlu0 %v5818_v2, %s7877_s11  ;;  %v1926_v35 = vld [vmem:[%s7927_s5 + $0x18] sm:$0xff]  ;;  %s7901_s10 = smov 125   ;;  %s7867_s22 = smov 85  }
  0x19   : > { %401 = vmatprep.subr.bf16.mxu0 %v5821_v4  ;;  %v1923_v31 = vld [vmem:[%s7927_s5] sm:$0xff]  ;;  %v1924_v32 = vld [vmem:[%s7927_s5 + $0x8] sm:$0xff]  ;;  %v1925_v36 = vld [vmem:[%s7927_s5 + $0x10] sm:$0xff]  ;;  %s6321_s12 = scalar_lea.vmem %s7929_s0, %s5782_s9  ;;  %s7865_s29 = smov 84  }
  0x1a   : > { %402 = vmatpush1.bf16.msra.mxu0 %v5818_v2  ;;  %v1928_v41 = vld [vmem:[%s7927_s5 + $0x28] sm:$0xff]  ;;  %v5832_v42 = vld [vmem:[%s7926_s4 + $0x50] sm:$0xff]   ;;  %v5831_v46 = vld [vmem:[%s7926_s4 + $0x38] sm:$0xff]   ;;  %s7863_s30 = smov 83   ;;  %s4804_s13 = sshll.u32 %s8005_s28, 1 }
  0x1b   : > { %403 = vmatprep.subr.bf16.mxu0 %v5820_v3  ;;  %v5834_v48 = vld [vmem:[%s7926_s4 + $0x58] sm:$0xff]   ;;  %v5833_v51 = vld [vmem:[%s7926_s4 + $0x60] sm:$0xff]   ;;  %v5835_v59 = vld [vmem:[%s7926_s4 + $0x68] sm:$0xff]   ;;  %s7931_s7 = sld [smem:[#allocation9_spill]]  ;;  %s7875_s15 = smov 88  }
  0x1c   : > { %526 = vrot.lane.b32.xlu1 %v5820_v3, %s7877_s11  ;;  %522 = vrot.lane.b32.xlu0 %v5821_v4, %s7877_s11  ;;  %v5836_v55 = vld [vmem:[%s7926_s4 + $0x80] sm:$0xff]   ;;  %v5838_v63 = vld [vmem:[%s7926_s4 + $0x88] sm:$0xff]   ;;  %s7873_s16 = smov 93   ;;  %s7948_s1 = smov 97  }
  0x1d   : > { %s7961_s8 = sld [smem:[#allocation10_spill]]  ;;  %s7964_s0 = smov 114  }
  0x1e   : > { %404 = vmatpush1.bf16.msra.mxu0 %v5816_v1 }
  0x20   : > { %699 = vrot.lane.b32.xlu1 %v5821_v4, %s7879_s14  ;;  %697 = vrot.lane.b32.xlu0 %v5818_v2, %s7879_s14 }
  0x21   : > { %4814 = vmatmul.mubr.msk.bf16.vlgmr.msra.gmra.mrb[0].mxu0 %vm7885_vm0, %v5822_v5  ;;  %v5839_v5 = vld [vmem:[%s7926_s4 + $0x78] sm:$0xff]   ;;  %s6935_s9 = scalar_lea.vmem %s7931_s7, %s4804_s13  ;;  %s7881_s13 = smov 103  }
  0x22   : > { %443 = vmatprep.mubr.bf16.mxu0 %v5875_v0 }
  0x24   : > { %703 = vrot.lane.b32.xlu1 %v5820_v3, %s7879_s14  ;;  %701 = vrot.lane.b32.xlu0 %v5816_v1, %s7879_s14 }
  0x28   : > { %876 = vrot.lane.b32.xlu1 %v5821_v4, %s7909_s17  ;;  %874 = vrot.lane.b32.xlu0 %v5818_v2, %s7909_s17 }
  0x29   : > { %4815 = vmatmul.mubr.msk.bf16.gmra.mrb[4].mxu0 %vm7885_vm0, %v5823_v6  ;;  %v5842_v6 = vld [vmem:[%s7926_s4 + $0x98] sm:$0xff]  }
  0x2a   : > { %453 = vmatprep.mubr.bf16.mxu0 %v5875_v0 }
  0x2c   : > { %880 = vrot.lane.b32.xlu1 %v5820_v3, %s7909_s17  ;;  %878 = vrot.lane.b32.xlu0 %v5816_v1, %s7909_s17 }
  0x30   : > { %1053 = vrot.lane.b32.xlu1 %v5821_v4, %s7911_s20  ;;  %1051 = vrot.lane.b32.xlu0 %v5818_v2, %s7911_s20 }
  0x31   : > { %4816 = vmatmul.mubr.msk.bf16.gmra.mrb[8].mxu0 %vm7885_vm0, %v5824_v7 }
  0x32   : > { %463 = vmatprep.mubr.bf16.mxu0 %v5875_v0 }
  0x34   : > { %1057 = vrot.lane.b32.xlu1 %v5820_v3, %s7911_s20  ;;  %1055 = vrot.lane.b32.xlu0 %v5816_v1, %s7911_s20 }
  0x38   : > { %1230 = vrot.lane.b32.xlu1 %v5821_v4, %s7905_s23  ;;  %1228 = vrot.lane.b32.xlu0 %v5818_v2, %s7905_s23 }
  0x39   : > { %4817 = vmatmul.mubr.msk.bf16.gmra.mrb[12].mxu0 %vm7885_vm0, %v5826_v8  ;;  %v5841_v8 = vld [vmem:[%s7926_s4 + $0xa0] sm:$0xff]  }
  0x3a   : > { %756 = vmatprep.mubr.bf16.mxu0 %v5875_v0 }
  0x3c   : > { %1234 = vrot.lane.b32.xlu1 %v5820_v3, %s7905_s23  ;;  %1232 = vrot.lane.b32.xlu0 %v5816_v1, %s7905_s23 }
  0x40   : > { %1407 = vrot.lane.b32.xlu1 %v5821_v4, %s7907_s24  ;;  %1405 = vrot.lane.b32.xlu0 %v5818_v2, %s7907_s24 }
  0x44   : > { %1411 = vrot.lane.b32.xlu1 %v5820_v3, %s7907_s24  ;;  %1409 = vrot.lane.b32.xlu0 %v5816_v1, %s7907_s24 }
  0x48   : > { %1584 = vrot.lane.b32.xlu1 %v5821_v4, %s7899_s25  ;;  %1582 = vrot.lane.b32.xlu0 %v5818_v2, %s7899_s25 }
  0x4c   : > { %1588 = vrot.lane.b32.xlu1 %v5820_v3, %s7899_s25  ;;  %1586 = vrot.lane.b32.xlu0 %v5816_v1, %s7899_s25 }
  0x50   : > { %1761 = vrot.lane.b32.xlu1 %v5821_v4, %s7861_s26  ;;  %1759 = vrot.lane.b32.xlu0 %v5818_v2, %s7861_s26  ;;  %v5837_v2 = vld [vmem:[%s7926_s4 + $0x70] sm:$0xff]  }
  0x54   : > { %1765 = vrot.lane.b32.xlu1 %v5820_v3, %s7861_s26  ;;  %1763 = vrot.lane.b32.xlu0 %v5816_v1, %s7861_s26  ;;  %v5840_v3 = vld [vmem:[%s7926_s4 + $0x90] sm:$0xff]   ;;  %s7930_s26 = smov 98  }
  0x58   : > { %1933 = vperm.xlu0 %5814, %v1923_v31   ;;  %1938 = vperm.xlu1 %5815, %v1924_v32   ;;  %v5847_v31 = vld [vmem:[%s7926_s4 + $0xb8] sm:$0xff]  }
  0x59   : > { %v5850_v32 = vld [vmem:[%s7926_s4 + $0xd8] sm:$0xff]  }
  0x5c   : > { %1948 = vperm.xlu0 %5814, %v1926_v35   ;;  %1943 = vperm.xlu1 %5815, %v1925_v36   ;;  %v2043_v35 = vld [vmem:[%s7854_s2 + $0x90] sm:$0xff]  ;;  %v2044_v36 = vld [vmem:[%s7854_s2 + $0x98] sm:$0xff] }
  0x60   : > { %1958 = vperm.xlu0 %5814, %v1928_v41   ;;  %v2027_v41 = vld [vmem:[%s7854_s2 + $0x10] sm:$0xff] }
  0x8a   : > { %v525_v9 = vpop.permute.xlu1 %524  ;;  %v521_v10 = vpop.permute.xlu0 %520 }
  0x8e   : > { %v527_v11 = vpop.permute.xlu1 %526  ;;  %v523_v12 = vpop.permute.xlu0 %522 }
  0x8f   : > { %547 = vmatprep.subr.bf16.mxu1 %v523_v12  ;;  %v529_v13 = vsel %vm528_vm1, %v521_v10, %v523_v12  ;;  %v530_v17 = vsel %vm528_vm1, %v525_v9, %v527_v11  ;;  %v2042_v12 = vld [vmem:[%s7854_s2 + $0x88] sm:$0xff]  ;;  %vm7886_vm1 = vcmask 65536  }
  0x90   : > { %548 = vmatpush1.bf16.msra.mxu1 %v529_v13  ;;  %v5844_v13 = vld [vmem:[%s7926_s4 + $0xc0] sm:$0xff]  }
  0x91   : > { %549 = vmatprep.subr.bf16.mxu1 %v527_v11  ;;  %v2041_v11 = vld [vmem:[%s7854_s2 + $0x80] sm:$0xff] }
  0x92   : > { %v700_v14 = vpop.permute.xlu1 %699  ;;  %v698_v15 = vpop.permute.xlu0 %697 }
  0x93   : > { %724 = vmatprep.subr.bf16.mxu0 %v700_v14  ;;  %v706_v16 = vsel %vm705_vm2, %v698_v15, %v700_v14  ;;  %v5494_v15 = vpack.c.bf16 %v2042_v12, %v2041_v11 }
  0x94   : > { %550 = vmatpush1.bf16.msra.mxu1 %v530_v17  ;;  %725 = vmatpush1.bf16.msra.mxu0 %v706_v16  ;;  %v1930_v16 = vld [vmem:[%s7927_s5 + $0x38] sm:$0xff] }
  0x95   : > { %1968 = vperm.xlu0 %5814, %v1930_v16  }
  0x96   : > { %v704_v19 = vpop.permute.xlu1 %703  ;;  %v702_v20 = vpop.permute.xlu0 %701 }
  0x97   : > { %726 = vmatprep.subr.bf16.mxu0 %v704_v19  ;;  %4830 = vmatmul.mubr.msk.bf16.vlgmr.msra.gmra.mrb[0].mxu1 %vm7885_vm0, %v5825_v18  ;;  %v707_v21 = vsel %vm705_vm2, %v702_v20, %v704_v19  ;;  %v5843_v18 = vld [vmem:[%s7926_s4 + $0xa8] sm:$0xff]   ;;  %vm7890_vm2 = vcmask 139336  }
  0x98   : > { %589 = vmatprep.mubr.bf16.mxu1 %v5875_v0  ;;  %727 = vmatpush1.bf16.msra.mxu0 %v707_v21  ;;  %v1927_v21 = vld [vmem:[%s7927_s5 + $0x20] sm:$0xff] }
  0x99   : > { %1953 = vperm.xlu1 %5815, %v1927_v21  }
  0x9a   : > { %v877_v23 = vpop.permute.xlu1 %876  ;;  %v875_v24 = vpop.permute.xlu0 %874 }
  0x9b   : > { %901 = vmatprep.subr.bf16.mxu1 %v877_v23  ;;  %4846 = vmatmul.mubr.msk.bf16.vlgmr.msra.gmra.mrb[16].mxu0 %vm7885_vm0, %v5828_v22  ;;  %v883_v26 = vsel %vm882_vm3, %v875_v24, %v877_v23  ;;  %v3327_v22 = vld [vmem:[%s7928_s6] sm:$0x1]  ;;  %v5846_v24 = vld [vmem:[%s7926_s4 + $0xc8] sm:$0xff]  }
  0x9c   : > { %766 = vmatprep.mubr.bf16.mxu0 %v5875_v0  ;;  %902 = vmatpush1.bf16.msra.mxu1 %v883_v26  ;;  %v3771_v26 = vld [vmem:[%s7928_s6 + $0x1] sm:$0x1] }
  0x9d   : > { %3330 = vperm.xlu0 %5814, %v3327_v22  }
  0x9e   : > { %v881_v27 = vpop.permute.xlu1 %880  ;;  %v879_v28 = vpop.permute.xlu0 %878 }
  0x9f   : > { %903 = vmatprep.subr.bf16.mxu1 %v881_v27  ;;  %4831 = vmatmul.mubr.msk.bf16.gmra.mrb[4].mxu1 %vm7885_vm0, %v5827_v25  ;;  %v884_v30 = vsel %vm882_vm3, %v879_v28, %v881_v27  ;;  %v1929_v25 = vld [vmem:[%s7927_s5 + $0x30] sm:$0xff]  ;;  %v4659_v28 = vld [vmem:[%s7928_s6 + $0x3] sm:$0x1]  ;;  %s7968_s5 = smov 100  }
  0xa0   : > { %599 = vmatprep.mubr.bf16.mxu1 %v5875_v0  ;;  %904 = vmatpush1.bf16.msra.mxu1 %v884_v30  ;;  %v5845_v27 = vld [vmem:[%s7926_s4 + $0xb0] sm:$0xff]  }
  0xa1   : > { %1963 = vperm.xlu1 %5815, %v1929_v25   ;;  %3774 = vperm.xlu0 %5814, %v3771_v26   ;;  %v5848_v30 = vld [vmem:[%s7926_s4 + $0xd0] sm:$0xff]   ;;  %v2038_v25 = vld [vmem:[%s7854_s2 + $0x68] sm:$0xff] }
  0xa2   : > { %v1054_v33 = vpop.permute.xlu1 %1053  ;;  %v1052_v34 = vpop.permute.xlu0 %1051  ;;  %v2055_v26 = vld [vmem:[%s7854_s2 + $0xf0] sm:$0xff] }
  0xa3   : > { %1078 = vmatprep.subr.bf16.mxu0 %v1054_v33  ;;  %4847 = vmatmul.mubr.msk.bf16.gmra.mrb[20].mxu0 %vm7885_vm0, %v5830_v29  ;;  %v1060_v38 = vsel %vm1059_vm4, %v1052_v34, %v1054_v33  ;;  %v4215_v29 = vld [vmem:[%s7928_s6 + $0x2] sm:$0x1]  ;;  %v2026_v34 = vld [vmem:[%s7854_s2 + $0x8] sm:$0xff]  ;;  %s7949_s6 = smov 86  }
  0xa4   : > { %776 = vmatprep.mubr.bf16.mxu0 %v5875_v0  ;;  %1079 = vmatpush1.bf16.msra.mxu0 %v1060_v38  ;;  %v2025_v33 = vld [vmem:[%s7854_s2] sm:$0xff] }
  0xa5   : > { %4662 = vperm.xlu1 %5815, %v4659_v28   ;;  %4218 = vperm.xlu0 %5814, %v4215_v29   ;;  %v5496_v38 = vpack.c.bf16 %v2026_v34, %v2025_v33  ;;  %v5855_v28 = vld [vmem:[%s7926_s4 + $0xf8] sm:$0xff]   ;;  %v6337_v34 = vld [vmem:[%s6321_s12 + $0x8] sm:$0xff] }
  0xa6   : > { %v1058_v39 = vpop.permute.xlu1 %1057  ;;  %v1056_v40 = vpop.permute.xlu0 %1055  ;;  %v2040_v33 = vld [vmem:[%s7854_s2 + $0x78] sm:$0xff] }
  0xa7   : > { %1080 = vmatprep.subr.bf16.mxu0 %v1058_v39  ;;  %4832 = vmatmul.mubr.msk.bf16.gmra.mrb[8].mxu1 %vm7885_vm0, %v5829_v37  ;;  %v1061_v43 = vsel %vm1059_vm4, %v1056_v40, %v1058_v39  ;;  %v5849_v37 = vld [vmem:[%s7926_s4 + $0xe0] sm:$0xff]   ;;  %v5498_v40 = vpack.c.bf16 %v2044_v36, %v2043_v35 }
  0xa8   : > { %609 = vmatprep.mubr.bf16.mxu1 %v5875_v0  ;;  %1081 = vmatpush1.bf16.msra.mxu0 %v1061_v43  ;;  %v2057_v36 = vld [vmem:[%s7854_s2 + $0x100] sm:$0xff] }
  0xaa   : > { %v1231_v44 = vpop.permute.xlu1 %1230  ;;  %v1229_v45 = vpop.permute.xlu0 %1228 }
  0xab   : > { %1255 = vmatprep.subr.bf16.mxu1 %v1231_v44  ;;  %4848 = vmatmul.mubr.msk.bf16.gmra.mrb[24].mxu0 %vm7885_vm0, %v5832_v42  ;;  %v1237_v52 = vsel %vm1236_vm5, %v1229_v45, %v1231_v44  ;;  %v2028_v42 = vld [vmem:[%s7854_s2 + $0x18] sm:$0xff]  ;;  %v2045_v44 = vld [vmem:[%s7854_s2 + $0xa0] sm:$0xff]  ;;  %v2046_v45 = vld [vmem:[%s7854_s2 + $0xa8] sm:$0xff] }
  0xac   : > { %786 = vmatprep.mubr.bf16.mxu0 %v5875_v0 }
  0xae   : > { %v1235_v47 = vpop.permute.xlu1 %1234  ;;  %v1233_v49 = vpop.permute.xlu0 %1232 }
  0xaf   : > { %4833 = vmatmul.mubr.msk.bf16.gmra.mrb[12].mxu1 %vm7885_vm0, %v5831_v46  ;;  %v1238_v56 = vsel %vm1236_vm5, %v1233_v49, %v1235_v47  ;;  %v5500_v49 = vpack.c.bf16 %v2028_v42, %v2027_v41 }
  0xb0   : > { %933 = vmatprep.mubr.bf16.mxu1 %v5875_v0 }
  0xb2   : > { %v1408_v50 = vpop.permute.xlu1 %1407  ;;  %v1406_v53 = vpop.permute.xlu0 %1405 }
  0xb3   : > { %1432 = vmatprep.subr.bf16.mxu0 %v1408_v50  ;;  %4849 = vmatmul.mubr.msk.bf16.gmra.mrb[28].mxu0 %vm7885_vm0, %v5834_v48  ;;  %v1414_v58 = vsel %vm1413_vm6, %v1406_v53, %v1408_v50  ;;  %v5502_v50 = vpack.c.bf16 %v2046_v45, %v2045_v44  ;;  %v2047_v53 = vld [vmem:[%s7854_s2 + $0xb0] sm:$0xff]  ;;  %v2060_v44 = vld [vmem:[%s7854_s2 + $0x118] sm:$0xff]  ;;  %v6362_v45 = vld [vmem:[%s6321_s12] sm:$0xff] }
  0xb4   : > { %1110 = vmatprep.mubr.bf16.mxu0 %v5875_v0 }
  0xb6   : > { %v1412_v54 = vpop.permute.xlu1 %1411  ;;  %v1410_v60 = vpop.permute.xlu0 %1409 }
  0xb7   : > { %4862 = vmatmul.mubr.msk.bf16.vlgmr.msra.gmra.mrb[16].mxu1 %vm7885_vm0, %v5833_v51  ;;  %v1415_v62 = vsel %vm1413_vm6, %v1410_v60, %v1412_v54  ;;  %v2029_v51 = vld [vmem:[%s7854_s2 + $0x20] sm:$0xff]  ;;  %v2032_v60 = vld [vmem:[%s7854_s2 + $0x38] sm:$0xff] }
  0xb8   : > { %943 = vmatprep.mubr.bf16.mxu1 %v5875_v0  ;;  %1256 = vmatpush1.bf16.msra.mxu1 %v1237_v52  ;;  %v2030_v52 = vld [vmem:[%s7854_s2 + $0x28] sm:$0xff] }
  0xb9   : > { %1257 = vmatprep.subr.bf16.mxu1 %v1235_v47  ;;  %v5852_v47 = vld [vmem:[%s7926_s4 + $0x100] sm:$0xff]  }
  0xba   : > { %v1585_v57 = vpop.permute.xlu1 %1584  ;;  %v1583_v4 = vpop.permute.xlu0 %1582 }
  0xbb   : > { %4878 = vmatmul.mubr.msk.bf16.vlgmr.msra.gmra.mrb[32].mxu0 %vm7885_vm0, %v5836_v55  ;;  %v1591_v9 = vsel %vm7892_vm7, %v1583_v4, %v1585_v57  ;;  %v5851_v55 = vld [vmem:[%s7926_s4 + $0xe8] sm:$0xff]  }
  0xbc   : > { %1120 = vmatprep.mubr.bf16.mxu0 %v5875_v0  ;;  %1258 = vmatpush1.bf16.msra.mxu1 %v1238_v56  ;;  %v5504_v56 = vpack.c.bf16 %v2030_v52, %v2029_v51  ;;  %v6380_v51 = vld [vmem:[%s6321_s12 + $0x28] sm:$0xff]  ;;  %v4967_v52 = vld [vmem:[%s7854_s2 + $0x1a0] sm:$0xff] }
  0xbd   : > { %1433 = vmatpush1.bf16.msra.mxu0 %v1414_v58  ;;  %1609 = vmatprep.subr.bf16.mxu1 %v1585_v57 }
  0xbe   : > { %v1589_v61 = vpop.permute.xlu1 %1588  ;;  %1434 = vmatprep.subr.bf16.mxu0 %v1412_v54  ;;  %v1587_v7 = vpop.permute.xlu0 %1586  ;;  %v2048_v54 = vld [vmem:[%s7854_s2 + $0xb8] sm:$0xff] }
  0xbf   : > { %4863 = vmatmul.mubr.msk.bf16.gmra.mrb[20].mxu1 %vm7885_vm0, %v5835_v59  ;;  %v1592_v14 = vsel %vm7892_vm7, %v1587_v7, %v1589_v61  ;;  %v5506_v58 = vpack.c.bf16 %v2048_v54, %v2047_v53  ;;  %v2031_v59 = vld [vmem:[%s7854_s2 + $0x30] sm:$0xff]  ;;  %v2034_v7 = vld [vmem:[%s7854_s2 + $0x48] sm:$0xff] }
  0xc0   : > { %953 = vmatprep.mubr.bf16.mxu1 %v5875_v0  ;;  %v5508_v4 = vpack.c.bf16 %v2032_v60, %v2031_v59  ;;  %v4968_v53 = vld [vmem:[%s7854_s2 + $0x1a8] sm:$0xff]  ;;  %v4969_v59 = vld [vmem:[%s7854_s2 + $0x1b0] sm:$0xff]  ;;  %v4970_v60 = vld [vmem:[%s7854_s2 + $0x1b8] sm:$0xff] }
  0xc1   : > { %1435 = vmatpush1.bf16.msra.mxu0 %v1415_v62  ;;  %v2049_v62 = vld [vmem:[%s7854_s2 + $0xc0] sm:$0xff]  ;;  %v5542_v54 = vpack.c.bf16 %v4968_v53, %v4967_v52 }
  0xc2   : > { %v1762_v1 = vpop.permute.xlu1 %1761  ;;  %v1760_v10 = vpop.permute.xlu0 %1759  ;;  %v4993_v53 = vld [vmem:[%s7854_s2 + $0x240] sm:$0xff] }
  0xc3   : > { %1786 = vmatprep.subr.bf16.mxu0 %v1762_v1  ;;  %4879 = vmatmul.mubr.msk.bf16.gmra.mrb[36].mxu0 %vm7885_vm0, %v5838_v63  ;;  %v1768_v17 = vsel %vm7893_vm8, %v1760_v10, %v1762_v1  ;;  %v2050_v63 = vld [vmem:[%s7854_s2 + $0xc8] sm:$0xff]  ;;  %v5853_v10 = vld [vmem:[%s7926_s4 + $0xf0] sm:$0xff]  }
  0xc4   : > { %1130 = vmatprep.mubr.bf16.mxu0 %v5875_v0 }
  0xc6   : > { %v1766_v19 = vpop.permute.xlu1 %1765  ;;  %v1764_v20 = vpop.permute.xlu0 %1763 }
  0xc7   : > { %4864 = vmatmul.mubr.msk.bf16.gmra.mrb[24].mxu1 %vm7885_vm0, %v5837_v2  ;;  %v1769_v23 = vsel %vm7893_vm8, %v1764_v20, %v1766_v19  ;;  %v5854_v2 = vld [vmem:[%s7926_s4 + $0x108] sm:$0xff]   ;;  %v5856_v20 = vld [vmem:[%s7926_s4 + $0x110] sm:$0xff]  }
  0xc8   : > { %963 = vmatprep.mubr.bf16.mxu1 %v5875_v0 }
  0xcb   : > { %4880 = vmatmul.mubr.msk.bf16.gmra.mrb[40].mxu0 %vm7885_vm0, %v5840_v3 }
  0xcc   : > { %1140 = vmatprep.mubr.bf16.mxu0 %v5875_v0 }
  0xcf   : > { %4865 = vmatmul.mubr.msk.bf16.gmra.mrb[28].mxu1 %vm7885_vm0, %v5839_v5  ;;  %v5510_v5 = vpack.c.bf16 %v2050_v63, %v2049_v62  ;;  %v4953_v62 = vld [vmem:[%s7854_s2 + $0x130] sm:$0xff]  ;;  %v4954_v63 = vld [vmem:[%s7854_s2 + $0x138] sm:$0xff] }
  0xd0   : > { %1287 = vmatprep.mubr.bf16.mxu1 %v5875_v0 }
  0xd3   : > { %4881 = vmatmul.mubr.msk.bf16.gmra.mrb[44].mxu0 %vm7885_vm0, %v5842_v6  ;;  %v2033_v6 = vld [vmem:[%s7854_s2 + $0x40] sm:$0xff] }
  0xd4   : > { %1464 = vmatprep.mubr.bf16.mxu0 %v5875_v0  ;;  %v5512_v11 = vpack.c.bf16 %v2034_v7, %v2033_v6  ;;  %v4955_v6 = vld [vmem:[%s7854_s2 + $0x140] sm:$0xff]  ;;  %v4956_v7 = vld [vmem:[%s7854_s2 + $0x148] sm:$0xff] }
  0xd7   : > { %4894 = vmatmul.mubr.msk.bf16.vlgmr.msra.gmra.mrb[32].mxu1 %vm7885_vm0, %v5841_v8  ;;  %v2051_v8 = vld [vmem:[%s7854_s2 + $0xd0] sm:$0xff] }
  0xd8   : > { %1297 = vmatprep.mubr.bf16.mxu1 %v5875_v0  ;;  %1610 = vmatpush1.bf16.msra.mxu1 %v1591_v9  ;;  %v2052_v9 = vld [vmem:[%s7854_s2 + $0xd8] sm:$0xff] }
  0xd9   : > { %1611 = vmatprep.subr.bf16.mxu1 %v1589_v61 }
  0xdb   : > { %4910 = vmatmul.mubr.msk.bf16.vlgmr.msra.gmra.mrb[48].mxu0 %vm7885_vm0, %v5844_v13  ;;  %v5514_v13 = vpack.c.bf16 %v2052_v9, %v2051_v8  ;;  %v5552_v8 = vpack.c.bf16 %v4956_v7, %v4955_v6  ;;  %v4973_v9 = vld [vmem:[%s7854_s2 + $0x1d0] sm:$0xff] }
  0xdc   : > { %1474 = vmatprep.mubr.bf16.mxu0 %v5875_v0  ;;  %1612 = vmatpush1.bf16.msra.mxu1 %v1592_v14  ;;  %v2035_v14 = vld [vmem:[%s7854_s2 + $0x50] sm:$0xff] }
  0xdd   : > { %1787 = vmatpush1.bf16.msra.mxu0 %v1768_v17  ;;  %5495 = vmatprep.subr.bf16.mxu1 %v5494_v15  ;;  %v2036_v15 = vld [vmem:[%s7854_s2 + $0x58] sm:$0xff]  ;;  %v2053_v17 = vld [vmem:[%s7854_s2 + $0xe0] sm:$0xff]  ;;  %v5015_v7 = vld [vmem:[%s7854_s2 + $0x2f0] sm:$0xff] }
  0xde   : > { %1788 = vmatprep.subr.bf16.mxu0 %v1766_v19  ;;  %v5516_v22 = vpack.c.bf16 %v2036_v15, %v2035_v14  ;;  %v4958_v14 = vld [vmem:[%s7854_s2 + $0x158] sm:$0xff] }
  0xdf   : > { %4895 = vmatmul.mubr.msk.bf16.gmra.mrb[36].mxu1 %vm7885_vm0, %v5843_v18  ;;  %v2054_v18 = vld [vmem:[%s7854_s2 + $0xe8] sm:$0xff] }
  0xe0   : > { %1307 = vmatprep.mubr.bf16.mxu1 %v5875_v0 }
  0xe1   : > { %1789 = vmatpush1.bf16.msra.mxu0 %v1769_v23  ;;  %v5518_v23 = vpack.c.bf16 %v2054_v18, %v2053_v17  ;;  %v4976_v17 = vld [vmem:[%s7854_s2 + $0x1e8] sm:$0xff] }
  0xe2   : > { %5543 = vmatprep.subr.bf16.mxu0 %v5542_v54  ;;  %v4994_v54 = vld [vmem:[%s7854_s2 + $0x248] sm:$0xff] }
  0xe3   : > { %4911 = vmatmul.mubr.msk.bf16.gmra.mrb[52].mxu0 %vm7885_vm0, %v5846_v24  ;;  %v2037_v24 = vld [vmem:[%s7854_s2 + $0x60] sm:$0xff] }
  0xe4   : > { %1484 = vmatprep.mubr.bf16.mxu0 %v5875_v0  ;;  %v5520_v29 = vpack.c.bf16 %v2038_v25, %v2037_v24  ;;  %v4978_v24 = vld [vmem:[%s7854_s2 + $0x1f8] sm:$0xff] }
  0xe7   : > { %4896 = vmatmul.mubr.msk.bf16.gmra.mrb[40].mxu1 %vm7885_vm0, %v5845_v27  ;;  %v2056_v27 = vld [vmem:[%s7854_s2 + $0xf8] sm:$0xff] }
  0xe8   : > { %1317 = vmatprep.mubr.bf16.mxu1 %v5875_v0 }
  0xeb   : > { %4912 = vmatmul.mubr.msk.bf16.gmra.mrb[56].mxu0 %vm7885_vm0, %v5848_v30 }
  0xec   : > { %1494 = vmatprep.mubr.bf16.mxu0 %v5875_v0 }
  0xef   : > { %4897 = vmatmul.mubr.msk.bf16.gmra.mrb[44].mxu1 %vm7885_vm0, %v5847_v31  ;;  %v5522_v31 = vpack.c.bf16 %v2056_v27, %v2055_v26  ;;  %v4961_v26 = vld [vmem:[%s7854_s2 + $0x170] sm:$0xff]  ;;  %v4962_v27 = vld [vmem:[%s7854_s2 + $0x178] sm:$0xff] }
  0xf0   : > { %1641 = vmatprep.mubr.bf16.mxu1 %v5875_v0 }
  0xf3   : > { %4913 = vmatmul.mubr.msk.bf16.gmra.mrb[60].mxu0 %vm7885_vm0, %v5850_v32  ;;  %v2039_v32 = vld [vmem:[%s7854_s2 + $0x70] sm:$0xff] }
  0xf4   : > { %1818 = vmatprep.mubr.bf16.mxu0 %v5875_v0  ;;  %v6202_v39 = vpop.f32.mrb[0].mxu0  ;;  %v5524_v41 = vpack.c.bf16 %v2040_v33, %v2039_v32  ;;  %v4963_v33 = vld [vmem:[%s7854_s2 + $0x180] sm:$0xff] }
  0xf5   : > { %v437_v43 = vpop.f32.mrb[1].mxu0 }
  0xf6   : > { %476 = vst.msk [vmem:[#allocation2 + $0x8] sm:$0xff] %vm475_vm9, %v437_v43  ;;  %v6217_v46 = vpop.f32.mrb[2].mxu0  ;;  %v2059_v43 = vld [vmem:[%s7854_s2 + $0x110] sm:$0xff] }
  0xf7   : > { %4926 = vmatmul.mubr.msk.bf16.vlgmr.msra.gmra.mrb[48].mxu1 %vm7885_vm0, %v5849_v37  ;;  %v441_v48 = vpop.f32.mrb[3].mxu0 }
  0xf8   : > { %5497 = vmatpush3.bf16.msra.mxu1 %v5496_v38  ;;  %1651 = vmatprep.mubr.bf16.mxu1 %v5875_v0  ;;  %478 = vst.msk [vmem:[#allocation2 + $0x18] sm:$0xff] %vm475_vm9, %v441_v48  ;;  %v5857_v38 = vld [vmem:[%s7926_s4 + $0x118] sm:$0xff]   ;;  %v5530_v48 = vpack.c.bf16 %v2060_v44, %v2059_v43  ;;  %v5009_v44 = vld [vmem:[%s7854_s2 + $0x2c0] sm:$0xff]  ;;  %s7967_s4 = smov 111  }
  0xf9   : > { %5499 = vmatprep.subr.bf16.mxu1 %v5498_v40 }
  0xfb   : > { %4942 = vmatmul.mubr.msk.bf16.vlgmr.msra.gmra.mrb[64].mxu0 %vm7885_vm0, %v5852_v47  ;;  %v6366_v47 = vld [vmem:[%s6321_s12 + $0x20] sm:$0xff] }
  0xfc   : > { %5501 = vmatpush3.bf16.msra.mxu1 %v5500_v49  ;;  %1828 = vmatprep.mubr.bf16.mxu0 %v5875_v0  ;;  %v6242_v57 = vpop.f32.mrb[4].mxu0  ;;  %v6371_v49 = vld [vmem:[%s6321_s12 + $0x18] sm:$0xff] }
  0xfd   : > { %5503 = vmatprep.subr.bf16.mxu1 %v5502_v50  ;;  %v447_v61 = vpop.f32.mrb[5].mxu0  ;;  %v6374_v50 = vld [vmem:[%s6321_s12 + $0x10] sm:$0xff] }
  0xfe   : > { %480 = vst.msk [vmem:[#allocation2 + $0x28] sm:$0xff] %vm475_vm9, %v447_v61  ;;  %v6257_v1 = vpop.f32.mrb[6].mxu0  ;;  %v5546_v61 = vpack.c.bf16 %v4970_v60, %v4969_v59  ;;  %v4995_v60 = vld [vmem:[%s7854_s2 + $0x250] sm:$0xff] }
  0xff   : > { %4927 = vmatmul.mubr.msk.bf16.gmra.mrb[52].mxu1 %vm7885_vm0, %v5851_v55  ;;  %v451_v3 = vpop.f32.mrb[7].mxu0  ;;  %v4951_v55 = vld [vmem:[%s7854_s2 + $0x120] sm:$0xff] }
 0x100   : > { %5505 = vmatpush3.bf16.msra.mxu1 %v5504_v56  ;;  %1661 = vmatprep.mubr.bf16.mxu1 %v5875_v0  ;;  %482 = vst.msk [vmem:[#allocation2 + $0x38] sm:$0xff] %vm475_vm9, %v451_v3  ;;  %v4952_v56 = vld [vmem:[%s7854_s2 + $0x128] sm:$0xff]  ;;  %v4971_v3 = vld [vmem:[%s7854_s2 + $0x1c0] sm:$0xff] }
 0x101   : > { %5507 = vmatprep.subr.bf16.mxu1 %v5506_v58  ;;  %v5544_v58 = vpack.c.bf16 %v4952_v56, %v4951_v55  ;;  %v5592_v55 = vpack.c.bf16 %v4994_v54, %v4993_v53  ;;  %v5011_v56 = vld [vmem:[%s7854_s2 + $0x2d0] sm:$0xff] }
 0x102   : > { %v5023_v53 = vld [vmem:[%s7854_s2 + $0x330] sm:$0xff] }
 0x103   : > { %4943 = vmatmul.mubr.msk.bf16.gmra.mrb[68].mxu0 %vm7885_vm0, %v5854_v2  ;;  %v5548_v2 = vpack.c.bf16 %v4954_v63, %v4953_v62  ;;  %v5013_v63 = vld [vmem:[%s7854_s2 + $0x2e0] sm:$0xff] }
 0x104   : > { %5509 = vmatpush3.bf16.msra.mxu1 %v5508_v4  ;;  %1838 = vmatprep.mubr.bf16.mxu0 %v5875_v0  ;;  %v6282_v12 = vpop.f32.mrb[8].mxu0  ;;  %v4972_v4 = vld [vmem:[%s7854_s2 + $0x1c8] sm:$0xff] }
 0x105   : > { %5511 = vmatprep.subr.bf16.mxu1 %v5510_v5  ;;  %v457_v16 = vpop.f32.mrb[9].mxu0  ;;  %5545 = vmatpush3.bf16.msra.mxu0 %v5544_v58  ;;  %v5550_v5 = vpack.c.bf16 %v4972_v4, %v4971_v3  ;;  %v5012_v58 = vld [vmem:[%s7854_s2 + $0x2d8] sm:$0xff]  ;;  %v4997_v4 = vld [vmem:[%s7854_s2 + $0x260] sm:$0xff] }
 0x106   : > { %484 = vst.msk [vmem:[#allocation2 + $0x48] sm:$0xff] %vm475_vm9, %v457_v16  ;;  %v6298_v19 = vpop.f32.mrb[10].mxu0  ;;  %5547 = vmatprep.subr.bf16.mxu0 %v5546_v61  ;;  %v4975_v16 = vld [vmem:[%s7854_s2 + $0x1e0] sm:$0xff]  ;;  %v5594_v59 = vpack.c.bf16 %v5012_v58, %v5011_v56  ;;  %v4996_v61 = vld [vmem:[%s7854_s2 + $0x258] sm:$0xff]  ;;  %v5007_v56 = vld [vmem:[%s7854_s2 + $0x2b0] sm:$0xff] }
 0x107   : > { %4928 = vmatmul.mubr.msk.bf16.gmra.mrb[56].mxu1 %vm7885_vm0, %v5853_v10  ;;  %v461_v21 = vpop.f32.mrb[11].mxu0  ;;  %v4974_v10 = vld [vmem:[%s7854_s2 + $0x1d8] sm:$0xff]  ;;  %v5558_v18 = vpack.c.bf16 %v4976_v17, %v4975_v16  ;;  %v5596_v62 = vpack.c.bf16 %v4996_v61, %v4995_v60  ;;  %v5001_v16 = vld [vmem:[%s7854_s2 + $0x280] sm:$0xff]  ;;  %v5002_v17 = vld [vmem:[%s7854_s2 + $0x288] sm:$0xff] }
 0x108   : > { %5513 = vmatpush3.bf16.msra.mxu1 %v5512_v11  ;;  %1671 = vmatprep.mubr.bf16.mxu1 %v5875_v0  ;;  %486 = vst.msk [vmem:[#allocation2 + $0x58] sm:$0xff] %vm475_vm9, %v461_v21  ;;  %v5554_v11 = vpack.c.bf16 %v4974_v10, %v4973_v9  ;;  %v4960_v21 = vld [vmem:[%s7854_s2 + $0x168] sm:$0xff]  ;;  %v4999_v9 = vld [vmem:[%s7854_s2 + $0x270] sm:$0xff]  ;;  %v5000_v10 = vld [vmem:[%s7854_s2 + $0x278] sm:$0xff] }
 0x109   : > { %5515 = vmatprep.subr.bf16.mxu1 %v5514_v13  ;;  %5549 = vmatpush3.bf16.msra.mxu0 %v5548_v2  ;;  %v4957_v13 = vld [vmem:[%s7854_s2 + $0x150] sm:$0xff]  ;;  %v5014_v2 = vld [vmem:[%s7854_s2 + $0x2e8] sm:$0xff]  ;;  %v5008_v58 = vld [vmem:[%s7854_s2 + $0x2b8] sm:$0xff] }
 0x10a   : > { %5551 = vmatprep.subr.bf16.mxu0 %v5550_v5  ;;  %v5556_v15 = vpack.c.bf16 %v4958_v14, %v4957_v13  ;;  %v5598_v3 = vpack.c.bf16 %v5014_v2, %v5013_v63  ;;  %v4998_v5 = vld [vmem:[%s7854_s2 + $0x268] sm:$0xff]  ;;  %v5017_v13 = vld [vmem:[%s7854_s2 + $0x300] sm:$0xff]  ;;  %v5620_v61 = vpack.c.bf16 %v5008_v58, %v5007_v56 }
 0x10b   : > { %4944 = vmatmul.mubr.msk.bf16.gmra.mrb[72].mxu0 %vm7885_vm0, %v5856_v20  ;;  %v4959_v20 = vld [vmem:[%s7854_s2 + $0x160] sm:$0xff]  ;;  %v5600_v6 = vpack.c.bf16 %v4998_v5, %v4997_v4  ;;  %v5018_v14 = vld [vmem:[%s7854_s2 + $0x308] sm:$0xff] }
 0x10c   : > { %5517 = vmatpush3.bf16.msra.mxu1 %v5516_v22  ;;  %1848 = vmatprep.mubr.bf16.mxu0 %v5875_v0  ;;  %v6328_v30 = vpop.f32.mrb[12].mxu0  ;;  %v2058_v0 = vld [vmem:[%s7854_s2 + $0x108] sm:$0xff]  ;;  %v5560_v22 = vpack.c.bf16 %v4960_v21, %v4959_v20  ;;  %v5019_v20 = vld [vmem:[%s7854_s2 + $0x310] sm:$0xff]  ;;  %v5020_v21 = vld [vmem:[%s7854_s2 + $0x318] sm:$0xff] }
 0x10d   : > { %5519 = vmatprep.subr.bf16.mxu1 %v5518_v23  ;;  %v467_v35 = vpop.f32.mrb[13].mxu0  ;;  %v5526_v42 = vpack.c.bf16 %v2058_v0, %v2057_v36  ;;  %5553 = vmatpush3.bf16.msra.mxu0 %v5552_v8  ;;  %v4977_v23 = vld [vmem:[%s7854_s2 + $0x1f0] sm:$0xff]  ;;  %v5067_v4 = vld [vmem:[%s7854_s2 + $0x460] sm:$0xff]  ;;  %v5068_v5 = vld [vmem:[%s7854_s2 + $0x468] sm:$0xff] }
 0x10e   : > { %488 = vst.msk [vmem:[#allocation2 + $0x68] sm:$0xff] %vm475_vm9, %v467_v35  ;;  %v6346_v37 = vpop.f32.mrb[14].mxu0  ;;  %5555 = vmatprep.subr.bf16.mxu0 %v5554_v11  ;;  %v5562_v25 = vpack.c.bf16 %v4978_v24, %v4977_v23  ;;  %v4964_v35 = vld [vmem:[%s7854_s2 + $0x188] sm:$0xff]  ;;  %v4981_v0 = vld [vmem:[%s7854_s2 + $0x210] sm:$0xff]  ;;  %v5604_v11 = vpack.c.bf16 %v5000_v10, %v4999_v9  ;;  %v5004_v24 = vld [vmem:[%s7854_s2 + $0x298] sm:$0xff] }
 0x10f   : > { %4929 = vmatmul.mubr.msk.bf16.gmra.mrb[60].mxu1 %vm7885_vm0, %v5855_v28  ;;  %v471_v40 = vpop.f32.mrb[15].mxu0  ;;  %v5564_v28 = vpack.c.bf16 %v4962_v27, %v4961_v26  ;;  %v5568_v36 = vpack.c.bf16 %v4964_v35, %v4963_v33  ;;  %v5003_v23 = vld [vmem:[%s7854_s2 + $0x290] sm:$0xff]  ;;  %v627_v10 = vld [vmem:[#allocation2 + $0x38] sm:$0xff] }
 0x110   : > { %5521 = vmatpush3.bf16.msra.mxu1 %v5520_v29  ;;  %2138 = vmatprep.mubr.f32.mxu1 %v6337_v34  ;;  %490 = vst.msk [vmem:[#allocation2 + $0x78] sm:$0xff] %vm475_vm9, %v471_v40  ;;  %v4979_v29 = vld [vmem:[%s7854_s2 + $0x200] sm:$0xff] }
 0x111   : > { %5523 = vmatprep.subr.bf16.mxu1 %v5522_v31  ;;  %5557 = vmatpush3.bf16.msra.mxu0 %v5556_v15  ;;  %v4980_v31 = vld [vmem:[%s7854_s2 + $0x208] sm:$0xff]  ;;  %v5606_v15 = vpack.c.bf16 %v5018_v14, %v5017_v13 }
 0x112   : > { %5559 = vmatprep.subr.bf16.mxu0 %v5558_v18  ;;  %v5566_v32 = vpack.c.bf16 %v4980_v31, %v4979_v29  ;;  %v5608_v18 = vpack.c.bf16 %v5002_v17, %v5001_v16  ;;  %v621_v29 = vld [vmem:[#allocation2 + $0x8] sm:$0xff]  ;;  %v5021_v31 = vld [vmem:[%s7854_s2 + $0x320] sm:$0xff] }
 0x113   : > { %4945 = vmatmul.mubr.msk.bf16.gmra.mrb[76].mxu0 %vm7885_vm0, %v5857_v38  ;;  %v4982_v38 = vld [vmem:[%s7854_s2 + $0x218] sm:$0xff] }
 0x114   : > { %5525 = vmatpush3.bf16.msra.mxu1 %v5524_v41  ;;  %2596 = vmatprep.mubr.f32.mxu0 %v6337_v34  ;;  %v5570_v40 = vpack.c.bf16 %v4982_v38, %v4981_v0  ;;  %v4965_v41 = vld [vmem:[%s7854_s2 + $0x190] sm:$0xff]  ;;  %v5005_v0 = vld [vmem:[%s7854_s2 + $0x2a0] sm:$0xff] }
 0x115   : > { %5527 = vmatprep.subr.bf16.mxu1 %v5526_v42  ;;  %5561 = vmatpush3.bf16.msra.mxu0 %v5560_v22  ;;  %v5610_v22 = vpack.c.bf16 %v5020_v21, %v5019_v20  ;;  %v5069_v20 = vld [vmem:[%s7854_s2 + $0x470] sm:$0xff] }
 0x116   : > { %5563 = vmatprep.subr.bf16.mxu0 %v5562_v25  ;;  %v5612_v25 = vpack.c.bf16 %v5004_v24, %v5003_v23  ;;  %v5884_v23 = vmov 0.0  }
 0x117   : > { %2139 = vmatmul.mubr.f32.vlgmr.msra.gmra.mrb[64].mxu1 %v6362_v45 }
 0x118   : > { %5529 = vmatpush3.bf16.msra.mxu1 %v5526_v42  ;;  %2143 = vmatprep.mubr.f32.mxu1 %v6366_v47  ;;  %v4966_v42 = vld [vmem:[%s7854_s2 + $0x198] sm:$0xff] }
 0x119   : > { %5531 = vmatprep.subr.bf16.mxu1 %v5530_v48  ;;  %5565 = vmatpush3.bf16.msra.mxu0 %v5564_v28  ;;  %v5572_v43 = vpack.c.bf16 %v4966_v42, %v4965_v41  ;;  %v623_v41 = vld [vmem:[#allocation2 + $0x18] sm:$0xff] }
 0x11a   : > { %5567 = vmatprep.subr.bf16.mxu0 %v5566_v32  ;;  %v5022_v32 = vld [vmem:[%s7854_s2 + $0x328] sm:$0xff] }
 0x11b   : > { %2144 = vmatmul.mubr.f32.gmra.mrb[66].mxu1 %v6371_v49 }
 0x11c   : > { %5533 = vmatpush3.bf16.msra.mxu1 %v5530_v48  ;;  %5436 = vmatprep.mubr.msk.f32.mxu1 %vm7885_vm0, %v6374_v50  ;;  %v5010_v48 = vld [vmem:[%s7854_s2 + $0x2c8] sm:$0xff] }
 0x11d   : > { %5569 = vmatpush3.bf16.msra.mxu0 %v5568_v36  ;;  %v5590_v52 = vpack.c.bf16 %v5010_v48, %v5009_v44  ;;  %v5614_v36 = vpack.c.bf16 %v5022_v32, %v5021_v31 }
 0x11e   : > { %5571 = vmatprep.subr.bf16.mxu0 %v5570_v40 }
 0x11f   : > { %5437 = vmatmul.mubr.msk.f32.vlgmr.msra.gmra.mrb[68].mxu1 %vm7885_vm0, %v6380_v51 }
 0x120   : > { %2294 = vmatprep.mubr.f32.mxu1 %v5884_v23 }
 0x121   : > { %5573 = vmatpush3.bf16.msra.mxu0 %v5572_v43 }
 0x122   : > { %5591 = vmatprep.subr.bf16.mxu0 %v5590_v52 }
 0x124   : > { %2597 = vmatmul.mubr.f32.vlgmr.msra.gmra.mrb[80].mxu0 %v6362_v45 }
 0x125   : > { %5593 = vmatpush3.bf16.msra.mxu0 %v5592_v55  ;;  %2601 = vmatprep.mubr.f32.mxu0 %v6366_v47 }
 0x126   : > { %5595 = vmatprep.subr.bf16.mxu0 %v5594_v59 }
 0x128   : > { %2602 = vmatmul.mubr.f32.gmra.mrb[82].mxu0 %v6371_v49 }
 0x129   : > { %5597 = vmatpush3.bf16.msra.mxu0 %v5596_v62  ;;  %3033 = vmatprep.mubr.f32.mxu0 %v6337_v34  ;;  %v5016_v34 = vld [vmem:[%s7854_s2 + $0x2f8] sm:$0xff] }
 0x12a   : > { %5599 = vmatprep.subr.bf16.mxu0 %v5598_v3  ;;  %v5602_v8 = vpack.c.bf16 %v5016_v34, %v5015_v7  ;;  %v625_v3 = vld [vmem:[#allocation2 + $0x28] sm:$0xff]  ;;  %v5670_v34 = vpack.c.bf16 %v5068_v5, %v5067_v4 }
 0x12d   : > { %5601 = vmatpush3.bf16.msra.mxu0 %v5600_v6 }
 0x12e   : > { %5603 = vmatprep.subr.bf16.mxu0 %v5602_v8 }
 0x131   : > { %5605 = vmatpush3.bf16.msra.mxu0 %v5604_v11 }
 0x132   : > { %5607 = vmatprep.subr.bf16.mxu0 %v5606_v15 }
 0x135   : > { %5609 = vmatpush3.bf16.msra.mxu0 %v5608_v18 }
 0x136   : > { %5611 = vmatprep.subr.bf16.mxu0 %v5610_v22 }
 0x139   : > { %5613 = vmatpush3.bf16.msra.mxu0 %v5612_v25 }
 0x13a   : > { %5615 = vmatprep.subr.bf16.mxu0 %v5614_v36 }
 0x16a   : > { %v581_v26 = vpop.f32.mrb[0].mxu1 }
 0x16b   : > { %v636_v27 = vadd.f32 %v581_v26, %v6202_v39  ;;  %v583_v28 = vpop.f32.mrb[1].mxu1  ;;  %v5006_v39 = vld [vmem:[%s7854_s2 + $0x2a8] sm:$0xff] }
 0x16c   : > { %v637_v33 = vadd.f32 %v621_v29, %v583_v28  ;;  %v585_v35 = vpop.f32.mrb[2].mxu1  ;;  %v5616_v42 = vpack.c.bf16 %v5006_v39, %v5005_v0 }
 0x16d   : > { %v638_v38 = vadd.f32 %v585_v35, %v6217_v46  ;;  %v587_v40 = vpop.f32.mrb[3].mxu1  ;;  %v5024_v46 = vld [vmem:[%s7854_s2 + $0x338] sm:$0xff] }
 0x16e   : > { %653 = vst.msk [vmem:[#allocation2 + $0x8] sm:$0xff] %vm475_vm9, %v637_v33  ;;  %v639_v43 = vadd.f32 %v623_v41, %v587_v40  ;;  %v758_v44 = vpop.f32.mrb[16].mxu0  ;;  %5617 = vmatpush3.bf16.msra.mxu0 %v5616_v42  ;;  %v5618_v55 = vpack.c.bf16 %v5024_v46, %v5023_v53  ;;  %v631_v33 = vld [vmem:[#allocation2 + $0x58] sm:$0xff] }
 0x16f   : > { %v6571_v48 = vadd.f32 %v758_v44, %v636_v27  ;;  %v760_v52 = vpop.f32.mrb[17].mxu0  ;;  %v629_v27 = vld [vmem:[#allocation2 + $0x48] sm:$0xff] }
 0x170   : > { %655 = vst.msk [vmem:[#allocation2 + $0x18] sm:$0xff] %vm475_vm9, %v639_v43  ;;  %v762_v54 = vpop.f32.mrb[18].mxu0  ;;  %5619 = vmatprep.subr.bf16.mxu0 %v5618_v55  ;;  %v635_v55 = vld [vmem:[#allocation2 + $0x78] sm:$0xff] }
 0x171   : > { %v6586_v59 = vadd.f32 %v762_v54, %v638_v38  ;;  %v764_v60 = vpop.f32.mrb[19].mxu0 }
 0x172   : > { %v591_v62 = vpop.f32.mrb[4].mxu1  ;;  %5621 = vmatpush3.bf16.msra.mxu0 %v5620_v61 }
 0x173   : > { %v640_v63 = vadd.f32 %v591_v62, %v6242_v57  ;;  %v593_v2 = vpop.f32.mrb[5].mxu1  ;;  %5671 = vmatprep.subr.bf16.mxu0 %v5670_v34 }
 0x174   : > { %v641_v6 = vadd.f32 %v625_v3, %v593_v2  ;;  %v595_v7 = vpop.f32.mrb[6].mxu1 }
 0x175   : > { %v642_v8 = vadd.f32 %v595_v7, %v6257_v1  ;;  %v597_v9 = vpop.f32.mrb[7].mxu1  ;;  %v798_v11 = vld [vmem:[#allocation2 + $0x8] sm:$0xff]  ;;  %3034 = vmatmul.mubr.f32.vlgmr.msra.gmra.mrb[84].mxu0 %v6362_v45  ;;  %v5070_v45 = vld [vmem:[%s7854_s2 + $0x478] sm:$0xff] }
 0x176   : > { %657 = vst.msk [vmem:[#allocation2 + $0x28] sm:$0xff] %vm475_vm9, %v641_v6  ;;  %v643_v57 = vadd.f32 %v627_v10, %v597_v9  ;;  %v814_v13 = vadd.f32 %v798_v11, %v760_v52  ;;  %v768_v14 = vpop.f32.mrb[20].mxu0  ;;  %5673 = vmatpush3.bf16.msra.mxu0 %v5670_v34  ;;  %3038 = vmatprep.mubr.f32.mxu0 %v6366_v47  ;;  %v633_v52 = vld [vmem:[#allocation2 + $0x68] sm:$0xff] }
 0x177   : > { %v800_v15 = vld [vmem:[#allocation2 + $0x18] sm:$0xff]  ;;  %v6598_v16 = vadd.f32 %v768_v14, %v640_v63  ;;  %v770_v17 = vpop.f32.mrb[21].mxu0  ;;  %v5674_v47 = vpack.c.bf16 %v5070_v45, %v5069_v20 }
 0x178   : > { %659 = vst.msk [vmem:[#allocation2 + $0x38] sm:$0xff] %vm475_vm9, %v643_v57  ;;  %830 = vst.msk [vmem:[#allocation2 + $0x8] sm:$0xff] %vm475_vm9, %v814_v13  ;;  %v816_v1 = vadd.f32 %v800_v15, %v764_v60  ;;  %v772_v18 = vpop.f32.mrb[22].mxu0 }
 0x179   : > { %v6609_v21 = vadd.f32 %v772_v18, %v642_v8  ;;  %v774_v22 = vpop.f32.mrb[23].mxu0  ;;  %3039 = vmatmul.mubr.f32.gmra.mrb[86].mxu0 %v6371_v49  ;;  %5675 = vmatprep.subr.bf16.mxu0 %v5674_v47 }
 0x17a   : > { %832 = vst.msk [vmem:[#allocation2 + $0x18] sm:$0xff] %vm475_vm9, %v816_v1  ;;  %v601_v24 = vpop.f32.mrb[8].mxu1  ;;  %5469 = vmatprep.mubr.msk.f32.mxu0 %vm7885_vm0, %v6374_v50  ;;  %5677 = vmatpush3.bf16.msra.mxu0 %v5674_v47 }
 0x17b   : > { %v644_v25 = vadd.f32 %v601_v24, %v6282_v12  ;;  %v603_v26 = vpop.f32.mrb[9].mxu1 }
 0x17c   : > { %v645_v28 = vadd.f32 %v629_v27, %v603_v26  ;;  %v605_v29 = vpop.f32.mrb[10].mxu1 }
 0x17d   : > { %v646_v31 = vadd.f32 %v605_v29, %v6298_v19  ;;  %v607_v32 = vpop.f32.mrb[11].mxu1  ;;  %v802_v35 = vld [vmem:[#allocation2 + $0x28] sm:$0xff]  ;;  %5470 = vmatmul.mubr.msk.f32.vlgmr.msra.gmra.mrb[88].mxu0 %vm7885_vm0, %v6380_v51 }
 0x17e   : > { %661 = vst.msk [vmem:[#allocation2 + $0x48] sm:$0xff] %vm475_vm9, %v645_v28  ;;  %v647_v36 = vadd.f32 %v631_v33, %v607_v32  ;;  %v818_v49 = vadd.f32 %v802_v35, %v770_v17  ;;  %v778_v0 = vpop.f32.mrb[24].mxu0  ;;  %3633 = vmatprep.mubr.f32.mxu0 %v5884_v23 }
 0x17f   : > { %v804_v12 = vld [vmem:[#allocation2 + $0x38] sm:$0xff]  ;;  %v6619_v39 = vadd.f32 %v778_v0, %v644_v25  ;;  %v780_v38 = vpop.f32.mrb[25].mxu0  ;;  %v975_v34 = vld [vmem:[#allocation2 + $0x8] sm:$0xff] }
 0x180   : > { %663 = vst.msk [vmem:[#allocation2 + $0x58] sm:$0xff] %vm475_vm9, %v647_v36  ;;  %834 = vst.msk [vmem:[#allocation2 + $0x28] sm:$0xff] %vm475_vm9, %v818_v49  ;;  %v820_v19 = vadd.f32 %v804_v12, %v774_v22  ;;  %v782_v50 = vpop.f32.mrb[26].mxu0 }
 0x181   : > { %v6626_v40 = vadd.f32 %v782_v50, %v646_v31  ;;  %v784_v41 = vpop.f32.mrb[27].mxu0  ;;  %v977_v57 = vld [vmem:[#allocation2 + $0x18] sm:$0xff] }
 0x182   : > { %836 = vst.msk [vmem:[#allocation2 + $0x38] sm:$0xff] %vm475_vm9, %v820_v19  ;;  %v611_v42 = vpop.f32.mrb[12].mxu1 }
 0x183   : > { %v648_v43 = vadd.f32 %v611_v42, %v6328_v30  ;;  %v613_v44 = vpop.f32.mrb[13].mxu1 }
 0x184   : > { %v649_v53 = vadd.f32 %v633_v52, %v613_v44  ;;  %v615_v51 = vpop.f32.mrb[14].mxu1 }
 0x185   : > { %v650_v46 = vadd.f32 %v615_v51, %v6346_v37  ;;  %v617_v54 = vpop.f32.mrb[15].mxu1  ;;  %v806_v56 = vld [vmem:[#allocation2 + $0x48] sm:$0xff] }
 0x186   : > { %665 = vst.msk [vmem:[#allocation2 + $0x68] sm:$0xff] %vm475_vm9, %v649_v53  ;;  %v651_v58 = vadd.f32 %v635_v55, %v617_v54  ;;  %v822_v60 = vadd.f32 %v806_v56, %v780_v38  ;;  %v788_v61 = vpop.f32.mrb[28].mxu0 }
 0x187   : > { %v808_v62 = vld [vmem:[#allocation2 + $0x58] sm:$0xff]  ;;  %v6632_v63 = vadd.f32 %v788_v61, %v648_v43  ;;  %v790_v2 = vpop.f32.mrb[29].mxu0  ;;  %v979_v26 = vld [vmem:[#allocation2 + $0x28] sm:$0xff] }
 0x188   : > { %667 = vst.msk [vmem:[#allocation2 + $0x78] sm:$0xff] %vm475_vm9, %v651_v58  ;;  %838 = vst.msk [vmem:[#allocation2 + $0x48] sm:$0xff] %vm475_vm9, %v822_v60  ;;  %v824_v30 = vadd.f32 %v808_v62, %v784_v41  ;;  %v792_v3 = vpop.f32.mrb[30].mxu0 }
 0x189   : > { %v6636_v4 = vadd.f32 %v792_v3, %v650_v46  ;;  %v794_v37 = vpop.f32.mrb[31].mxu0  ;;  %v981_v32 = vld [vmem:[#allocation2 + $0x38] sm:$0xff] }
 0x18a   : > { %840 = vst.msk [vmem:[#allocation2 + $0x58] sm:$0xff] %vm475_vm9, %v824_v30  ;;  %v935_v5 = vpop.f32.mrb[16].mxu1 }
 0x18b   : > { %v990_v6 = vadd.f32 %v935_v5, %v6571_v48  ;;  %v937_v7 = vpop.f32.mrb[17].mxu1 }
 0x18c   : > { %v991_v8 = vadd.f32 %v975_v34, %v937_v7  ;;  %v939_v9 = vpop.f32.mrb[18].mxu1 }
 0x18d   : > { %v992_v10 = vadd.f32 %v939_v9, %v6586_v59  ;;  %v941_v11 = vpop.f32.mrb[19].mxu1  ;;  %v810_v13 = vld [vmem:[#allocation2 + $0x68] sm:$0xff] }
 0x18e   : > { %1007 = vst.msk [vmem:[#allocation2 + $0x8] sm:$0xff] %vm475_vm9, %v991_v8  ;;  %v993_v14 = vadd.f32 %v977_v57, %v941_v11  ;;  %v826_v15 = vadd.f32 %v810_v13, %v790_v2  ;;  %v1112_v17 = vpop.f32.mrb[32].mxu0 }
 0x18f   : > { %v812_v1 = vld [vmem:[#allocation2 + $0x78] sm:$0xff]  ;;  %v6642_v18 = vadd.f32 %v1112_v17, %v990_v6  ;;  %v1114_v20 = vpop.f32.mrb[33].mxu0  ;;  %v983_v44 = vld [vmem:[#allocation2 + $0x48] sm:$0xff] }
 0x190   : > { %1009 = vst.msk [vmem:[#allocation2 + $0x18] sm:$0xff] %vm475_vm9, %v993_v14  ;;  %842 = vst.msk [vmem:[#allocation2 + $0x68] sm:$0xff] %vm475_vm9, %v826_v15  ;;  %v828_v48 = vadd.f32 %v812_v1, %v794_v37  ;;  %v1116_v45 = vpop.f32.mrb[34].mxu0 }
 0x191   : > { %v6646_v22 = vadd.f32 %v1116_v45, %v992_v10  ;;  %v1118_v59 = vpop.f32.mrb[35].mxu0  ;;  %v985_v54 = vld [vmem:[#allocation2 + $0x58] sm:$0xff] }
 0x192   : > { %844 = vst.msk [vmem:[#allocation2 + $0x78] sm:$0xff] %vm475_vm9, %v828_v48  ;;  %v945_v47 = vpop.f32.mrb[20].mxu1 }
 0x193   : > { %v994_v24 = vadd.f32 %v945_v47, %v6598_v16  ;;  %v947_v25 = vpop.f32.mrb[21].mxu1 }
 0x194   : > { %v995_v27 = vadd.f32 %v979_v26, %v947_v25  ;;  %v949_v28 = vpop.f32.mrb[22].mxu1 }
 0x195   : > { %v996_v29 = vadd.f32 %v949_v28, %v6609_v21  ;;  %v951_v31 = vpop.f32.mrb[23].mxu1  ;;  %v1152_v33 = vld [vmem:[#allocation2 + $0x8] sm:$0xff] }
 0x196   : > { %1011 = vst.msk [vmem:[#allocation2 + $0x28] sm:$0xff] %vm475_vm9, %v995_v27  ;;  %v997_v35 = vadd.f32 %v981_v32, %v951_v31  ;;  %v1168_v36 = vadd.f32 %v1152_v33, %v1114_v20  ;;  %v1122_v49 = vpop.f32.mrb[36].mxu0 }
 0x197   : > { %v1154_v0 = vld [vmem:[#allocation2 + $0x18] sm:$0xff]  ;;  %v6652_v12 = vadd.f32 %v1122_v49, %v994_v24  ;;  %v1124_v38 = vpop.f32.mrb[37].mxu0  ;;  %v987_v7 = vld [vmem:[#allocation2 + $0x68] sm:$0xff] }
 0x198   : > { %1013 = vst.msk [vmem:[#allocation2 + $0x38] sm:$0xff] %vm475_vm9, %v997_v35  ;;  %1184 = vst.msk [vmem:[#allocation2 + $0x8] sm:$0xff] %vm475_vm9, %v1168_v36  ;;  %v1170_v16 = vadd.f32 %v1154_v0, %v1118_v59  ;;  %v1126_v19 = vpop.f32.mrb[38].mxu0 }
 0x199   : > { %v6656_v50 = vadd.f32 %v1126_v19, %v996_v29  ;;  %v1128_v21 = vpop.f32.mrb[39].mxu0  ;;  %v989_v11 = vld [vmem:[#allocation2 + $0x78] sm:$0xff] }
 0x19a   : > { %1186 = vst.msk [vmem:[#allocation2 + $0x18] sm:$0xff] %vm475_vm9, %v1170_v16  ;;  %v955_v41 = vpop.f32.mrb[24].mxu1 }
 0x19b   : > { %v998_v42 = vadd.f32 %v955_v41, %v6619_v39  ;;  %v957_v43 = vpop.f32.mrb[25].mxu1 }
 0x19c   : > { %v999_v52 = vadd.f32 %v983_v44, %v957_v43  ;;  %v959_v53 = vpop.f32.mrb[26].mxu1 }
 0x19d   : > { %v1000_v51 = vadd.f32 %v959_v53, %v6626_v40  ;;  %v961_v46 = vpop.f32.mrb[27].mxu1  ;;  %v1156_v55 = vld [vmem:[#allocation2 + $0x28] sm:$0xff] }
 0x19e   : > { %1015 = vst.msk [vmem:[#allocation2 + $0x48] sm:$0xff] %vm475_vm9, %v999_v52  ;;  %v1001_v56 = vadd.f32 %v985_v54, %v961_v46  ;;  %v1172_v58 = vadd.f32 %v1156_v55, %v1124_v38  ;;  %v1132_v60 = vpop.f32.mrb[40].mxu0 }
 0x19f   : > { %v1158_v61 = vld [vmem:[#allocation2 + $0x38] sm:$0xff]  ;;  %v6662_v62 = vadd.f32 %v1132_v60, %v998_v42  ;;  %v1134_v2 = vpop.f32.mrb[41].mxu0  ;;  %v1329_v25 = vld [vmem:[#allocation2 + $0x8] sm:$0xff] }
 0x1a0   : > { %1017 = vst.msk [vmem:[#allocation2 + $0x58] sm:$0xff] %vm475_vm9, %v1001_v56  ;;  %1188 = vst.msk [vmem:[#allocation2 + $0x28] sm:$0xff] %vm475_vm9, %v1172_v58  ;;  %v1174_v39 = vadd.f32 %v1158_v61, %v1128_v21  ;;  %v1136_v30 = vpop.f32.mrb[42].mxu0 }
 0x1a1   : > { %v6666_v3 = vadd.f32 %v1136_v30, %v1000_v51  ;;  %v1138_v40 = vpop.f32.mrb[43].mxu0  ;;  %v1331_v32 = vld [vmem:[#allocation2 + $0x18] sm:$0xff] }
 0x1a2   : > { %1190 = vst.msk [vmem:[#allocation2 + $0x38] sm:$0xff] %vm475_vm9, %v1174_v39  ;;  %v965_v37 = vpop.f32.mrb[28].mxu1 }
 0x1a3   : > { %v1002_v5 = vadd.f32 %v965_v37, %v6632_v63  ;;  %v967_v6 = vpop.f32.mrb[29].mxu1 }
 0x1a4   : > { %v1003_v34 = vadd.f32 %v987_v7, %v967_v6  ;;  %v969_v8 = vpop.f32.mrb[30].mxu1 }
 0x1a5   : > { %v1004_v9 = vadd.f32 %v969_v8, %v6636_v4  ;;  %v971_v10 = vpop.f32.mrb[31].mxu1  ;;  %v1160_v57 = vld [vmem:[#allocation2 + $0x48] sm:$0xff] }
 0x1a6   : > { %1019 = vst.msk [vmem:[#allocation2 + $0x68] sm:$0xff] %vm475_vm9, %v1003_v34  ;;  %v1005_v13 = vadd.f32 %v989_v11, %v971_v10  ;;  %v1176_v14 = vadd.f32 %v1160_v57, %v1134_v2  ;;  %v1142_v15 = vpop.f32.mrb[44].mxu0 }
 0x1a7   : > { %v1162_v17 = vld [vmem:[#allocation2 + $0x58] sm:$0xff]  ;;  %v6672_v1 = vadd.f32 %v1142_v15, %v1002_v5  ;;  %v1144_v20 = vpop.f32.mrb[45].mxu0  ;;  %v1333_v43 = vld [vmem:[#allocation2 + $0x28] sm:$0xff] }
 0x1a8   : > { %1021 = vst.msk [vmem:[#allocation2 + $0x78] sm:$0xff] %vm475_vm9, %v1005_v13  ;;  %1192 = vst.msk [vmem:[#allocation2 + $0x48] sm:$0xff] %vm475_vm9, %v1176_v14  ;;  %v1178_v63 = vadd.f32 %v1162_v17, %v1138_v40  ;;  %v1146_v48 = vpop.f32.mrb[46].mxu0 }
 0x1a9   : > { %v6676_v45 = vadd.f32 %v1146_v48, %v1004_v9  ;;  %v1148_v4 = vpop.f32.mrb[47].mxu0  ;;  %v1335_v46 = vld [vmem:[#allocation2 + $0x38] sm:$0xff] }
 0x1aa   : > { %1194 = vst.msk [vmem:[#allocation2 + $0x58] sm:$0xff] %vm475_vm9, %v1178_v63  ;;  %v1289_v59 = vpop.f32.mrb[32].mxu1 }
 0x1ab   : > { %v1344_v47 = vadd.f32 %v1289_v59, %v6642_v18  ;;  %v1291_v24 = vpop.f32.mrb[33].mxu1 }
 0x1ac   : > { %v1345_v26 = vadd.f32 %v1329_v25, %v1291_v24  ;;  %v1293_v27 = vpop.f32.mrb[34].mxu1 }
 0x1ad   : > { %v1346_v28 = vadd.f32 %v1293_v27, %v6646_v22  ;;  %v1164_v29 = vld [vmem:[#allocation2 + $0x68] sm:$0xff]  ;;  %v1295_v31 = vpop.f32.mrb[35].mxu1 }
 0x1ae   : > { %1361 = vst.msk [vmem:[#allocation2 + $0x8] sm:$0xff] %vm475_vm9, %v1345_v26  ;;  %v1180_v33 = vadd.f32 %v1164_v29, %v1144_v20  ;;  %v1347_v35 = vadd.f32 %v1331_v32, %v1295_v31  ;;  %v1466_v36 = vpop.f32.mrb[48].mxu0 }
 0x1af   : > { %v1166_v49 = vld [vmem:[#allocation2 + $0x78] sm:$0xff]  ;;  %v6682_v0 = vadd.f32 %v1466_v36, %v1344_v47  ;;  %v1468_v38 = vpop.f32.mrb[49].mxu0  ;;  %v1337_v6 = vld [vmem:[#allocation2 + $0x48] sm:$0xff] }
 0x1b0   : > { %1196 = vst.msk [vmem:[#allocation2 + $0x68] sm:$0xff] %vm475_vm9, %v1180_v33  ;;  %1363 = vst.msk [vmem:[#allocation2 + $0x18] sm:$0xff] %vm475_vm9, %v1347_v35  ;;  %v1182_v18 = vadd.f32 %v1166_v49, %v1148_v4  ;;  %v1470_v16 = vpop.f32.mrb[50].mxu0 }
 0x1b1   : > { %v6686_v19 = vadd.f32 %v1470_v16, %v1346_v28  ;;  %v1472_v22 = vpop.f32.mrb[51].mxu0  ;;  %v1339_v10 = vld [vmem:[#allocation2 + $0x58] sm:$0xff] }
 0x1b2   : > { %1198 = vst.msk [vmem:[#allocation2 + $0x78] sm:$0xff] %vm475_vm9, %v1182_v18  ;;  %v1299_v21 = vpop.f32.mrb[36].mxu1 }
 0x1b3   : > { %v1348_v41 = vadd.f32 %v1299_v21, %v6652_v12  ;;  %v1301_v42 = vpop.f32.mrb[37].mxu1 }
 0x1b4   : > { %v1349_v44 = vadd.f32 %v1333_v43, %v1301_v42  ;;  %v1303_v52 = vpop.f32.mrb[38].mxu1 }
 0x1b5   : > { %v1350_v53 = vadd.f32 %v1303_v52, %v6656_v50  ;;  %v1305_v51 = vpop.f32.mrb[39].mxu1  ;;  %v1506_v54 = vld [vmem:[#allocation2 + $0x8] sm:$0xff] }
 0x1b6   : > { %1365 = vst.msk [vmem:[#allocation2 + $0x28] sm:$0xff] %vm475_vm9, %v1349_v44  ;;  %v1351_v55 = vadd.f32 %v1335_v46, %v1305_v51  ;;  %v1522_v56 = vadd.f32 %v1506_v54, %v1468_v38  ;;  %v1476_v58 = vpop.f32.mrb[52].mxu0 }
 0x1b7   : > { %v1508_v60 = vld [vmem:[#allocation2 + $0x18] sm:$0xff]  ;;  %v6692_v61 = vadd.f32 %v1476_v58, %v1348_v41  ;;  %v1478_v2 = vpop.f32.mrb[53].mxu0  ;;  %v1341_v24 = vld [vmem:[#allocation2 + $0x68] sm:$0xff] }
 0x1b8   : > { %1367 = vst.msk [vmem:[#allocation2 + $0x38] sm:$0xff] %vm475_vm9, %v1351_v55  ;;  %1538 = vst.msk [vmem:[#allocation2 + $0x8] sm:$0xff] %vm475_vm9, %v1522_v56  ;;  %v1524_v12 = vadd.f32 %v1508_v60, %v1472_v22  ;;  %v1480_v39 = vpop.f32.mrb[54].mxu0 }
 0x1b9   : > { %v6696_v30 = vadd.f32 %v1480_v39, %v1350_v53  ;;  %v1482_v50 = vpop.f32.mrb[55].mxu0  ;;  %v1343_v29 = vld [vmem:[#allocation2 + $0x78] sm:$0xff] }
 0x1ba   : > { %1540 = vst.msk [vmem:[#allocation2 + $0x18] sm:$0xff] %vm475_vm9, %v1524_v12  ;;  %v1309_v40 = vpop.f32.mrb[40].mxu1  ;;  %v1934_v12 = vpop.permute.xlu0 %1933 }
 0x1bb   : > { %v1352_v37 = vadd.f32 %v1309_v40, %v6662_v62  ;;  %v1311_v5 = vpop.f32.mrb[41].mxu1 }
 0x1bc   : > { %v1353_v7 = vadd.f32 %v1337_v6, %v1311_v5  ;;  %v1313_v34 = vpop.f32.mrb[42].mxu1 }
 0x1bd   : > { %v1354_v8 = vadd.f32 %v1313_v34, %v6666_v3  ;;  %v1315_v9 = vpop.f32.mrb[43].mxu1  ;;  %v1510_v11 = vld [vmem:[#allocation2 + $0x28] sm:$0xff] }
 0x1be   : > { %1369 = vst.msk [vmem:[#allocation2 + $0x48] sm:$0xff] %vm475_vm9, %v1353_v7  ;;  %v1355_v57 = vadd.f32 %v1339_v10, %v1315_v9  ;;  %v1526_v13 = vadd.f32 %v1510_v11, %v1478_v2  ;;  %v1486_v14 = vpop.f32.mrb[56].mxu0 }
 0x1bf   : > { %v1512_v15 = vld [vmem:[#allocation2 + $0x38] sm:$0xff]  ;;  %v6702_v17 = vadd.f32 %v1486_v14, %v1352_v37  ;;  %v1488_v20 = vpop.f32.mrb[57].mxu0  ;;  %v1683_v42 = vld [vmem:[#allocation2 + $0x8] sm:$0xff] }
 0x1c0   : > { %1371 = vst.msk [vmem:[#allocation2 + $0x58] sm:$0xff] %vm475_vm9, %v1355_v57  ;;  %1542 = vst.msk [vmem:[#allocation2 + $0x28] sm:$0xff] %vm475_vm9, %v1526_v13  ;;  %v1528_v62 = vadd.f32 %v1512_v15, %v1482_v50  ;;  %v1490_v63 = vpop.f32.mrb[58].mxu0  ;;  %v6724_v50 = vpop.permute.xlu1 %1938 }
 0x1c1   : > { %v6706_v48 = vadd.f32 %v1490_v63, %v1354_v8  ;;  %v1492_v3 = vpop.f32.mrb[59].mxu0  ;;  %v1685_v46 = vld [vmem:[#allocation2 + $0x18] sm:$0xff] }
 0x1c2   : > { %1544 = vst.msk [vmem:[#allocation2 + $0x38] sm:$0xff] %vm475_vm9, %v1528_v62  ;;  %v1319_v4 = vpop.f32.mrb[44].mxu1 }
 0x1c3   : > { %v1356_v59 = vadd.f32 %v1319_v4, %v6672_v1  ;;  %v1321_v47 = vpop.f32.mrb[45].mxu1 }
 0x1c4   : > { %v1357_v25 = vadd.f32 %v1341_v24, %v1321_v47  ;;  %v1323_v26 = vpop.f32.mrb[46].mxu1 }
 0x1c5   : > { %v1358_v27 = vadd.f32 %v1323_v26, %v6676_v45  ;;  %v1325_v28 = vpop.f32.mrb[47].mxu1  ;;  %v1514_v31 = vld [vmem:[#allocation2 + $0x48] sm:$0xff] }
 0x1c6   : > { %1373 = vst.msk [vmem:[#allocation2 + $0x68] sm:$0xff] %vm475_vm9, %v1357_v25  ;;  %v1359_v32 = vadd.f32 %v1343_v29, %v1325_v28  ;;  %v1530_v33 = vadd.f32 %v1514_v31, %v1488_v20  ;;  %v1496_v35 = vpop.f32.mrb[60].mxu0  ;;  %v6739_v28 = vpop.permute.xlu0 %1948 }
 0x1c7   : > { %v1516_v36 = vld [vmem:[#allocation2 + $0x58] sm:$0xff]  ;;  %v6712_v49 = vadd.f32 %v1496_v35, %v1356_v59  ;;  %v1498_v38 = vpop.f32.mrb[61].mxu0  ;;  %v1687_v34 = vld [vmem:[#allocation2 + $0x28] sm:$0xff] }
 0x1c8   : > { %1375 = vst.msk [vmem:[#allocation2 + $0x78] sm:$0xff] %vm475_vm9, %v1359_v32  ;;  %1546 = vst.msk [vmem:[#allocation2 + $0x48] sm:$0xff] %vm475_vm9, %v1530_v33  ;;  %v1532_v1 = vadd.f32 %v1516_v36, %v1492_v3  ;;  %v1500_v18 = vpop.f32.mrb[62].mxu0  ;;  %v6733_v3 = vpop.permute.xlu1 %1943 }
 0x1c9   : > { %v6716_v16 = vadd.f32 %v1500_v18, %v1358_v27  ;;  %v1502_v45 = vpop.f32.mrb[63].mxu0  ;;  %v1689_v13 = vld [vmem:[#allocation2 + $0x38] sm:$0xff] }
 0x1ca   : > { %1548 = vst.msk [vmem:[#allocation2 + $0x58] sm:$0xff] %vm475_vm9, %v1532_v1  ;;  %v1643_v22 = vpop.f32.mrb[48].mxu1 }
 0x1cb   : > { %v1698_v21 = vadd.f32 %v1643_v22, %v6682_v0  ;;  %v1645_v41 = vpop.f32.mrb[49].mxu1 }
 0x1cc   : > { %v1699_v43 = vadd.f32 %v1683_v42, %v1645_v41  ;;  %v1647_v44 = vpop.f32.mrb[50].mxu1 }
 0x1cd   : > { %v1700_v52 = vadd.f32 %v1647_v44, %v6686_v19  ;;  %v1518_v53 = vld [vmem:[#allocation2 + $0x68] sm:$0xff]  ;;  %v1649_v51 = vpop.f32.mrb[51].mxu1 }
 0x1ce   : > { %1715 = vst.msk [vmem:[#allocation2 + $0x8] sm:$0xff] %vm475_vm9, %v1699_v43  ;;  %v1534_v54 = vadd.f32 %v1518_v53, %v1498_v38  ;;  %v1701_v55 = vadd.f32 %v1685_v46, %v1649_v51  ;;  %v1820_v56 = vpop.f32.mrb[64].mxu0  ;;  %v6749_v46 = vpop.permute.xlu1 %1953 }
 0x1cf   : > { %v1520_v58 = vld [vmem:[#allocation2 + $0x78] sm:$0xff]  ;;  %v1875_v60 = vadd.f32 %v1820_v56, %v1698_v21  ;;  %v1822_v2 = vpop.f32.mrb[65].mxu0  ;;  %v1691_v32 = vld [vmem:[#allocation2 + $0x48] sm:$0xff] }
 0x1d0   : > { %1550 = vst.msk [vmem:[#allocation2 + $0x68] sm:$0xff] %vm475_vm9, %v1534_v54  ;;  %1717 = vst.msk [vmem:[#allocation2 + $0x18] sm:$0xff] %vm475_vm9, %v1701_v55  ;;  %v1536_v0 = vadd.f32 %v1520_v58, %v1502_v45  ;;  %v1824_v39 = vpop.f32.mrb[66].mxu0 }
 0x1d1   : > { %v1877_v19 = vadd.f32 %v1824_v39, %v1700_v52  ;;  %v1826_v40 = vpop.f32.mrb[67].mxu0  ;;  %v1971_v37 = vadd.f32 %v1934_v12, %v1875_v60  ;;  %v1693_v18 = vld [vmem:[#allocation2 + $0x58] sm:$0xff] }
 0x1d2   : > { %1552 = vst.msk [vmem:[#allocation2 + $0x78] sm:$0xff] %vm475_vm9, %v1536_v0  ;;  %v1653_v5 = vpop.f32.mrb[52].mxu1  ;;  %v1959_v0 = vpop.permute.xlu0 %1958 }
 0x1d3   : > { %v1702_v6 = vadd.f32 %v1653_v5, %v6692_v61  ;;  %v1655_v7 = vpop.f32.mrb[53].mxu1  ;;  %v1973_v8 = vadd.f32 %v6724_v50, %v1877_v19 }
 0x1d4   : > { %v1703_v9 = vadd.f32 %v1687_v34, %v1655_v7  ;;  %v1657_v10 = vpop.f32.mrb[54].mxu1 }
 0x1d5   : > { %v1704_v11 = vadd.f32 %v1657_v10, %v6696_v30  ;;  %v1659_v57 = vpop.f32.mrb[55].mxu1  ;;  %v1860_v14 = vld [vmem:[#allocation2 + $0x8] sm:$0xff]  ;;  %v6730_v15 = vpack.c.bf16 %v1973_v8, %v1971_v37 }
 0x1d6   : > { %1719 = vst.msk [vmem:[#allocation2 + $0x28] sm:$0xff] %vm475_vm9, %v1703_v9  ;;  %v1705_v20 = vadd.f32 %v1689_v13, %v1659_v57  ;;  %v1876_v62 = vadd.f32 %v1860_v14, %v1822_v2  ;;  %v1830_v63 = vpop.f32.mrb[68].mxu0 }
 0x1d7   : > { %v1862_v61 = vld [vmem:[#allocation2 + $0x18] sm:$0xff]  ;;  %v1879_v4 = vadd.f32 %v1830_v63, %v1702_v6  ;;  %v1832_v59 = vpop.f32.mrb[69].mxu0  ;;  %v1695_v19 = vld [vmem:[#allocation2 + $0x68] sm:$0xff]  ;;  %v1964_v63 = vpop.permute.xlu1 %1963 }
 0x1d8   : > { %1721 = vst.msk [vmem:[#allocation2 + $0x38] sm:$0xff] %vm475_vm9, %v1705_v20  ;;  %1892 = vst.msk [vmem:[#allocation2 + $0x8] sm:$0xff] %vm475_vm9, %v1876_v62  ;;  %v1878_v30 = vadd.f32 %v1862_v61, %v1826_v40  ;;  %v1834_v47 = vpop.f32.mrb[70].mxu0 }
 0x1d9   : > { %v1881_v24 = vadd.f32 %v1834_v47, %v1704_v11  ;;  %v1836_v25 = vpop.f32.mrb[71].mxu0  ;;  %v1975_v26 = vadd.f32 %v6733_v3, %v1879_v4  ;;  %v1697_v34 = vld [vmem:[#allocation2 + $0x78] sm:$0xff] }
 0x1da   : > { %1894 = vst.msk [vmem:[#allocation2 + $0x18] sm:$0xff] %vm475_vm9, %v1878_v30  ;;  %v1663_v27 = vpop.f32.mrb[56].mxu1 }
 0x1db   : > { %v1706_v29 = vadd.f32 %v1663_v27, %v6702_v17  ;;  %v1665_v31 = vpop.f32.mrb[57].mxu1  ;;  %v1977_v33 = vadd.f32 %v6739_v28, %v1881_v24  ;;  %v1969_v24 = vpop.permute.xlu0 %1968 }
 0x1dc   : > { %v1707_v35 = vadd.f32 %v1691_v32, %v1665_v31  ;;  %v1667_v36 = vpop.f32.mrb[58].mxu1 }
 0x1dd   : > { %v1708_v38 = vadd.f32 %v1667_v36, %v6706_v48  ;;  %v1669_v1 = vpop.f32.mrb[59].mxu1  ;;  %v1864_v45 = vld [vmem:[#allocation2 + $0x28] sm:$0xff]  ;;  %v6744_v22 = vpack.c.bf16 %v1977_v33, %v1975_v26 }
 0x1de   : > { %1723 = vst.msk [vmem:[#allocation2 + $0x48] sm:$0xff] %vm475_vm9, %v1707_v35  ;;  %v1709_v21 = vadd.f32 %v1693_v18, %v1669_v1  ;;  %v1880_v41 = vadd.f32 %v1864_v45, %v1832_v59  ;;  %v1840_v42 = vpop.f32.mrb[72].mxu0  ;;  %v4946_v35 = vld [vmem:[%s7855_s3] ss:$0 sm:$0xff] }
 0x1df   : > { %v1908_v43 = vld [vmem:[#allocation2 + $0x8] sm:$0xff]  ;;  %v1866_v17 = vld [vmem:[#allocation2 + $0x38] sm:$0xff]  ;;  %v1883_v44 = vadd.f32 %v1840_v42, %v1706_v29  ;;  %v1842_v52 = vpop.f32.mrb[73].mxu0 }
 0x1e0   : > { %1725 = vst.msk [vmem:[#allocation2 + $0x58] sm:$0xff] %vm475_vm9, %v1709_v21  ;;  %1896 = vst.msk [vmem:[#allocation2 + $0x28] sm:$0xff] %vm475_vm9, %v1880_v41  ;;  %v1972_v53 = vadd.f32 %v1934_v12, %v1908_v43  ;;  %v1882_v48 = vadd.f32 %v1866_v17, %v1836_v25  ;;  %v1844_v51 = vpop.f32.mrb[74].mxu0 }
 0x1e1   : > { %v1910_v54 = vld [vmem:[#allocation2 + $0x18] sm:$0xff]  ;;  %v1885_v55 = vadd.f32 %v1844_v51, %v1708_v38  ;;  %v1846_v56 = vpop.f32.mrb[75].mxu0  ;;  %v1979_v58 = vadd.f32 %v6749_v46, %v1883_v44  ;;  %v4983_v44 = vld [vmem:[%s7854_s2 + $0x220] sm:$0xff] }
 0x1e2   : > { %1988 = vst.msk [vmem:[#allocation2 + $0x8] sm:$0xff] %vm475_vm9, %v1972_v53  ;;  %1898 = vst.msk [vmem:[#allocation2 + $0x38] sm:$0xff] %vm475_vm9, %v1882_v48  ;;  %v1974_v60 = vadd.f32 %v6724_v50, %v1910_v54  ;;  %v1673_v2 = vpop.f32.mrb[60].mxu1 }
 0x1e3   : > { %v1710_v39 = vadd.f32 %v1673_v2, %v6712_v49  ;;  %v1675_v12 = vpop.f32.mrb[61].mxu1  ;;  %v1981_v40 = vadd.f32 %v1959_v0, %v1885_v55 }
 0x1e4   : > { %1990 = vst.msk [vmem:[#allocation2 + $0x18] sm:$0xff] %vm475_vm9, %v1974_v60  ;;  %v1711_v37 = vadd.f32 %v1695_v19, %v1675_v12  ;;  %v1677_v5 = vpop.f32.mrb[62].mxu1 }
 0x1e5   : > { %v1712_v6 = vadd.f32 %v1677_v5, %v6716_v16  ;;  %v1679_v7 = vpop.f32.mrb[63].mxu1  ;;  %v1868_v8 = vld [vmem:[#allocation2 + $0x48] sm:$0xff]  ;;  %v6758_v9 = vpack.c.bf16 %v1981_v40, %v1979_v58 }
 0x1e6   : > { %1727 = vst.msk [vmem:[#allocation2 + $0x68] sm:$0xff] %vm475_vm9, %v1711_v37  ;;  %v1713_v50 = vadd.f32 %v1697_v34, %v1679_v7  ;;  %v1884_v10 = vadd.f32 %v1868_v8, %v1842_v52  ;;  %v1850_v11 = vpop.f32.mrb[76].mxu0  ;;  %v4984_v52 = vld [vmem:[%s7854_s2 + $0x228] sm:$0xff]  ;;  %v6802_v8 = vld [vmem:[%s6321_s12 + $0x10] sm:$0xff] }
 0x1e7   : > { %v1912_v49 = vld [vmem:[#allocation2 + $0x28] sm:$0xff]  ;;  %v1870_v57 = vld [vmem:[#allocation2 + $0x58] sm:$0xff]  ;;  %v1887_v13 = vadd.f32 %v1850_v11, %v1710_v39  ;;  %v1852_v14 = vpop.f32.mrb[77].mxu0  ;;  %v5574_v2 = vpack.c.bf16 %v4984_v52, %v4983_v44  ;;  %v4985_v39 = vld [vmem:[%s7854_s2 + $0x230] sm:$0xff] }
 0x1e8   : > { %1729 = vst.msk [vmem:[#allocation2 + $0x78] sm:$0xff] %vm475_vm9, %v1713_v50  ;;  %1900 = vst.msk [vmem:[#allocation2 + $0x48] sm:$0xff] %vm475_vm9, %v1884_v10  ;;  %v1976_v16 = vadd.f32 %v6733_v3, %v1912_v49  ;;  %v1886_v20 = vadd.f32 %v1870_v57, %v1846_v56  ;;  %v1854_v62 = vpop.f32.mrb[78].mxu0  ;;  %v6807_v50 = vld [vmem:[%s6321_s12 + $0x28] sm:$0xff] }
 0x1e9   : > { %v1914_v61 = vld [vmem:[#allocation2 + $0x38] sm:$0xff]  ;;  %v1889_v4 = vadd.f32 %v1854_v62, %v1712_v6  ;;  %v1856_v59 = vpop.f32.mrb[79].mxu0  ;;  %v1983_v30 = vadd.f32 %v1964_v63, %v1887_v13  ;;  %v2004_v27 = vld [vmem:[#allocation2 + $0x8] sm:$0xff] }
 0x1ea   : > { %v1978_v47 = vadd.f32 %v6739_v28, %v1914_v61  ;;  %1992 = vst.msk [vmem:[#allocation2 + $0x28] sm:$0xff] %vm475_vm9, %v1976_v16  ;;  %1902 = vst.msk [vmem:[#allocation2 + $0x58] sm:$0xff] %vm475_vm9, %v1886_v20  ;;  %v5196_v25 = vpop.f32.mrb[64].mxu1 }
 0x1eb   : > { %v1985_v26 = vadd.f32 %v1969_v24, %v1889_v4  ;;  %v2006_v29 = vld [vmem:[#allocation2 + $0x18] sm:$0xff]  ;;  %v5197_v31 = vpop.f32.mrb[65].mxu1 }
 0x1ec   : > { %1994 = vst.msk [vmem:[#allocation2 + $0x38] sm:$0xff] %vm475_vm9, %v1978_v47  ;;  %v5534_v3 = vpack.c.bf16 %v2006_v29, %v2004_v27  ;;  %v5198_v32 = vadd.f32 %v5197_v31, %v5196_v25  ;;  %v4988_v47 = vld [vmem:[%s7855_s3 + $0x1] ss:$0 sm:$0xff] }
 0x1ed   : > { %v1872_v33 = vld [vmem:[#allocation2 + $0x68] sm:$0xff]  ;;  %v6771_v28 = vpack.c.bf16 %v1985_v26, %v1983_v30 }
 0x1ee   : > { %v1888_v36 = vadd.f32 %v1872_v33, %v1852_v14  ;;  %5535 = vmatprep.subr.bf16.mxu1 %v5534_v3  ;;  %v5199_v38 = vpop.f32.mrb[66].mxu1  ;;  %v2141_v43 = vadd.f32 %v5198_v32, %v4946_v35  ;;  %v5028_v32 = vld [vmem:[%s7854_s2 + $0x358] sm:$0xff] }
 0x1ef   : > { %v1916_v1 = vld [vmem:[#allocation2 + $0x48] sm:$0xff]  ;;  %v1874_v18 = vld [vmem:[#allocation2 + $0x78] sm:$0xff]  ;;  %5537 = vmatpush1.bf16.msra.mxu1 %v6730_v15  ;;  %v5200_v45 = vpop.f32.mrb[67].mxu1 }
 0x1f0   : > { %1904 = vst.msk [vmem:[#allocation2 + $0x68] sm:$0xff] %vm475_vm9, %v1888_v36  ;;  %v1980_v21 = vadd.f32 %v6749_v46, %v1916_v1  ;;  %v1890_v41 = vadd.f32 %v1874_v18, %v1856_v59  ;;  %v5201_v42 = vadd.f32 %v5200_v45, %v5199_v38 }
 0x1f1   : > { %v1918_v17 = vld [vmem:[#allocation2 + $0x58] sm:$0xff]  ;;  %v2008_v46 = vld [vmem:[#allocation2 + $0x28] sm:$0xff] }
 0x1f2   : > { %v1982_v53 = vadd.f32 %v1959_v0, %v1918_v17  ;;  %1996 = vst.msk [vmem:[#allocation2 + $0x48] sm:$0xff] %vm475_vm9, %v1980_v21  ;;  %1906 = vst.msk [vmem:[#allocation2 + $0x78] sm:$0xff] %vm475_vm9, %v1890_v41  ;;  %v2146_v48 = vadd.f32 %v5201_v42, %v4946_v35  ;;  %v5438_v51 = vpop.f32.mrb[68].mxu1  ;;  %v4986_v0 = vld [vmem:[%s7854_s2 + $0x238] sm:$0xff] }
 0x1f3   : > { %v2010_v54 = vld [vmem:[#allocation2 + $0x38] sm:$0xff]  ;;  %v2215_v55 = vpop.f32.mrb[69].mxu1  ;;  %v5578_v40 = vpack.c.bf16 %v4986_v0, %v4985_v39 }
 0x1f4   : > { %1998 = vst.msk [vmem:[#allocation2 + $0x58] sm:$0xff] %vm475_vm9, %v1982_v53  ;;  %v2221_v56 = vadd.f32 %v5438_v51, %v2146_v48  ;;  %v5538_v58 = vpack.c.bf16 %v2010_v54, %v2008_v46  ;;  %v2216_v60 = vadd.f32 %v2215_v55, %v2141_v43 }
 0x1f6   : > { %5539 = vmatprep.subr.bf16.mxu1 %v5538_v58 }
 0x1f7   : > { %v1920_v12 = vld [vmem:[#allocation2 + $0x68] sm:$0xff]  ;;  %5541 = vmatpush1.bf16.msra.mxu1 %v6744_v22  ;;  %v5240_v57 = vpop.f32.mrb[80].mxu0 }
 0x1f8   : > { %v1984_v19 = vadd.f32 %v1964_v63, %v1920_v12  ;;  %5575 = vmatprep.subr.bf16.mxu1 %v5574_v2  ;;  %v5241_v13 = vpop.f32.mrb[81].mxu0  ;;  %v5026_v63 = vld [vmem:[%s7854_s2 + $0x348] sm:$0xff] }
 0x1f9   : > { %v1922_v37 = vld [vmem:[#allocation2 + $0x78] sm:$0xff]  ;;  %v2012_v6 = vld [vmem:[#allocation2 + $0x48] sm:$0xff]  ;;  %v5242_v14 = vadd.f32 %v5241_v13, %v5240_v57 }
 0x1fa   : > { %v1986_v5 = vadd.f32 %v1969_v24, %v1922_v37  ;;  %2000 = vst.msk [vmem:[#allocation2 + $0x68] sm:$0xff] %vm475_vm9, %v1984_v19  ;;  %4949 = vmatmul.mubr.msk.f32.vlgmr.msra.gmra.mrb[70].mxu1 %vm7885_vm0, %v2216_v60 }
 0x1fb   : > { %5577 = vmatpush3.bf16.msra.mxu1 %v5574_v2  ;;  %2300 = vmatprep.mubr.f32.mxu1 %v5884_v23  ;;  %v2014_v7 = vld [vmem:[#allocation2 + $0x58] sm:$0xff]  ;;  %v5243_v16 = vpop.f32.mrb[82].mxu0  ;;  %v2599_v31 = vadd.f32 %v5242_v14, %v4988_v47  ;;  %v6915_v14 = vpop.permute.xlu1 %4662 }
 0x1fc   : > { %2002 = vst.msk [vmem:[#allocation2 + $0x78] sm:$0xff] %vm475_vm9, %v1986_v5  ;;  %5579 = vmatprep.subr.bf16.mxu1 %v5578_v40  ;;  %v6796_v34 = vpack.c.bf16 %v2014_v7, %v2012_v6  ;;  %v5244_v20 = vpop.f32.mrb[83].mxu0  ;;  %v6903_v5 = vpop.permute.xlu0 %3330  ;;  %vm2455_vm9 = vcmask 213136  }
 0x1fd   : > { %v5245_v62 = vadd.f32 %v5244_v20, %v5243_v16 }
 0x1fe   : > { %4950 = vmatmul.mubr.msk.f32.gmra.mrb[72].mxu1 %vm7885_vm0, %v2221_v56  ;;  %5679 = vmatprep.subr.bf16.mxu0 %v6796_v34 }
 0x1ff   : > { %5581 = vmatpush3.bf16.msra.mxu1 %v5578_v40  ;;  %5681 = vmatpush1.bf16.msra.mxu0 %v6758_v9  ;;  %v2604_v29 = vadd.f32 %v5245_v62, %v4988_v47 }
 0x200   : > { %5583 = vmatprep.subr.bf16.mxu1 %v5534_v3  ;;  %5447 = vmatprep.mubr.msk.f32.mxu1 %vm7885_vm0, %v6802_v8  ;;  %v5027_v3 = vld [vmem:[%s7854_s2 + $0x350] sm:$0xff]  ;;  %v6913_v13 = vpop.permute.xlu0 %3774 }
 0x201   : > { %v2016_v10 = vld [vmem:[#allocation2 + $0x68] sm:$0xff]  ;;  %v5626_v45 = vpack.c.bf16 %v5028_v32, %v5027_v3 }
 0x202   : > { %5448 = vmatmul.mubr.msk.f32.vlgmr.msra.gmra.mrb[74].mxu1 %vm7885_vm0, %v6807_v50 }
 0x203   : > { %5585 = vmatpush1.bf16.msra.mxu1 %v6730_v15  ;;  %v2018_v11 = vld [vmem:[#allocation2 + $0x78] sm:$0xff]  ;;  %2752 = vmatprep.mubr.f32.mxu1 %v5884_v23  ;;  %v5025_v15 = vld [vmem:[%s7854_s2 + $0x340] sm:$0xff] }
 0x204   : > { %5587 = vmatprep.subr.bf16.mxu1 %v5538_v58  ;;  %v6813_v49 = vpack.c.bf16 %v2018_v11, %v2016_v10  ;;  %v5622_v61 = vpack.c.bf16 %v5026_v63, %v5025_v15  ;;  %v5051_v10 = vld [vmem:[%s7854_s2 + $0x3e0] sm:$0xff]  ;;  %v5052_v11 = vld [vmem:[%s7854_s2 + $0x3e8] sm:$0xff]  ;;  %v6917_v16 = vpop.permute.xlu0 %4218 }
 0x205   : > { %v5638_v57 = vpack.c.bf16 %v5052_v11, %v5051_v10 }
 0x206   : > { %5683 = vmatprep.subr.bf16.mxu0 %v6813_v49 }
 0x207   : > { %5589 = vmatpush1.bf16.msra.mxu1 %v6744_v22  ;;  %5685 = vmatpush1.bf16.msra.mxu0 %v6771_v28 }
 0x208   : > { %5623 = vmatprep.subr.bf16.mxu1 %v5622_v61 }
 0x248   : > { %v5284_v12 = vpop.f32.mrb[84].mxu0 }
 0x249   : > { %v5285_v19 = vpop.f32.mrb[85].mxu0 }
 0x24a   : > { %v6901_v40 = vadd.f32 %v5285_v19, %v5284_v12 }
 0x24c   : > { %v5287_v37 = vpop.f32.mrb[86].mxu0 }
 0x24d   : > { %v5288_v6 = vpop.f32.mrb[87].mxu0 }
 0x24e   : > { %v6905_v7 = vadd.f32 %v5288_v6, %v5287_v37 }
 0x2cd   : > { %v6824_v4 = vpop.f32.mrb[70].mxu1 }
 0x2ce   : > { %v2313_v22 = vrot.slane %v6824_v4, 2  ;;  %v2308_v59 = vrot.slane %v6824_v4, 1  ;;  %v2298_v30 = vpop.f32.mrb[71].mxu1  ;;  %v2324_v25 = vrot.slane %v6824_v4, 4  ;;  %v2318_v26 = vrot.slane %v6824_v4, 3 }
 0x2cf   : > { %v2334_v38 = vrot.slane %v6824_v4, 5  ;;  %v2325_v1 = vrot.slane %v2298_v30, 4  ;;  %v2344_v21 = vrot.slane %v6824_v4, 6  ;;  %v2335_v41 = vrot.slane %v2298_v30, 5 }
 0x2d0   : > { %2314 = vrot.lane.b32.xlu0 %v2313_v22, %s7879_s14  ;;  %2309 = vrot.lane.b32.xlu1 %v2308_v59, %s7877_s11  ;;  %v2354_v42 = vrot.slane %v6824_v4, 7  ;;  %v2345_v43 = vrot.slane %v2298_v30, 6  ;;  %v2355_v17 = vrot.slane %v2298_v30, 7 }
 0x2d1   : > { %v6833_v24 = vpop.f32.mrb[72].mxu1 }
 0x2d2   : > { %v6837_v27 = vpop.f32.mrb[73].mxu1  ;;  %v2374_v44 = vrot.slane %v6833_v24, 1  ;;  %v2384_v52 = vrot.slane %v6833_v24, 2  ;;  %v2394_v48 = vrot.slane %v6833_v24, 3  ;;  %v2404_v46 = vrot.slane %v6833_v24, 4 }
 0x2d3   : > { %v2375_v53 = vrot.slane %v6837_v27, 1  ;;  %v2385_v51 = vrot.slane %v6837_v27, 2  ;;  %v2395_v54 = vrot.slane %v6837_v27, 3  ;;  %v2414_v55 = vrot.slane %v6833_v24, 5 }
 0x2d4   : > { %2326 = vrot.lane.b32.xlu0 %v2324_v25, %s7909_s17  ;;  %2319 = vrot.lane.b32.xlu1 %v2318_v26, %s7901_s10  ;;  %v2405_v56 = vrot.slane %v6837_v27, 4  ;;  %v2424_v58 = vrot.slane %v6833_v24, 6  ;;  %v2415_v60 = vrot.slane %v6837_v27, 5  ;;  %v2434_v2 = vrot.slane %v6833_v24, 7 }
 0x2d5   : > { %v5449_v33 = vpop.f32.mrb[74].mxu1  ;;  %v2425_v39 = vrot.slane %v6837_v27, 6  ;;  %v2435_v0 = vrot.slane %v6837_v27, 7 }
 0x2d6   : > { %v2679_v35 = vadd.f32 %v5449_v33, %v2604_v29  ;;  %v2673_v36 = vpop.f32.mrb[75].mxu1 }
 0x2d7   : > { %v2674_v18 = vadd.f32 %v2673_v36, %v2599_v31 }
 0x2d8   : > { %2336 = vrot.lane.b32.xlu0 %v2334_v38, %s7911_s20  ;;  %2328 = vrot.lane.b32.xlu1 %v2325_v1, %s7909_s17 }
 0x2d9   : > { %4991 = vmatmul.mubr.msk.f32.vlgmr.msra.gmra.mrb[76].mxu1 %vm7885_vm0, %v2674_v18 }
 0x2da   : > { %5625 = vmatpush3.bf16.msra.mxu1 %v5622_v61  ;;  %2758 = vmatprep.mubr.f32.mxu1 %v5884_v23 }
 0x2db   : > { %5627 = vmatprep.subr.bf16.mxu1 %v5626_v45 }
 0x2dc   : > { %2346 = vrot.lane.b32.xlu0 %v2344_v21, %s7905_s23  ;;  %2338 = vrot.lane.b32.xlu1 %v2335_v41, %s7911_s20 }
 0x2dd   : > { %4992 = vmatmul.mubr.msk.f32.gmra.mrb[78].mxu1 %vm7885_vm0, %v2679_v35 }
 0x2de   : > { %5629 = vmatpush3.bf16.msra.mxu1 %v5626_v45  ;;  %5458 = vmatprep.mubr.msk.f32.mxu1 %vm7885_vm0, %v6802_v8 }
 0x2df   : > { %5631 = vmatprep.subr.bf16.mxu1 %v6796_v34 }
 0x2e0   : > { %2356 = vrot.lane.b32.xlu0 %v2354_v42, %s7903_s18  ;;  %2348 = vrot.lane.b32.xlu1 %v2345_v43, %s7905_s23 }
 0x2e1   : > { %5459 = vmatmul.mubr.msk.f32.vlgmr.msra.gmra.mrb[80].mxu1 %vm7885_vm0, %v6807_v50 }
 0x2e2   : > { %5633 = vmatpush1.bf16.msra.mxu1 %v6758_v9  ;;  %3189 = vmatprep.mubr.f32.mxu1 %v5884_v23 }
 0x2e3   : > { %5635 = vmatprep.subr.bf16.mxu1 %v6813_v49 }
 0x2e4   : > { %2358 = vrot.lane.b32.xlu1 %v2355_v17, %s7903_s18  ;;  %2366 = vrot.lane.b32.xlu0 %v6833_v24, %s7907_s24 }
 0x2e6   : > { %5637 = vmatpush1.bf16.msra.mxu1 %v6771_v28 }
 0x2e7   : > { %5639 = vmatprep.subr.bf16.mxu1 %v5638_v57 }
 0x2e8   : > { %2376 = vrot.lane.b32.xlu0 %v2374_v44, %s7899_s25  ;;  %2368 = vrot.lane.b32.xlu1 %v6837_v27, %s7907_s24 }
 0x2ec   : > { %2386 = vrot.lane.b32.xlu0 %v2384_v52, %s7930_s26  ;;  %2378 = vrot.lane.b32.xlu1 %v2375_v53, %s7899_s25 }
 0x2f0   : > { %2396 = vrot.lane.b32.xlu0 %v2394_v48, %s7897_s19  ;;  %2388 = vrot.lane.b32.xlu1 %v2385_v51, %s7930_s26 }
 0x2f4   : > { %2406 = vrot.lane.b32.xlu0 %v2404_v46, %s7895_s21  ;;  %2398 = vrot.lane.b32.xlu1 %v2395_v54, %s7897_s19 }
 0x2f8   : > { %2416 = vrot.lane.b32.xlu0 %v2414_v55, %s7867_s22  ;;  %2408 = vrot.lane.b32.xlu1 %v2405_v56, %s7895_s21 }
 0x2fc   : > { %2426 = vrot.lane.b32.xlu0 %v2424_v58, %s7865_s29  ;;  %2418 = vrot.lane.b32.xlu1 %v2415_v60, %s7867_s22  ;;  %s7869_s22 = smov 108  }
 0x300   : > { %2436 = vrot.lane.b32.xlu0 %v2434_v2, %s7863_s30  ;;  %2428 = vrot.lane.b32.xlu1 %v2425_v39, %s7865_s29  ;;  %s7871_s29 = smov 123  }
 0x304   : > { %2438 = vrot.lane.b32.xlu1 %v2435_v0, %s7863_s30  ;;  %s7883_s30 = smov 118  }
 0x342   : > { %v2315_v20 = vpop.permute.xlu0 %2314  ;;  %v2310_v62 = vpop.permute.xlu1 %2309 }
 0x343   : > { %v2312_v27 = vadd.f32 %v2310_v62, %v6824_v4 }
 0x345   : > { %v2317_v3 = vadd.f32 %v2315_v20, %v2312_v27 }
 0x346   : > { %v2327_v15 = vpop.permute.xlu0 %2326  ;;  %v2320_v63 = vpop.permute.xlu1 %2319 }
 0x347   : > { %v2322_v36 = vadd.f32 %v2320_v63, %v2317_v3  ;;  %v5036_v3 = vld [vmem:[%s7854_s2 + $0x368] sm:$0xff] }
 0x34a   : > { %v2337_v61 = vpop.permute.xlu0 %2336  ;;  %v2329_v22 = vpop.permute.xlu1 %2328 }
 0x34b   : > { %v2331_v35 = vsel %vm882_vm3, %v2327_v15, %v2329_v22 }
 0x34c   : > { %v2333_v1 = vadd.f32 %v2331_v35, %v2322_v36 }
 0x34e   : > { %v2347_v59 = vpop.permute.xlu0 %2346  ;;  %v2339_v30 = vpop.permute.xlu1 %2338 }
 0x34f   : > { %v2341_v38 = vsel %vm1059_vm4, %v2337_v61, %v2339_v30  ;;  %v5030_v30 = vld [vmem:[%s7855_s3 + $0x2] ss:$0 sm:$0xff] }
 0x350   : > { %v2343_v41 = vadd.f32 %v2341_v38, %v2333_v1  ;;  %v3041_v27 = vadd.f32 %v6905_v7, %v5030_v30 }
 0x352   : > { %v2357_v47 = vpop.permute.xlu0 %2356  ;;  %v2349_v24 = vpop.permute.xlu1 %2348 }
 0x353   : > { %v2351_v21 = vsel %vm1236_vm5, %v2347_v59, %v2349_v24 }
 0x354   : > { %v2353_v4 = vadd.f32 %v2351_v21, %v2343_v41  ;;  %v5037_v21 = vld [vmem:[%s7854_s2 + $0x370] sm:$0xff]  ;;  %v5038_v41 = vld [vmem:[%s7854_s2 + $0x378] sm:$0xff] }
 0x356   : > { %v2359_v25 = vpop.permute.xlu1 %2358  ;;  %v2367_v26 = vpop.permute.xlu0 %2366 }
 0x357   : > { %v2361_v42 = vsel %vm7891_vm10, %v2357_v47, %v2359_v25 }
 0x358   : > { %v2363_v52 = vadd.f32 %v2361_v42, %v2353_v4  ;;  %v5055_v42 = vld [vmem:[%s7854_s2 + $0x400] sm:$0xff]  ;;  %v5056_v4 = vld [vmem:[%s7854_s2 + $0x408] sm:$0xff] }
 0x35a   : > { %v2377_v29 = vpop.permute.xlu0 %2376  ;;  %v2369_v31 = vpop.permute.xlu1 %2368 }
 0x35b   : > { %v2371_v44 = vsel %vm1413_vm6, %v2367_v26, %v2369_v31  ;;  %v5035_v31 = vld [vmem:[%s7854_s2 + $0x360] sm:$0xff] }
 0x35c   : > { %v2373_v48 = vadd.f32 %v2371_v44, %v2363_v52  ;;  %v5640_v38 = vpack.c.bf16 %v5036_v3, %v5035_v31  ;;  %v5644_v44 = vpack.c.bf16 %v5038_v41, %v5037_v21  ;;  %v5646_v52 = vpack.c.bf16 %v5056_v4, %v5055_v42  ;;  %v5047_v3 = vld [vmem:[%s7854_s2 + $0x3c0] sm:$0xff]  ;;  %v5110_v21 = vld [vmem:[%s7854_s2 + $0x588] sm:$0xff] }
 0x35e   : > { %v2387_v32 = vpop.permute.xlu0 %2386  ;;  %v2379_v33 = vpop.permute.xlu1 %2378 }
 0x35f   : > { %v2381_v53 = vsel %vm7892_vm7, %v2377_v29, %v2379_v33  ;;  %v3036_v29 = vadd.f32 %v6901_v40, %v5030_v30  ;;  %v5054_v40 = vld [vmem:[%s7854_s2 + $0x3f8] sm:$0xff]  ;;  %v5063_v30 = vld [vmem:[%s7854_s2 + $0x440] sm:$0xff] }
 0x360   : > { %v2383_v55 = vadd.f32 %v2381_v53, %v2373_v48  ;;  %v5039_v53 = vld [vmem:[%s7854_s2 + $0x380] sm:$0xff]  ;;  %v5040_v48 = vld [vmem:[%s7854_s2 + $0x388] sm:$0xff] }
 0x362   : > { %v2397_v18 = vpop.permute.xlu0 %2396  ;;  %v2389_v45 = vpop.permute.xlu1 %2388 }
 0x363   : > { %v2391_v54 = vsel %vm7893_vm8, %v2387_v32, %v2389_v45  ;;  %v5053_v32 = vld [vmem:[%s7854_s2 + $0x3f0] sm:$0xff] }
 0x364   : > { %v2393_v58 = vadd.f32 %v2391_v54, %v2383_v55  ;;  %v5642_v45 = vpack.c.bf16 %v5054_v40, %v5053_v32  ;;  %v5048_v32 = vld [vmem:[%s7854_s2 + $0x3c8] sm:$0xff]  ;;  %v5065_v40 = vld [vmem:[%s7854_s2 + $0x450] sm:$0xff] }
 0x366   : > { %v2407_v43 = vpop.permute.xlu0 %2406  ;;  %v2399_v17 = vpop.permute.xlu1 %2398 }
 0x367   : > { %v2401_v56 = vsel %vm7894_vm11, %v2397_v18, %v2399_v17 }
 0x368   : > { %v2403_v39 = vadd.f32 %v2401_v56, %v2393_v58  ;;  %v5648_v56 = vpack.c.bf16 %v5040_v48, %v5039_v53  ;;  %v7019_v58 = vld [vmem:[%s6321_s12 + $0x8] sm:$0xff] }
 0x36a   : > { %v2417_v51 = vpop.permute.xlu0 %2416  ;;  %v2409_v46 = vpop.permute.xlu1 %2408 }
 0x36b   : > { %v2411_v2 = vsel %vm2410_vm12, %v2407_v43, %v2409_v46  ;;  %v5058_v46 = vld [vmem:[%s7854_s2 + $0x418] sm:$0xff] }
 0x36c   : > { %v2413_v19 = vadd.f32 %v2411_v2, %v2403_v39  ;;  %v5041_v2 = vld [vmem:[%s7854_s2 + $0x390] sm:$0xff]  ;;  %v5042_v39 = vld [vmem:[%s7854_s2 + $0x398] sm:$0xff] }
 0x36e   : > { %v2419_v60 = vpop.permute.xlu1 %2418  ;;  %v2427_v0 = vpop.permute.xlu0 %2426 }
 0x36f   : > { %v2421_v12 = vsel %vm7889_vm13, %v2417_v51, %v2419_v60  ;;  %v5057_v51 = vld [vmem:[%s7854_s2 + $0x410] sm:$0xff]  ;;  %vm2480_vm13 = vcmask 582136  }
 0x370   : > { %v2423_v10 = vadd.f32 %v2421_v12, %v2413_v19  ;;  %v5650_v60 = vpack.c.bf16 %v5058_v46, %v5057_v51  ;;  %v5060_v12 = vld [vmem:[%s7854_s2 + $0x428] sm:$0xff]  ;;  %v7115_v51 = vld [vmem:[%s6321_s12] sm:$0xff] }
 0x371   : > { %v7119_v46 = vld [vmem:[%s6321_s12 + $0x20] sm:$0xff] }
 0x372   : > { %v2429_v37 = vpop.permute.xlu1 %2428  ;;  %v2437_v11 = vpop.permute.xlu0 %2436 }
 0x373   : > { %v2431_v6 = vsel %vm7888_vm14, %v2427_v0, %v2429_v37  ;;  %v5059_v0 = vld [vmem:[%s7854_s2 + $0x420] sm:$0xff]  ;;  %v5652_v37 = vpack.c.bf16 %v5042_v39, %v5041_v2  ;;  %vm2475_vm14 = vcmask 508336  }
 0x374   : > { %v2433_v57 = vadd.f32 %v2431_v6, %v2423_v10  ;;  %v5654_v6 = vpack.c.bf16 %v5060_v12, %v5059_v0  ;;  %v5043_v10 = vld [vmem:[%s7854_s2 + $0x3a0] sm:$0xff] }
 0x376   : > { %v2439_v20 = vpop.permute.xlu1 %2438 }
 0x377   : > { %v2441_v62 = vsel %vm7887_vm15, %v2437_v11, %v2439_v20  ;;  %v5044_v11 = vld [vmem:[%s7854_s2 + $0x3a8] sm:$0xff]  ;;  %v5062_v20 = vld [vmem:[%s7854_s2 + $0x438] sm:$0xff]  ;;  %vm2470_vm15 = vcmask 434536  }
 0x378   : > { %v2443_v15 = vadd.f32 %v2441_v62, %v2433_v57  ;;  %v5061_v57 = vld [vmem:[%s7854_s2 + $0x430] sm:$0xff] }
 0x37a   : > { %2452 = vrot.lane.b32.xlu1 %v2443_v15, %s7883_s30  ;;  %2447 = vrot.lane.b32.xlu0 %v2443_v15, %s7871_s29  ;;  %2445 = vst.msk [vmem:[%s6935_s9] sm:$0x1] %vm7886_vm1, %v2443_v15  ;;  %s7932_s30 = smov 85   ;;  %vm2465_vm1 = vcmask 360736   ;;  %s7940_s29 = smov 123  }
 0x37e   : > { %2462 = vrot.lane.b32.xlu1 %v2443_v15, %s7869_s22  ;;  %2457 = vrot.lane.b32.xlu0 %v2443_v15, %s7911_s20  ;;  %s7934_s22 = smov 83  }
 0x382   : > { %2472 = vrot.lane.b32.xlu1 %v2443_v15, %s7930_s26  ;;  %2467 = vrot.lane.b32.xlu0 %v2443_v15, %s7881_s13  ;;  %s7933_s13 = smov 84  }
 0x386   : > { %2482 = vrot.lane.b32.xlu1 %v2443_v15, %s7875_s15  ;;  %2477 = vrot.lane.b32.xlu0 %v2443_v15, %s7873_s16  ;;  %v5656_v15 = vpack.c.bf16 %v5044_v11, %v5043_v10  ;;  %s7941_s15 = smov 108   ;;  %s7942_s16 = smov 103  }
 0x3ac   : > { %v6948_v63 = vpop.f32.mrb[76].mxu1 }
 0x3ad   : > { %v2771_v61 = vrot.slane %v6948_v63, 2  ;;  %v2766_v22 = vrot.slane %v6948_v63, 1  ;;  %v6952_v59 = vpop.f32.mrb[77].mxu1  ;;  %v2782_v25 = vrot.slane %v6948_v63, 4  ;;  %v2776_v26 = vrot.slane %v6948_v63, 3 }
 0x3ae   : > { %v2791_v35 = vrot.slane %v6948_v63, 5  ;;  %v2783_v36 = vrot.slane %v6952_v59, 4  ;;  %v2800_v43 = vrot.slane %v6948_v63, 6  ;;  %v2792_v17 = vrot.slane %v6952_v59, 5 }
 0x3af   : > { %2772 = vrot.lane.b32.xlu1 %v2771_v61, %s7879_s14  ;;  %2767 = vrot.lane.b32.xlu0 %v2766_v22, %s7877_s11  ;;  %v2809_v54 = vrot.slane %v6948_v63, 7  ;;  %v2801_v55 = vrot.slane %v6952_v59, 6  ;;  %v2810_v19 = vrot.slane %v6952_v59, 7  ;;  %v5658_v61 = vpack.c.bf16 %v5062_v20, %v5061_v57  ;;  %v5045_v22 = vld [vmem:[%s7854_s2 + $0x3b0] sm:$0xff]  ;;  %v5046_v59 = vld [vmem:[%s7854_s2 + $0x3b8] sm:$0xff]  ;;  %s7939_s14 = smov 118  }
 0x3b0   : > { %v6959_v47 = vpop.f32.mrb[78].mxu1  ;;  %s7943_s11 = smov 88  }
 0x3b1   : > { %v6961_v24 = vpop.f32.mrb[79].mxu1  ;;  %v2827_v62 = vrot.slane %v6959_v47, 1  ;;  %v2854_v41 = vrot.slane %v6959_v47, 4 }
 0x3b2   : > { %v2846_v42 = vrot.slane %v6961_v24, 3  ;;  %v2855_v53 = vrot.slane %v6961_v24, 4  ;;  %v2873_v2 = vrot.slane %v6961_v24, 6 }
 0x3b3   : > { %2784 = vrot.lane.b32.xlu1 %v2782_v25, %s7909_s17  ;;  %2777 = vrot.lane.b32.xlu0 %v2776_v26, %s7901_s10  ;;  %v5064_v25 = vld [vmem:[%s7854_s2 + $0x448] sm:$0xff]  ;;  %v2836_v26 = vrot.slane %v6959_v47, 2 }
 0x3b4   : > { %v5460_v7 = vpop.f32.mrb[80].mxu1  ;;  %v5662_v31 = vpack.c.bf16 %v5064_v25, %v5063_v30  ;;  %v5093_v30 = vld [vmem:[%s7854_s2 + $0x500] sm:$0xff]  ;;  %v5094_v25 = vld [vmem:[%s7854_s2 + $0x508] sm:$0xff] }
 0x3b5   : > { %v3110_v33 = vpop.f32.mrb[81].mxu1  ;;  %v3116_v1 = vadd.f32 %v5460_v7, %v3041_v27  ;;  %v2828_v27 = vrot.slane %v6961_v24, 1  ;;  %v5066_v7 = vld [vmem:[%s7854_s2 + $0x458] sm:$0xff] }
 0x3b6   : > { %v3111_v18 = vadd.f32 %v3110_v33, %v3036_v29  ;;  %v5660_v29 = vpack.c.bf16 %v5046_v59, %v5045_v22  ;;  %v2845_v33 = vrot.slane %v6959_v47, 3  ;;  %v7161_v22 = vpop.f32.mrb[88].mxu0 }
 0x3b7   : > { %2793 = vrot.lane.b32.xlu1 %v2791_v35, %s7911_s20  ;;  %2786 = vrot.lane.b32.xlu0 %v2783_v36, %s7909_s17  ;;  %v2837_v35 = vrot.slane %v6961_v24, 2  ;;  %v5664_v36 = vpack.c.bf16 %v5048_v32, %v5047_v3  ;;  %v7163_v59 = vpop.f32.mrb[89].mxu0 }
 0x3b8   : > { %5033 = vmatmul.mubr.msk.f32.vlgmr.msra.gmra.mrb[82].mxu1 %vm7885_vm0, %v3111_v18  ;;  %v5050_v18 = vld [vmem:[%s7854_s2 + $0x3d8] sm:$0xff] }
 0x3b9   : > { %5641 = vmatpush3.bf16.msra.mxu1 %v5640_v38  ;;  %3195 = vmatprep.mubr.f32.mxu1 %v5884_v23  ;;  %v5666_v38 = vpack.c.bf16 %v5066_v7, %v5065_v40 }
 0x3ba   : > { %5643 = vmatprep.subr.bf16.mxu1 %v5642_v45  ;;  %v5109_v45 = vld [vmem:[%s7854_s2 + $0x580] sm:$0xff] }
 0x3bb   : > { %2802 = vrot.lane.b32.xlu1 %v2800_v43, %s7905_s23  ;;  %2795 = vrot.lane.b32.xlu0 %v2792_v17, %s7911_s20  ;;  %v5718_v43 = vpack.c.bf16 %v5110_v21, %v5109_v45  ;;  %v5111_v17 = vld [vmem:[%s7854_s2 + $0x590] sm:$0xff] }
 0x3bc   : > { %5034 = vmatmul.mubr.msk.f32.gmra.mrb[84].mxu1 %vm7885_vm0, %v3116_v1  ;;  %v5049_v1 = vld [vmem:[%s7854_s2 + $0x3d0] sm:$0xff] }
 0x3bd   : > { %5645 = vmatpush3.bf16.msra.mxu1 %v5644_v44  ;;  %3477 = vmatprep.mubr.f32.mxu1 %v7019_v58  ;;  %v5668_v4 = vpack.c.bf16 %v5050_v18, %v5049_v1  ;;  %v5112_v44 = vld [vmem:[%s7854_s2 + $0x598] sm:$0xff] }
 0x3be   : > { %5647 = vmatprep.subr.bf16.mxu1 %v5646_v52  ;;  %v2863_v52 = vrot.slane %v6959_v47, 5  ;;  %v5722_v48 = vpack.c.bf16 %v5112_v44, %v5111_v17 }
 0x3bf   : > { %2811 = vrot.lane.b32.xlu1 %v2809_v54, %s7903_s18  ;;  %2804 = vrot.lane.b32.xlu0 %v2801_v55, %s7905_s23  ;;  %v2872_v54 = vrot.slane %v6959_v47, 6  ;;  %v2864_v55 = vrot.slane %v6961_v24, 5 }
 0x3c1   : > { %5649 = vmatpush3.bf16.msra.mxu1 %v5648_v56  ;;  %v7127_v56 = vld [vmem:[%s6321_s12 + $0x18] sm:$0xff] }
 0x3c2   : > { %5651 = vmatprep.subr.bf16.mxu1 %v5650_v60  ;;  %v2881_v60 = vrot.slane %v6959_v47, 7 }
 0x3c3   : > { %2820 = vrot.lane.b32.xlu1 %v6959_v47, %s7907_s24  ;;  %2813 = vrot.lane.b32.xlu0 %v2810_v19, %s7903_s18 }
 0x3c5   : > { %5653 = vmatpush3.bf16.msra.mxu1 %v5652_v37 }
 0x3c6   : > { %5655 = vmatprep.subr.bf16.mxu1 %v5654_v6 }
 0x3c7   : > { %2829 = vrot.lane.b32.xlu1 %v2827_v62, %s7899_s25  ;;  %2822 = vrot.lane.b32.xlu0 %v6961_v24, %s7907_s24 }
 0x3c9   : > { %5657 = vmatpush3.bf16.msra.mxu1 %v5656_v15 }
 0x3ca   : > { %5659 = vmatprep.subr.bf16.mxu1 %v5658_v61 }
 0x3cb   : > { %2838 = vrot.lane.b32.xlu1 %v2836_v26, %s7930_s26  ;;  %2831 = vrot.lane.b32.xlu0 %v2828_v27, %s7899_s25  ;;  %s7946_s25 = smov 127  }
 0x3cd   : > { %5661 = vmatpush3.bf16.msra.mxu1 %v5660_v29  ;;  %v5686_v29 = vpack.c.bf16 %v5094_v25, %v5093_v30 }
 0x3ce   : > { %5663 = vmatprep.subr.bf16.mxu1 %v5662_v31 }
 0x3cf   : > { %2847 = vrot.lane.b32.xlu1 %v2845_v33, %s7897_s19  ;;  %2840 = vrot.lane.b32.xlu0 %v2837_v35, %s7930_s26 }
 0x3d0   : > { %5687 = vmatprep.subr.bf16.mxu0 %v5686_v29 }
 0x3d1   : > { %5665 = vmatpush3.bf16.msra.mxu1 %v5664_v36 }
 0x3d2   : > { %5667 = vmatprep.subr.bf16.mxu1 %v5666_v38 }
 0x3d3   : > { %2856 = vrot.lane.b32.xlu1 %v2854_v41, %s7895_s21  ;;  %2849 = vrot.lane.b32.xlu0 %v2846_v42, %s7897_s19  ;;  %s7945_s19 = smov 126  }
 0x3d5   : > { %5669 = vmatpush3.bf16.msra.mxu1 %v5668_v4 }
 0x3d6   : > { %5719 = vmatprep.subr.bf16.mxu1 %v5718_v43 }
 0x3d7   : > { %2865 = vrot.lane.b32.xlu1 %v2863_v52, %s7932_s30  ;;  %2858 = vrot.lane.b32.xlu0 %v2855_v53, %s7895_s21  ;;  %s7944_s21 = smov 93  }
 0x3d8   : > { %3478 = vmatmul.mubr.f32.vlgmr.msra.gmra.mrb[86].mxu1 %v7115_v51 }
 0x3d9   : > { %5721 = vmatpush3.bf16.msra.mxu1 %v5718_v43  ;;  %3482 = vmatprep.mubr.f32.mxu1 %v7119_v46 }
 0x3da   : > { %5723 = vmatprep.subr.bf16.mxu1 %v5722_v48 }
 0x3db   : > { %2874 = vrot.lane.b32.xlu1 %v2872_v54, %s7933_s13  ;;  %2867 = vrot.lane.b32.xlu0 %v2864_v55, %s7932_s30 }
 0x3dc   : > { %3483 = vmatmul.mubr.f32.gmra.mrb[88].mxu1 %v7127_v56 }
 0x3dd   : > { %5725 = vmatpush3.bf16.msra.mxu1 %v5722_v48  ;;  %5480 = vmatprep.mubr.msk.f32.mxu1 %vm7885_vm0, %v6802_v8  ;;  %v2882_v8 = vrot.slane %v6961_v24, 7 }
 0x3de   : > { %5727 = vmatprep.subr.bf16.mxu1 %v6796_v34 }
 0x3df   : > { %2883 = vrot.lane.b32.xlu1 %v2881_v60, %s7934_s22  ;;  %2876 = vrot.lane.b32.xlu0 %v2873_v2, %s7933_s13 }
 0x3e0   : > { %5481 = vmatmul.mubr.msk.f32.vlgmr.msra.gmra.mrb[90].mxu1 %vm7885_vm0, %v6807_v50  ;;  %vm2460_vm0 = vcmask 286936  }
 0x3e1   : > { %5729 = vmatpush1.bf16.msra.mxu1 %v6758_v9  ;;  %4077 = vmatprep.mubr.f32.mxu1 %v5884_v23 }
 0x3e2   : > { %5731 = vmatprep.subr.bf16.mxu1 %v6813_v49 }
 0x3e3   : > { %2885 = vrot.lane.b32.xlu0 %v2882_v8, %s7934_s22 }
 0x3e5   : > { %5733 = vmatpush1.bf16.msra.mxu1 %v6771_v28 }
 0x3ec   : > { %v2453_v47 = vpop.permute.xlu1 %2452  ;;  %v2448_v50 = vpop.permute.xlu0 %2447 }
 0x3ed   : > { %2451 = vst.msk [vmem:[%s6935_s9] sm:$0x1] %vm7890_vm2, %v2448_v50  ;;  %vm2485_vm2 = vcmask 655936  }
 0x3ee   : > { %2456 = vst.msk [vmem:[%s6935_s9] sm:$0x1] %vm2455_vm9, %v2453_v47 }
 0x3f0   : > { %v2463_v24 = vpop.permute.xlu1 %2462  ;;  %v2458_v39 = vpop.permute.xlu0 %2457 }
 0x3f1   : > { %2461 = vst.msk [vmem:[%s6935_s9] sm:$0x1] %vm2460_vm0, %v2458_v39 }
 0x3f2   : > { %2466 = vst.msk [vmem:[%s6935_s9] sm:$0x1] %vm2465_vm1, %v2463_v24 }
 0x3f4   : > { %v2473_v0 = vpop.permute.xlu1 %2472  ;;  %v2468_v12 = vpop.permute.xlu0 %2467 }
 0x3f5   : > { %2471 = vst.msk [vmem:[%s6935_s9] sm:$0x1] %vm2470_vm15, %v2468_v12 }
 0x3f6   : > { %2476 = vst.msk [vmem:[%s6935_s9] sm:$0x1] %vm2475_vm14, %v2473_v0 }
 0x3f8   : > { %v2483_v19 = vpop.permute.xlu1 %2482  ;;  %v2478_v37 = vpop.permute.xlu0 %2477 }
 0x3f9   : > { %2481 = vst.msk [vmem:[%s6935_s9] sm:$0x1] %vm2480_vm13, %v2478_v37 }
 0x3fa   : > { %2486 = vst.msk [vmem:[%s6935_s9] sm:$0x1] %vm2485_vm2, %v2483_v19 }
 0x421   : > { %v2773_v6 = vpop.permute.xlu1 %2772  ;;  %v2768_v10 = vpop.permute.xlu0 %2767 }
 0x422   : > { %v2770_v32 = vadd.f32 %v2768_v10, %v6948_v63 }
 0x424   : > { %v2775_v33 = vadd.f32 %v2773_v6, %v2770_v32 }
 0x425   : > { %v2785_v11 = vpop.permute.xlu1 %2784  ;;  %v2778_v57 = vpop.permute.xlu0 %2777 }
 0x426   : > { %v2780_v1 = vadd.f32 %v2778_v57, %v2775_v33 }
 0x429   : > { %v2794_v20 = vpop.permute.xlu1 %2793  ;;  %v2787_v62 = vpop.permute.xlu0 %2786 }
 0x42a   : > { %v2788_v38 = vsel %vm882_vm3, %v2785_v11, %v2787_v62 }
 0x42b   : > { %v2790_v45 = vadd.f32 %v2788_v38, %v2780_v1 }
 0x42d   : > { %v2803_v15 = vpop.permute.xlu1 %2802  ;;  %v2796_v61 = vpop.permute.xlu0 %2795 }
 0x42e   : > { %v2797_v18 = vsel %vm1059_vm4, %v2794_v20, %v2796_v61 }
 0x42f   : > { %v2799_v4 = vadd.f32 %v2797_v18, %v2790_v45 }
 0x431   : > { %v2812_v26 = vpop.permute.xlu1 %2811  ;;  %v2805_v27 = vpop.permute.xlu0 %2804 }
 0x432   : > { %v2806_v42 = vsel %vm1236_vm5, %v2803_v15, %v2805_v27 }
 0x433   : > { %v2808_v17 = vadd.f32 %v2806_v42, %v2799_v4 }
 0x435   : > { %v2821_v31 = vpop.permute.xlu1 %2820  ;;  %v2814_v3 = vpop.permute.xlu0 %2813 }
 0x436   : > { %v2815_v43 = vsel %vm7891_vm10, %v2812_v26, %v2814_v3  ;;  %vm7935_vm10 = vcmask 695296  }
 0x437   : > { %v2817_v53 = vadd.f32 %v2815_v43, %v2808_v17  ;;  %v5072_v17 = vld [vmem:[%s7855_s3 + $0x3] ss:$0 sm:$0xff] }
 0x439   : > { %v2830_v40 = vpop.permute.xlu1 %2829  ;;  %v2823_v7 = vpop.permute.xlu0 %2822 }
 0x43a   : > { %v2824_v52 = vsel %vm1413_vm6, %v2821_v31, %v2823_v7 }
 0x43b   : > { %v2826_v54 = vadd.f32 %v2824_v52, %v2817_v53  ;;  %v5078_v52 = vld [vmem:[%s7854_s2 + $0x488] sm:$0xff]  ;;  %v5095_v53 = vld [vmem:[%s7854_s2 + $0x510] sm:$0xff] }
 0x43d   : > { %v2839_v35 = vpop.permute.xlu1 %2838  ;;  %v2832_v36 = vpop.permute.xlu0 %2831 }
 0x43e   : > { %v2833_v48 = vsel %vm7892_vm7, %v2830_v40, %v2832_v36  ;;  %vm7936_vm7 = vcmask 687104  }
 0x43f   : > { %v2835_v8 = vadd.f32 %v2833_v48, %v2826_v54  ;;  %v5096_v48 = vld [vmem:[%s7854_s2 + $0x518] sm:$0xff] }
 0x441   : > { %v2848_v21 = vpop.permute.xlu1 %2847  ;;  %v2841_v41 = vpop.permute.xlu0 %2840 }
 0x442   : > { %v2842_v2 = vsel %vm7893_vm8, %v2839_v35, %v2841_v41  ;;  %vm7937_vm8 = vcmask 678912  }
 0x443   : > { %v2844_v50 = vadd.f32 %v2842_v2, %v2835_v8 }
 0x445   : > { %v2857_v63 = vpop.permute.xlu1 %2856  ;;  %v2850_v44 = vpop.permute.xlu0 %2849 }
 0x446   : > { %v2851_v47 = vsel %vm7894_vm11, %v2848_v21, %v2850_v44  ;;  %vm7938_vm11 = vcmask 65536   ;;  %v5077_v44 = vld [vmem:[%s7854_s2 + $0x480] sm:$0xff] }
 0x447   : > { %v2853_v0 = vadd.f32 %v2851_v47, %v2844_v50 }
 0x449   : > { %v2866_v55 = vpop.permute.xlu1 %2865  ;;  %v2859_v60 = vpop.permute.xlu0 %2858 }
 0x44a   : > { %v2860_v39 = vsel %vm2410_vm12, %v2857_v63, %v2859_v60  ;;  %v5688_v60 = vpack.c.bf16 %v5078_v52, %v5077_v44  ;;  %v5089_v52 = vld [vmem:[%s7854_s2 + $0x4e0] sm:$0xff] }
 0x44b   : > { %v2862_v37 = vadd.f32 %v2860_v39, %v2853_v0  ;;  %v5079_v39 = vld [vmem:[%s7854_s2 + $0x490] sm:$0xff]  ;;  %v5080_v0 = vld [vmem:[%s7854_s2 + $0x498] sm:$0xff] }
 0x44d   : > { %v2868_v24 = vpop.permute.xlu0 %2867  ;;  %v2875_v12 = vpop.permute.xlu1 %2874 }
 0x44e   : > { %v2869_v19 = vsel %vm7935_vm10, %v2866_v55, %v2868_v24  ;;  %v5690_v24 = vpack.c.bf16 %v5096_v48, %v5095_v53  ;;  %v5090_v53 = vld [vmem:[%s7854_s2 + $0x4e8] sm:$0xff]  ;;  %v5107_v48 = vld [vmem:[%s7854_s2 + $0x570] sm:$0xff]  ;;  %vm7952_vm10 = vcmask 139336  }
 0x44f   : > { %v2871_v11 = vadd.f32 %v2869_v19, %v2862_v37  ;;  %v5097_v19 = vld [vmem:[%s7854_s2 + $0x520] sm:$0xff] }
 0x451   : > { %v2877_v6 = vpop.permute.xlu0 %2876  ;;  %v2884_v57 = vpop.permute.xlu1 %2883 }
 0x452   : > { %v2878_v10 = vsel %vm7936_vm7, %v2875_v12, %v2877_v6  ;;  %vm7950_vm7 = vcmask 261120   ;;  %v5692_v6 = vpack.c.bf16 %v5080_v0, %v5079_v39 }
 0x453   : > { %v2880_v20 = vadd.f32 %v2878_v10, %v2871_v11 }
 0x455   : > { %v2886_v62 = vpop.permute.xlu0 %2885 }
 0x456   : > { %v2887_v15 = vsel %vm7937_vm8, %v2884_v57, %v2886_v62  ;;  %v5082_v62 = vld [vmem:[%s7854_s2 + $0x4a8] sm:$0xff]  ;;  %vm7951_vm8 = vmmov %vm7950_vm7 }
 0x457   : > { %v2889_v61 = vadd.f32 %v2887_v15, %v2880_v20  ;;  %v5081_v20 = vld [vmem:[%s7854_s2 + $0x4a0] sm:$0xff] }
 0x459   : > { %2890 = vst.msk [vmem:[%s6935_s9 + $0x1] sm:$0x1] %vm7938_vm11, %v2889_v61  ;;  %2896 = vrot.lane.b32.xlu0 %v2889_v61, %s7939_s14  ;;  %2892 = vrot.lane.b32.xlu1 %v2889_v61, %s7940_s29  ;;  %vm7953_vm11 = vmmov %vm7950_vm7 }
 0x45d   : > { %2904 = vrot.lane.b32.xlu0 %v2889_v61, %s7941_s15  ;;  %2900 = vrot.lane.b32.xlu1 %v2889_v61, %s7911_s20 }
 0x461   : > { %2912 = vrot.lane.b32.xlu0 %v2889_v61, %s7930_s26  ;;  %2908 = vrot.lane.b32.xlu1 %v2889_v61, %s7942_s16 }
 0x465   : > { %2920 = vrot.lane.b32.xlu0 %v2889_v61, %s7943_s11  ;;  %2916 = vrot.lane.b32.xlu1 %v2889_v61, %s7944_s21  ;;  %v5099_v61 = vld [vmem:[%s7854_s2 + $0x530] sm:$0xff] }
 0x48b   : > { %v7194_v30 = vpop.f32.mrb[82].mxu1 }
 0x48c   : > { %v3208_v25 = vrot.slane %v7194_v30, 2  ;;  %v3203_v26 = vrot.slane %v7194_v30, 1  ;;  %v3193_v27 = vpop.f32.mrb[83].mxu1  ;;  %v3219_v31 = vrot.slane %v7194_v30, 4  ;;  %v3213_v3 = vrot.slane %v7194_v30, 3 }
 0x48d   : > { %v3220_v40 = vrot.slane %v3193_v27, 4  ;;  %v3228_v7 = vrot.slane %v7194_v30, 5  ;;  %v3229_v33 = vrot.slane %v3193_v27, 5  ;;  %v3237_v35 = vrot.slane %v7194_v30, 6 }
 0x48e   : > { %3209 = vrot.lane.b32.xlu0 %v3208_v25, %s7945_s19  ;;  %3204 = vrot.lane.b32.xlu1 %v3203_v26, %s7946_s25  ;;  %v3238_v36 = vrot.slane %v3193_v27, 6  ;;  %v3246_v38 = vrot.slane %v7194_v30, 7  ;;  %v3247_v1 = vrot.slane %v3193_v27, 7  ;;  %v5100_v25 = vld [vmem:[%s7854_s2 + $0x538] sm:$0xff]  ;;  %v5696_v26 = vpack.c.bf16 %v5082_v62, %v5081_v20 }
 0x48f   : > { %v7200_v29 = vpop.f32.mrb[84].mxu1 }
 0x490   : > { %v7204_v32 = vpop.f32.mrb[85].mxu1  ;;  %v3264_v18 = vrot.slane %v7200_v29, 1  ;;  %v3273_v45 = vrot.slane %v7200_v29, 2  ;;  %v3282_v4 = vrot.slane %v7200_v29, 3  ;;  %v3291_v2 = vrot.slane %v7200_v29, 4 }
 0x491   : > { %v3265_v21 = vrot.slane %v7204_v32, 1  ;;  %v3274_v43 = vrot.slane %v7204_v32, 2  ;;  %v3283_v8 = vrot.slane %v7204_v32, 3  ;;  %v3300_v10 = vrot.slane %v7200_v29, 5 }
 0x492   : > { %3221 = vrot.lane.b32.xlu0 %v3219_v31, %s7909_s17  ;;  %3214 = vrot.lane.b32.xlu1 %v3213_v3, %s7901_s10  ;;  %s7947_s10 = smov 99   ;;  %v3292_v11 = vrot.slane %v7204_v32, 4  ;;  %v3309_v27 = vrot.slane %v7200_v29, 6  ;;  %v5698_v31 = vpack.c.bf16 %v5100_v25, %v5099_v61  ;;  %v5083_v3 = vld [vmem:[%s7854_s2 + $0x4b0] sm:$0xff]  ;;  %v5865_v61 = vld [vmem:[%s6321_s12 + $0x28] sm:$0xff] }
 0x496   : > { %3230 = vrot.lane.b32.xlu0 %v3228_v7, %s7911_s20  ;;  %3223 = vrot.lane.b32.xlu1 %v3220_v40, %s7909_s17  ;;  %v5084_v40 = vld [vmem:[%s7854_s2 + $0x4b8] sm:$0xff]  ;;  %v5101_v7 = vld [vmem:[%s7854_s2 + $0x540] sm:$0xff]  ;;  %s7965_s17 = smov 125  }
 0x49a   : > { %3239 = vrot.lane.b32.xlu0 %v3237_v35, %s7905_s23  ;;  %3232 = vrot.lane.b32.xlu1 %v3229_v33, %s7911_s20  ;;  %v5700_v33 = vpack.c.bf16 %v5084_v40, %v5083_v3  ;;  %v3318_v35 = vrot.slane %v7200_v29, 7  ;;  %s4805_s20 = sshll.u32 %s8005_s28, 2  ;;  %s7963_s28 = smov 113  }
 0x49e   : > { %3248 = vrot.lane.b32.xlu0 %v3246_v38, %s7903_s18  ;;  %3241 = vrot.lane.b32.xlu1 %v3238_v36, %s7905_s23  ;;  %v3310_v36 = vrot.slane %v7204_v32, 6  ;;  %s7416_s23 = scalar_lea.vmem %s7961_s8, %s4805_s20 }
 0x4a2   : > { %3257 = vrot.lane.b32.xlu0 %v7200_v29, %s7907_s24  ;;  %3250 = vrot.lane.b32.xlu1 %v3247_v1, %s7903_s18  ;;  %v5085_v1 = vld [vmem:[%s7854_s2 + $0x4c0] sm:$0xff]  ;;  %v5103_v29 = vld [vmem:[%s7854_s2 + $0x550] sm:$0xff] }
 0x4a6   : > { %3266 = vrot.lane.b32.xlu0 %v3264_v18, %s7947_s10  ;;  %3259 = vrot.lane.b32.xlu1 %v7204_v32, %s7907_s24  ;;  %v5086_v18 = vld [vmem:[%s7854_s2 + $0x4c8] sm:$0xff] }
 0x4aa   : > { %3275 = vrot.lane.b32.xlu0 %v3273_v45, %s7930_s26  ;;  %3268 = vrot.lane.b32.xlu1 %v3265_v21, %s7947_s10  ;;  %v5104_v45 = vld [vmem:[%s7854_s2 + $0x558] sm:$0xff]  ;;  %v5704_v21 = vpack.c.bf16 %v5086_v18, %v5085_v1 }
 0x4ab   : > { %v5328_v41 = vpop.f32.mrb[86].mxu1 }
 0x4ac   : > { %v5329_v42 = vpop.f32.mrb[87].mxu1 }
 0x4ad   : > { %v5330_v63 = vadd.f32 %v5329_v42, %v5328_v41  ;;  %v3319_v41 = vrot.slane %v7204_v32, 7  ;;  %v5706_v42 = vpack.c.bf16 %v5104_v45, %v5103_v29 }
 0x4ae   : > { %3284 = vrot.lane.b32.xlu0 %v3282_v4, %s7948_s1  ;;  %3277 = vrot.lane.b32.xlu1 %v3274_v43, %s7930_s26  ;;  %v5087_v4 = vld [vmem:[%s7854_s2 + $0x4d0] sm:$0xff]  ;;  %v5088_v43 = vld [vmem:[%s7854_s2 + $0x4d8] sm:$0xff] }
 0x4af   : > { %v3480_v54 = vadd.f32 %v5330_v63, %v5072_v17  ;;  %v5331_v55 = vpop.f32.mrb[88].mxu1  ;;  %v5708_v63 = vpack.c.bf16 %v5088_v43, %v5087_v4 }
 0x4b0   : > { %v5332_v47 = vpop.f32.mrb[89].mxu1 }
 0x4b1   : > { %v3555_v50 = vadd.f32 %v7163_v59, %v3480_v54  ;;  %v5333_v12 = vadd.f32 %v5332_v47, %v5331_v55  ;;  %v5098_v59 = vld [vmem:[%s7854_s2 + $0x528] sm:$0xff]  ;;  %v5108_v54 = vld [vmem:[%s7854_s2 + $0x578] sm:$0xff]  ;;  %v5712_v55 = vpack.c.bf16 %v5090_v53, %v5089_v52  ;;  %v5151_v47 = vld [vmem:[%s7854_s2 + $0x6a0] sm:$0xff] }
 0x4b2   : > { %3293 = vrot.lane.b32.xlu0 %v3291_v2, %s7949_s6  ;;  %3286 = vrot.lane.b32.xlu1 %v3283_v8, %s7948_s1  ;;  %v5694_v57 = vpack.c.bf16 %v5098_v59, %v5097_v19  ;;  %v5091_v2 = vld [vmem:[%s7854_s2 + $0x4f0] sm:$0xff]  ;;  %v5092_v8 = vld [vmem:[%s7854_s2 + $0x4f8] sm:$0xff] }
 0x4b3   : > { %5075 = vmatmul.mubr.msk.f32.vlgmr.msra.gmra.mrb[90].mxu0 %vm7950_vm7, %v3555_v50  ;;  %v3485_v37 = vadd.f32 %v5333_v12, %v5072_v17  ;;  %v5105_v17 = vld [vmem:[%s7854_s2 + $0x560] sm:$0xff]  ;;  %v5152_v50 = vld [vmem:[%s7854_s2 + $0x6a8] sm:$0xff]  ;;  %v5716_v0 = vpack.c.bf16 %v5092_v8, %v5091_v2  ;;  %v5153_v19 = vld [vmem:[%s7854_s2 + $0x6b0] sm:$0xff]  ;;  %v7397_v2 = vpop.f32.mrb[90].mxu1 }
 0x4b4   : > { %5689 = vmatpush3.bf16.msra.mxu0 %v5688_v60  ;;  %3639 = vmatprep.mubr.f32.mxu0 %v5884_v23  ;;  %v5714_v60 = vpack.c.bf16 %v5108_v54, %v5107_v48  ;;  %v5766_v12 = vpack.c.bf16 %v5152_v50, %v5151_v47  ;;  %v5154_v59 = vld [vmem:[%s7854_s2 + $0x6b8] sm:$0xff]  ;;  %v7399_v47 = vpop.f32.mrb[91].mxu1 }
 0x4b5   : > { %5691 = vmatprep.subr.bf16.mxu0 %v5690_v24  ;;  %v3560_v15 = vadd.f32 %v7161_v22, %v3485_v37  ;;  %v3301_v22 = vrot.slane %v7204_v32, 5  ;;  %v5106_v32 = vld [vmem:[%s7854_s2 + $0x568] sm:$0xff] }
 0x4b6   : > { %3302 = vrot.lane.b32.xlu0 %v3300_v10, %s7932_s30  ;;  %3295 = vrot.lane.b32.xlu1 %v3292_v11, %s7949_s6  ;;  %v5710_v44 = vpack.c.bf16 %v5106_v32, %v5105_v17  ;;  %v5770_v10 = vpack.c.bf16 %v5154_v59, %v5153_v19 }
 0x4b7   : > { %5076 = vmatmul.mubr.msk.f32.gmra.mrb[92].mxu0 %vm7951_vm8, %v3560_v15  ;;  %v5864_v15 = vld [vmem:[%s6321_s12 + $0x10] sm:$0xff]  ;;  %vm7954_vm8 = vcmask 908288  }
 0x4b8   : > { %5693 = vmatpush3.bf16.msra.mxu0 %v5692_v6  ;;  %3921 = vmatprep.mubr.f32.mxu0 %v7019_v58  ;;  %v5102_v58 = vld [vmem:[%s7854_s2 + $0x548] sm:$0xff] }
 0x4b9   : > { %5695 = vmatprep.subr.bf16.mxu0 %v5694_v57  ;;  %v5702_v38 = vpack.c.bf16 %v5102_v58, %v5101_v7 }
 0x4ba   : > { %3311 = vrot.lane.b32.xlu0 %v3309_v27, %s7933_s13  ;;  %3304 = vrot.lane.b32.xlu1 %v3301_v22, %s7932_s30 }
 0x4bc   : > { %5697 = vmatpush3.bf16.msra.mxu0 %v5696_v26 }
 0x4bd   : > { %5699 = vmatprep.subr.bf16.mxu0 %v5698_v31 }
 0x4be   : > { %3320 = vrot.lane.b32.xlu0 %v3318_v35, %s7934_s22  ;;  %3313 = vrot.lane.b32.xlu1 %v3310_v36, %s7933_s13 }
 0x4c0   : > { %5701 = vmatpush3.bf16.msra.mxu0 %v5700_v33 }
 0x4c1   : > { %5703 = vmatprep.subr.bf16.mxu0 %v5702_v38 }
 0x4c2   : > { %3322 = vrot.lane.b32.xlu1 %v3319_v41, %s7934_s22 }
 0x4c4   : > { %5705 = vmatpush3.bf16.msra.mxu0 %v5704_v21 }
 0x4c5   : > { %5707 = vmatprep.subr.bf16.mxu0 %v5706_v42 }
 0x4c8   : > { %5709 = vmatpush3.bf16.msra.mxu0 %v5708_v63 }
 0x4c9   : > { %5711 = vmatprep.subr.bf16.mxu0 %v5710_v44 }
 0x4cb   : > { %v2897_v24 = vpop.permute.xlu0 %2896  ;;  %v2893_v39 = vpop.permute.xlu1 %2892 }
 0x4cc   : > { %5713 = vmatpush3.bf16.msra.mxu0 %v5712_v55  ;;  %2895 = vst.msk [vmem:[%s6935_s9 + $0x1] sm:$0x1] %vm7952_vm10, %v2893_v39  ;;  %vm7955_vm10 = vcmask 809984   ;;  %v5136_v39 = vld [vmem:[%s7854_s2 + $0x628] sm:$0xff] }
 0x4cd   : > { %2899 = vst.msk [vmem:[%s6935_s9 + $0x1] sm:$0x1] %vm2455_vm9, %v2897_v24  ;;  %5715 = vmatprep.subr.bf16.mxu0 %v5714_v60  ;;  %v5135_v24 = vld [vmem:[%s7854_s2 + $0x620] sm:$0xff] }
 0x4ce   : > { %v5734_v19 = vpack.c.bf16 %v5136_v39, %v5135_v24 }
 0x4cf   : > { %v2905_v37 = vpop.permute.xlu0 %2904  ;;  %v2901_v6 = vpop.permute.xlu1 %2900 }
 0x4d0   : > { %5717 = vmatpush3.bf16.msra.mxu0 %v5716_v0  ;;  %2903 = vst.msk [vmem:[%s6935_s9 + $0x1] sm:$0x1] %vm2460_vm0, %v2901_v6  ;;  %5735 = vmatprep.subr.bf16.mxu1 %v5734_v19 }
 0x4d1   : > { %2907 = vst.msk [vmem:[%s6935_s9 + $0x1] sm:$0x1] %vm2465_vm1, %v2905_v37  ;;  %5767 = vmatprep.subr.bf16.mxu0 %v5766_v12 }
 0x4d3   : > { %3922 = vmatmul.mubr.f32.vlgmr.msra.gmra.mrb[94].mxu0 %v7115_v51  ;;  %v2913_v11 = vpop.permute.xlu0 %2912  ;;  %v2909_v57 = vpop.permute.xlu1 %2908 }
 0x4d4   : > { %5769 = vmatpush3.bf16.msra.mxu0 %v5766_v12  ;;  %2911 = vst.msk [vmem:[%s6935_s9 + $0x1] sm:$0x1] %vm2470_vm15, %v2909_v57  ;;  %3926 = vmatprep.mubr.f32.mxu0 %v7119_v46 }
 0x4d5   : > { %2915 = vst.msk [vmem:[%s6935_s9 + $0x1] sm:$0x1] %vm2475_vm14, %v2913_v11  ;;  %5771 = vmatprep.subr.bf16.mxu0 %v5770_v10 }
 0x4d7   : > { %3927 = vmatmul.mubr.f32.gmra.mrb[96].mxu0 %v7127_v56  ;;  %v2921_v20 = vpop.permute.xlu0 %2920  ;;  %v2917_v62 = vpop.permute.xlu1 %2916 }
 0x4d8   : > { %5773 = vmatpush3.bf16.msra.mxu0 %v5770_v10  ;;  %2919 = vst.msk [vmem:[%s6935_s9 + $0x1] sm:$0x1] %vm2480_vm13, %v2917_v62  ;;  %5491 = vmatprep.mubr.msk.f32.mxu0 %vm7953_vm11, %v5864_v15  ;;  %vm7956_vm11 = vcmask 801792  }
 0x4d9   : > { %5775 = vmatprep.subr.bf16.mxu0 %v6796_v34  ;;  %2923 = vst.msk [vmem:[%s6935_s9 + $0x1] sm:$0x1] %vm2485_vm2, %v2921_v20  ;;  %s7966_s9 = smov 112  }
 0x4db   : > { %5492 = vmatmul.mubr.msk.f32.vlgmr.msra.gmra.mrb[98].mxu0 %vm7950_vm7, %v5865_v61  ;;  %vm7957_vm7 = vcmask 793600  }
 0x4dc   : > { %5777 = vmatpush1.bf16.msra.mxu0 %v6758_v9  ;;  %4521 = vmatprep.mubr.f32.mxu0 %v5884_v23 }
 0x4dd   : > { %5779 = vmatprep.subr.bf16.mxu0 %v6813_v49 }
 0x4e0   : > { %5781 = vmatpush1.bf16.msra.mxu0 %v6771_v28 }
 0x500   : > { %v3210_v25 = vpop.permute.xlu0 %3209  ;;  %v3205_v26 = vpop.permute.xlu1 %3204 }
 0x501   : > { %v3207_v9 = vadd.f32 %v3205_v26, %v7194_v30 }
 0x503   : > { %v3212_v1 = vadd.f32 %v3210_v25, %v3207_v9 }
 0x504   : > { %v3222_v27 = vpop.permute.xlu0 %3221  ;;  %v3215_v22 = vpop.permute.xlu1 %3214 }
 0x505   : > { %v3217_v29 = vadd.f32 %v3215_v22, %v3212_v1 }
 0x508   : > { %v3231_v31 = vpop.permute.xlu0 %3230  ;;  %v3224_v3 = vpop.permute.xlu1 %3223 }
 0x509   : > { %v3225_v28 = vsel %vm882_vm3, %v3222_v27, %v3224_v3 }
 0x50a   : > { %v3227_v21 = vadd.f32 %v3225_v28, %v3217_v29 }
 0x50c   : > { %v3240_v34 = vpop.permute.xlu0 %3239  ;;  %v3233_v40 = vpop.permute.xlu1 %3232 }
 0x50d   : > { %v3234_v45 = vsel %vm1059_vm4, %v3231_v31, %v3233_v40 }
 0x50e   : > { %v3236_v43 = vadd.f32 %v3234_v45, %v3227_v21 }
 0x510   : > { %v3249_v7 = vpop.permute.xlu0 %3248  ;;  %v3242_v58 = vpop.permute.xlu1 %3241 }
 0x511   : > { %v3243_v4 = vsel %vm1236_vm5, %v3240_v34, %v3242_v58 }
 0x512   : > { %v3245_v32 = vadd.f32 %v3243_v4, %v3236_v43  ;;  %v5114_v43 = vld [vmem:[%s7855_s3 + $0x4] ss:$0 sm:$0xff] }
 0x514   : > { %v3258_v33 = vpop.permute.xlu0 %3257  ;;  %v3251_v35 = vpop.permute.xlu1 %3250 }
 0x515   : > { %v3252_v17 = vsel %vm7954_vm8, %v3249_v7, %v3251_v35  ;;  %vm7958_vm8 = vcmask 695296  }
 0x516   : > { %v3254_v52 = vadd.f32 %v3252_v17, %v3245_v32  ;;  %v5119_v32 = vld [vmem:[%s7854_s2 + $0x5a0] sm:$0xff] }
 0x518   : > { %v3267_v36 = vpop.permute.xlu0 %3266  ;;  %v3260_v38 = vpop.permute.xlu1 %3259 }
 0x519   : > { %v3261_v44 = vsel %vm1413_vm6, %v3258_v33, %v3260_v38 }
 0x51a   : > { %v3263_v48 = vadd.f32 %v3261_v44, %v3254_v52  ;;  %v5138_v44 = vld [vmem:[%s7854_s2 + $0x638] sm:$0xff] }
 0x51c   : > { %v3276_v49 = vpop.permute.xlu0 %3275  ;;  %v3269_v18 = vpop.permute.xlu1 %3268 }
 0x51d   : > { %v3270_v53 = vsel %vm7955_vm10, %v3267_v36, %v3269_v18  ;;  %vm7959_vm10 = vcmask 687104  }
 0x51e   : > { %v3272_v8 = vadd.f32 %v3270_v53, %v3263_v48 }
 0x520   : > { %v3285_v41 = vpop.permute.xlu0 %3284  ;;  %v3278_v42 = vpop.permute.xlu1 %3277 }
 0x521   : > { %v3279_v60 = vsel %vm7956_vm11, %v3276_v49, %v3278_v42  ;;  %vm7960_vm11 = vcmask 678912  }
 0x522   : > { %v3281_v0 = vadd.f32 %v3279_v60, %v3272_v8 }
 0x524   : > { %v3294_v30 = vpop.permute.xlu0 %3293  ;;  %v3287_v63 = vpop.permute.xlu1 %3286 }
 0x525   : > { %v3288_v50 = vsel %vm7957_vm7, %v3285_v41, %v3287_v63  ;;  %vm7962_vm7 = vcmask 65536   ;;  %v5137_v63 = vld [vmem:[%s7854_s2 + $0x630] sm:$0xff] }
 0x526   : > { %v3290_v37 = vadd.f32 %v3288_v50, %v3281_v0  ;;  %v5738_v39 = vpack.c.bf16 %v5138_v44, %v5137_v63  ;;  %v5121_v0 = vld [vmem:[%s7854_s2 + $0x5b0] sm:$0xff]  ;;  %v5147_v63 = vld [vmem:[%s7854_s2 + $0x680] sm:$0xff] }
 0x528   : > { %v3303_v54 = vpop.permute.xlu0 %3302  ;;  %v3296_v55 = vpop.permute.xlu1 %3295 }
 0x529   : > { %v3297_v59 = vsel %vm2410_vm12, %v3294_v30, %v3296_v55  ;;  %v5120_v30 = vld [vmem:[%s7854_s2 + $0x5a8] sm:$0xff] }
 0x52a   : > { %v3299_v11 = vadd.f32 %v3297_v59, %v3290_v37  ;;  %v5736_v48 = vpack.c.bf16 %v5120_v30, %v5119_v32  ;;  %v5140_v59 = vld [vmem:[%s7854_s2 + $0x648] sm:$0xff]  ;;  %v5129_v32 = vld [vmem:[%s7854_s2 + $0x5f0] sm:$0xff]  ;;  %v5130_v30 = vld [vmem:[%s7854_s2 + $0x5f8] sm:$0xff] }
 0x52b   : > { %v5756_v44 = vpack.c.bf16 %v5130_v30, %v5129_v32 }
 0x52c   : > { %v3305_v12 = vpop.permute.xlu1 %3304  ;;  %v3312_v6 = vpop.permute.xlu0 %3311 }
 0x52d   : > { %v3306_v10 = vsel %vm7958_vm8, %v3303_v54, %v3305_v12  ;;  %v5122_v12 = vld [vmem:[%s7854_s2 + $0x5b8] sm:$0xff]  ;;  %vm7969_vm8 = vcmask 139336  }
 0x52e   : > { %v3308_v62 = vadd.f32 %v3306_v10, %v3299_v11 }
 0x530   : > { %v3314_v57 = vpop.permute.xlu1 %3313  ;;  %v3321_v15 = vpop.permute.xlu0 %3320 }
 0x531   : > { %v3315_v20 = vsel %vm7959_vm10, %v3312_v6, %v3314_v57  ;;  %vm7970_vm10 = vcmask 261120   ;;  %v5740_v6 = vpack.c.bf16 %v5122_v12, %v5121_v0 }
 0x532   : > { %v3317_v61 = vadd.f32 %v3315_v20, %v3308_v62 }
 0x534   : > { %v3323_v25 = vpop.permute.xlu1 %3322 }
 0x535   : > { %v3324_v26 = vsel %vm7960_vm11, %v3321_v15, %v3323_v25  ;;  %v5123_v15 = vld [vmem:[%s7854_s2 + $0x5c0] sm:$0xff]  ;;  %vm7971_vm11 = vmmov %vm7970_vm10 }
 0x536   : > { %v3326_v27 = vadd.f32 %v3324_v26, %v3317_v61  ;;  %v5124_v61 = vld [vmem:[%s7854_s2 + $0x5c8] sm:$0xff]  ;;  %v5141_v26 = vld [vmem:[%s7854_s2 + $0x650] sm:$0xff] }
 0x538   : > { %v3333_v22 = vadd.f32 %v6903_v5, %v3326_v27  ;;  %v5142_v27 = vld [vmem:[%s7854_s2 + $0x658] sm:$0xff] }
 0x53a   : > { %3334 = vst.msk [vmem:[%s7416_s23] sm:$0x1] %vm7962_vm7, %v3333_v22  ;;  %3340 = vrot.lane.b32.xlu0 %v3333_v22, %s7939_s14  ;;  %3336 = vrot.lane.b32.xlu1 %v3333_v22, %s7940_s29  ;;  %vm7972_vm7 = vcmask 908288  }
 0x53e   : > { %3348 = vrot.lane.b32.xlu0 %v3333_v22, %s7941_s15  ;;  %3344 = vrot.lane.b32.xlu1 %v3333_v22, %s7963_s28 }
 0x542   : > { %3356 = vrot.lane.b32.xlu0 %v3333_v22, %s7930_s26  ;;  %3352 = vrot.lane.b32.xlu1 %v3333_v22, %s7942_s16 }
 0x546   : > { %3364 = vrot.lane.b32.xlu0 %v3333_v22, %s7943_s11  ;;  %3360 = vrot.lane.b32.xlu1 %v3333_v22, %s7944_s21  ;;  %s7980_s21 = smov 99  }
 0x586   : > { %v7429_v31 = vpop.f32.mrb[90].mxu0 }
 0x587   : > { %v3652_v5 = vrot.slane %v7429_v31, 2  ;;  %v3647_v3 = vrot.slane %v7429_v31, 1  ;;  %v3637_v34 = vpop.f32.mrb[91].mxu0  ;;  %v3663_v7 = vrot.slane %v7429_v31, 4  ;;  %v3657_v58 = vrot.slane %v7429_v31, 3 }
 0x588   : > { %v3664_v35 = vrot.slane %v3637_v34, 4  ;;  %v3672_v9 = vrot.slane %v7429_v31, 5  ;;  %v3673_v36 = vrot.slane %v3637_v34, 5  ;;  %v3681_v38 = vrot.slane %v7429_v31, 6 }
 0x589   : > { %3653 = vrot.lane.b32.xlu0 %v3652_v5, %s7945_s19  ;;  %3648 = vrot.lane.b32.xlu1 %v3647_v3, %s7946_s25  ;;  %v3682_v1 = vrot.slane %v3637_v34, 6  ;;  %v3690_v49 = vrot.slane %v7429_v31, 7  ;;  %v3691_v18 = vrot.slane %v3637_v34, 7  ;;  %v5866_v3 = vld [vmem:[%s6321_s12 + $0x8] sm:$0xff] }
 0x58a   : > { %v7435_v40 = vpop.f32.mrb[92].mxu0 }
 0x58b   : > { %v7439_v33 = vpop.f32.mrb[93].mxu0  ;;  %v3708_v28 = vrot.slane %v7435_v40, 1  ;;  %v3717_v29 = vrot.slane %v7435_v40, 2  ;;  %v3726_v42 = vrot.slane %v7435_v40, 3  ;;  %v3735_v54 = vrot.slane %v7435_v40, 4 }
 0x58c   : > { %v3709_v45 = vrot.slane %v7439_v33, 1  ;;  %v3718_v4 = vrot.slane %v7439_v33, 2  ;;  %v3727_v55 = vrot.slane %v7439_v33, 3  ;;  %v3744_v10 = vrot.slane %v7435_v40, 5 }
 0x58d   : > { %3665 = vrot.lane.b32.xlu0 %v3663_v7, %s7964_s0  ;;  %3658 = vrot.lane.b32.xlu1 %v3657_v58, %s7965_s17  ;;  %v3736_v11 = vrot.slane %v7439_v33, 4  ;;  %v3753_v22 = vrot.slane %v7435_v40, 6  ;;  %v3745_v5 = vrot.slane %v7439_v33, 5  ;;  %v5746_v58 = vpack.c.bf16 %v5142_v27, %v5141_v26 }
 0x591   : > { %3674 = vrot.lane.b32.xlu0 %v3672_v9, %s7963_s28  ;;  %3667 = vrot.lane.b32.xlu1 %v3664_v35, %s7964_s0  ;;  %v5125_v35 = vld [vmem:[%s7854_s2 + $0x5d0] sm:$0xff]  ;;  %v5126_v9 = vld [vmem:[%s7854_s2 + $0x5d8] sm:$0xff] }
 0x595   : > { %3683 = vrot.lane.b32.xlu0 %v3681_v38, %s7966_s9  ;;  %3676 = vrot.lane.b32.xlu1 %v3673_v36, %s7963_s28  ;;  %v5143_v36 = vld [vmem:[%s7854_s2 + $0x660] sm:$0xff]  ;;  %v5144_v38 = vld [vmem:[%s7854_s2 + $0x668] sm:$0xff] }
 0x599   : > { %3692 = vrot.lane.b32.xlu0 %v3690_v49, %s7967_s4  ;;  %3685 = vrot.lane.b32.xlu1 %v3682_v1, %s7966_s9  ;;  %v5748_v1 = vpack.c.bf16 %v5126_v9, %v5125_v35  ;;  %v3762_v49 = vrot.slane %v7435_v40, 7 }
 0x59d   : > { %3701 = vrot.lane.b32.xlu0 %v7435_v40, %s7968_s5  ;;  %3694 = vrot.lane.b32.xlu1 %v3691_v18, %s7967_s4  ;;  %v3754_v18 = vrot.slane %v7439_v33, 6  ;;  %v5145_v40 = vld [vmem:[%s7854_s2 + $0x670] sm:$0xff] }
 0x5a1   : > { %3710 = vrot.lane.b32.xlu0 %v3708_v28, %s7947_s10  ;;  %3703 = vrot.lane.b32.xlu1 %v7439_v33, %s7968_s5 }
 0x5a5   : > { %3719 = vrot.lane.b32.xlu0 %v3717_v29, %s7930_s26  ;;  %3712 = vrot.lane.b32.xlu1 %v3709_v45, %s7947_s10  ;;  %v5750_v45 = vpack.c.bf16 %v5144_v38, %v5143_v36 }
 0x5a6   : > { %v5372_v21 = vpop.f32.mrb[94].mxu0 }
 0x5a7   : > { %v5373_v41 = vpop.f32.mrb[95].mxu0 }
 0x5a8   : > { %v5374_v17 = vadd.f32 %v5373_v41, %v5372_v21  ;;  %v5127_v21 = vld [vmem:[%s7854_s2 + $0x5e0] sm:$0xff]  ;;  %v5128_v41 = vld [vmem:[%s7854_s2 + $0x5e8] sm:$0xff] }
 0x5a9   : > { %3728 = vrot.lane.b32.xlu0 %v3726_v42, %s7948_s1  ;;  %3721 = vrot.lane.b32.xlu1 %v3718_v4, %s7930_s26  ;;  %v5146_v42 = vld [vmem:[%s7854_s2 + $0x678] sm:$0xff]  ;;  %v5752_v4 = vpack.c.bf16 %v5128_v41, %v5127_v21 }
 0x5aa   : > { %v3924_v52 = vadd.f32 %v5374_v17, %v5114_v43  ;;  %v5375_v53 = vpop.f32.mrb[96].mxu0  ;;  %v5754_v17 = vpack.c.bf16 %v5146_v42, %v5145_v40 }
 0x5ab   : > { %v5376_v60 = vpop.f32.mrb[97].mxu0 }
 0x5ac   : > { %v3999_v8 = vadd.f32 %v7399_v47, %v3924_v52  ;;  %v3341_v50 = vpop.permute.xlu0 %3340  ;;  %v3337_v24 = vpop.permute.xlu1 %3336  ;;  %v5377_v19 = vadd.f32 %v5376_v60, %v5375_v53  ;;  %v5139_v47 = vld [vmem:[%s7854_s2 + $0x640] sm:$0xff] }
 0x5ad   : > { %3737 = vrot.lane.b32.xlu0 %v3735_v54, %s7949_s6  ;;  %3730 = vrot.lane.b32.xlu1 %v3727_v55, %s7948_s1  ;;  %3339 = vst.msk [vmem:[%s7416_s23] sm:$0x1] %vm7969_vm8, %v3337_v24  ;;  %v5742_v62 = vpack.c.bf16 %v5140_v59, %v5139_v47  ;;  %v5131_v53 = vld [vmem:[%s7854_s2 + $0x600] sm:$0xff]  ;;  %vm7973_vm8 = vcmask 809984  }
 0x5ae   : > { %5117 = vmatmul.mubr.msk.f32.vlgmr.msra.gmra.mrb[92].mxu1 %vm7970_vm10, %v3999_v8  ;;  %3343 = vst.msk [vmem:[%s7416_s23] sm:$0x1] %vm2455_vm9, %v3341_v50  ;;  %v3929_v37 = vadd.f32 %v5377_v19, %v5114_v43  ;;  %v3763_v43 = vrot.slane %v7439_v33, 7  ;;  %v5148_v33 = vld [vmem:[%s7854_s2 + $0x688] sm:$0xff]  ;;  %v5149_v54 = vld [vmem:[%s7854_s2 + $0x690] sm:$0xff]  ;;  %v5150_v55 = vld [vmem:[%s7854_s2 + $0x698] sm:$0xff] }
 0x5af   : > { %5737 = vmatpush3.bf16.msra.mxu1 %v5736_v48  ;;  %4083 = vmatprep.mubr.f32.mxu1 %v5884_v23  ;;  %v5758_v52 = vpack.c.bf16 %v5148_v33, %v5147_v63  ;;  %v5132_v48 = vld [vmem:[%s7854_s2 + $0x608] sm:$0xff]  ;;  %v5762_v8 = vpack.c.bf16 %v5150_v55, %v5149_v54  ;;  %v5133_v50 = vld [vmem:[%s7854_s2 + $0x610] sm:$0xff]  ;;  %v5134_v24 = vld [vmem:[%s7854_s2 + $0x618] sm:$0xff]  ;;  %vm7974_vm10 = vcmask 801792  }
 0x5b0   : > { %5739 = vmatprep.subr.bf16.mxu1 %v5738_v39  ;;  %v3349_v57 = vpop.permute.xlu0 %3348  ;;  %v3345_v20 = vpop.permute.xlu1 %3344  ;;  %v4004_v25 = vadd.f32 %v7397_v2, %v3929_v37  ;;  %v5744_v2 = vpack.c.bf16 %v5124_v61, %v5123_v15  ;;  %v5760_v60 = vpack.c.bf16 %v5132_v48, %v5131_v53  ;;  %v5764_v39 = vpack.c.bf16 %v5134_v24, %v5133_v50 }
 0x5b1   : > { %3746 = vrot.lane.b32.xlu0 %v3744_v10, %s7932_s30  ;;  %3739 = vrot.lane.b32.xlu1 %v3736_v11, %s7949_s6  ;;  %3347 = vst.msk [vmem:[%s7416_s23] sm:$0x1] %vm2460_vm0, %v3345_v20 }
 0x5b2   : > { %3351 = vst.msk [vmem:[%s7416_s23] sm:$0x1] %vm2465_vm1, %v3349_v57  ;;  %5118 = vmatmul.mubr.msk.f32.gmra.mrb[94].mxu1 %vm7971_vm11, %v4004_v25  ;;  %vm7975_vm11 = vcmask 793600  }
 0x5b3   : > { %5741 = vmatpush3.bf16.msra.mxu1 %v5740_v6  ;;  %4365 = vmatprep.mubr.f32.mxu1 %v5866_v3 }
 0x5b4   : > { %5743 = vmatprep.subr.bf16.mxu1 %v5742_v62  ;;  %v3357_v34 = vpop.permute.xlu0 %3356  ;;  %v3353_v7 = vpop.permute.xlu1 %3352 }
 0x5b5   : > { %3755 = vrot.lane.b32.xlu0 %v3753_v22, %s7933_s13  ;;  %3748 = vrot.lane.b32.xlu1 %v3745_v5, %s7932_s30  ;;  %3355 = vst.msk [vmem:[%s7416_s23] sm:$0x1] %vm2470_vm15, %v3353_v7 }
 0x5b6   : > { %3359 = vst.msk [vmem:[%s7416_s23] sm:$0x1] %vm2475_vm14, %v3357_v34 }
 0x5b7   : > { %5745 = vmatpush3.bf16.msra.mxu1 %v5744_v2 }
 0x5b8   : > { %5747 = vmatprep.subr.bf16.mxu1 %v5746_v58  ;;  %v3365_v28 = vpop.permute.xlu0 %3364  ;;  %v3361_v29 = vpop.permute.xlu1 %3360 }
 0x5b9   : > { %3764 = vrot.lane.b32.xlu0 %v3762_v49, %s7934_s22  ;;  %3757 = vrot.lane.b32.xlu1 %v3754_v18, %s7933_s13  ;;  %3363 = vst.msk [vmem:[%s7416_s23] sm:$0x1] %vm2480_vm13, %v3361_v29 }
 0x5ba   : > { %3367 = vst.msk [vmem:[%s7416_s23] sm:$0x1] %vm2485_vm2, %v3365_v28 }
 0x5bb   : > { %5749 = vmatpush3.bf16.msra.mxu1 %v5748_v1 }
 0x5bc   : > { %5751 = vmatprep.subr.bf16.mxu1 %v5750_v45  ;;  %v7611_v45 = vpop.f32.mrb[98].mxu0 }
 0x5bd   : > { %3766 = vrot.lane.b32.xlu1 %v3763_v43, %s7934_s22  ;;  %v7613_v41 = vpop.f32.mrb[99].mxu0 }
 0x5bf   : > { %5753 = vmatpush3.bf16.msra.mxu1 %v5752_v4 }
 0x5c0   : > { %5755 = vmatprep.subr.bf16.mxu1 %v5754_v17 }
 0x5c3   : > { %5757 = vmatpush3.bf16.msra.mxu1 %v5756_v44 }
 0x5c4   : > { %5759 = vmatprep.subr.bf16.mxu1 %v5758_v52 }
 0x5c7   : > { %5761 = vmatpush3.bf16.msra.mxu1 %v5760_v60 }
 0x5c8   : > { %5763 = vmatprep.subr.bf16.mxu1 %v5762_v8 }
 0x5cb   : > { %5765 = vmatpush3.bf16.msra.mxu1 %v5764_v39 }
 0x5ce   : > { %4366 = vmatmul.mubr.f32.vlgmr.msra.gmra.mrb[96].mxu1 %v7115_v51 }
 0x5cf   : > { %4370 = vmatprep.mubr.f32.mxu1 %v7119_v46 }
 0x5d2   : > { %4371 = vmatmul.mubr.f32.gmra.mrb[98].mxu1 %v7127_v56 }
 0x5fb   : > { %v3654_v0 = vpop.permute.xlu0 %3653  ;;  %v3649_v12 = vpop.permute.xlu1 %3648 }
 0x5fc   : > { %v3651_v15 = vadd.f32 %v3649_v12, %v7429_v31 }
 0x5fe   : > { %v3656_v25 = vadd.f32 %v3654_v0, %v3651_v15 }
 0x5ff   : > { %v3666_v19 = vpop.permute.xlu0 %3665  ;;  %v3659_v47 = vpop.permute.xlu1 %3658 }
 0x600   : > { %v3661_v27 = vadd.f32 %v3659_v47, %v3656_v25 }
 0x603   : > { %v3675_v59 = vpop.permute.xlu0 %3674  ;;  %v3668_v37 = vpop.permute.xlu1 %3667 }
 0x604   : > { %v3669_v56 = vsel %vm882_vm3, %v3666_v19, %v3668_v37 }
 0x605   : > { %v3671_v22 = vadd.f32 %v3669_v56, %v3661_v27 }
 0x607   : > { %v3684_v6 = vpop.permute.xlu0 %3683  ;;  %v3677_v10 = vpop.permute.xlu1 %3676 }
 0x608   : > { %v3678_v2 = vsel %vm1059_vm4, %v3675_v59, %v3677_v10 }
 0x609   : > { %v3680_v7 = vadd.f32 %v3678_v2, %v3671_v22 }
 0x60b   : > { %v3693_v11 = vpop.permute.xlu0 %3692  ;;  %v3686_v57 = vpop.permute.xlu1 %3685 }
 0x60c   : > { %v3687_v34 = vsel %vm1236_vm5, %v3684_v6, %v3686_v57 }
 0x60d   : > { %v3689_v35 = vadd.f32 %v3687_v34, %v3680_v7 }
 0x60f   : > { %v3702_v20 = vpop.permute.xlu0 %3701  ;;  %v3695_v62 = vpop.permute.xlu1 %3694 }
 0x610   : > { %v3696_v58 = vsel %vm7972_vm7, %v3693_v11, %v3695_v62  ;;  %vm7976_vm7 = vcmask 695296  }
 0x611   : > { %v3698_v38 = vadd.f32 %v3696_v58, %v3689_v35 }
 0x613   : > { %v3711_v61 = vpop.permute.xlu0 %3710  ;;  %v3704_v51 = vpop.permute.xlu1 %3703 }
 0x614   : > { %v3705_v36 = vsel %vm1413_vm6, %v3702_v20, %v3704_v51 }
 0x615   : > { %v3707_v49 = vadd.f32 %v3705_v36, %v3698_v38 }
 0x617   : > { %v3720_v46 = vpop.permute.xlu0 %3719  ;;  %v3713_v26 = vpop.permute.xlu1 %3712 }
 0x618   : > { %v3714_v1 = vsel %vm7973_vm8, %v3711_v61, %v3713_v26  ;;  %vm7977_vm8 = vcmask 687104   ;;  %v5156_v26 = vld [vmem:[%s7855_s3 + $0x5] ss:$0 sm:$0xff] }
 0x619   : > { %v3716_v21 = vadd.f32 %v3714_v1, %v3707_v49 }
 0x61b   : > { %v3729_v5 = vpop.permute.xlu0 %3728  ;;  %v3722_v3 = vpop.permute.xlu1 %3721 }
 0x61c   : > { %v3723_v29 = vsel %vm7974_vm10, %v3720_v46, %v3722_v3  ;;  %vm7978_vm10 = vcmask 678912  }
 0x61d   : > { %v3725_v42 = vadd.f32 %v3723_v29, %v3716_v21 }
 0x61f   : > { %v3738_v31 = vpop.permute.xlu0 %3737  ;;  %v3731_v9 = vpop.permute.xlu1 %3730 }
 0x620   : > { %v3732_v40 = vsel %vm7975_vm11, %v3729_v5, %v3731_v9  ;;  %vm7979_vm11 = vcmask 65536  }
 0x621   : > { %v3734_v17 = vadd.f32 %v3732_v40, %v3725_v42 }
 0x623   : > { %v3747_v18 = vpop.permute.xlu0 %3746  ;;  %v3740_v28 = vpop.permute.xlu1 %3739 }
 0x624   : > { %v3741_v43 = vsel %vm2410_vm12, %v3738_v31, %v3740_v28 }
 0x625   : > { %v3743_v63 = vadd.f32 %v3741_v43, %v3734_v17 }
 0x627   : > { %v3749_v4 = vpop.permute.xlu1 %3748  ;;  %v3756_v32 = vpop.permute.xlu0 %3755 }
 0x628   : > { %v3750_v30 = vsel %vm7976_vm7, %v3747_v18, %v3749_v4  ;;  %vm7981_vm7 = vcmask 139336  }
 0x629   : > { %v3752_v52 = vadd.f32 %v3750_v30, %v3743_v63 }
 0x62b   : > { %v3758_v33 = vpop.permute.xlu1 %3757  ;;  %v3765_v53 = vpop.permute.xlu0 %3764 }
 0x62c   : > { %v3759_v44 = vsel %vm7977_vm8, %v3756_v32, %v3758_v33  ;;  %vm7982_vm8 = vcmask 261120  }
 0x62d   : > { %v3761_v48 = vadd.f32 %v3759_v44, %v3752_v52 }
 0x62f   : > { %v3767_v54 = vpop.permute.xlu1 %3766 }
 0x630   : > { %v3768_v55 = vsel %vm7978_vm10, %v3765_v53, %v3767_v54  ;;  %vm7983_vm10 = vmmov %vm7982_vm8 }
 0x631   : > { %v3770_v60 = vadd.f32 %v3768_v55, %v3761_v48 }
 0x633   : > { %v7621_v8 = vadd.f32 %v6913_v13, %v3770_v60 }
 0x635   : > { %3778 = vst.msk [vmem:[%s7416_s23 + $0x1] sm:$0x1] %vm7979_vm11, %v7621_v8  ;;  %3784 = vrot.lane.b32.xlu0 %v7621_v8, %s7939_s14  ;;  %3780 = vrot.lane.b32.xlu1 %v7621_v8, %s7940_s29  ;;  %vm7984_vm11 = vcmask 908288  }
 0x639   : > { %3792 = vrot.lane.b32.xlu0 %v7621_v8, %s7941_s15  ;;  %3788 = vrot.lane.b32.xlu1 %v7621_v8, %s7963_s28 }
 0x63d   : > { %3796 = vrot.lane.b32.xlu1 %v7621_v8, %s7942_s16 }
 0x681   : > { %v7636_v13 = vpop.f32.mrb[92].mxu1 }
 0x682   : > { %v4081_v50 = vpop.f32.mrb[93].mxu1  ;;  %v4091_v24 = vrot.slane %v7636_v13, 1  ;;  %v4096_v12 = vrot.slane %v7636_v13, 2  ;;  %v4101_v59 = vrot.slane %v7636_v13, 3  ;;  %v4107_v6 = vrot.slane %v7636_v13, 4 }
 0x683   : > { %v4108_v39 = vrot.slane %v4081_v50, 4  ;;  %v4117_v47 = vrot.slane %v4081_v50, 5  ;;  %v4126_v37 = vrot.slane %v4081_v50, 6  ;;  %v4135_v10 = vrot.slane %v4081_v50, 7 }
 0x684   : > { %4092 = vrot.lane.b32.xlu0 %v4091_v24, %s7946_s25  ;;  %v4116_v11 = vrot.slane %v7636_v13, 5  ;;  %v4125_v57 = vrot.slane %v7636_v13, 6  ;;  %v4134_v62 = vrot.slane %v7636_v13, 7 }
 0x685   : > { %4111 = vrot.lane.b32.xlu1 %v4108_v39, %s7964_s0  ;;  %v7641_v0 = vpop.f32.mrb[94].mxu1 }
 0x686   : > { %v7644_v19 = vpop.f32.mrb[95].mxu1  ;;  %v4152_v46 = vrot.slane %v7641_v0, 1  ;;  %v4161_v5 = vrot.slane %v7641_v0, 2  ;;  %v4170_v36 = vrot.slane %v7641_v0, 3  ;;  %v4179_v28 = vrot.slane %v7641_v0, 4 }
 0x687   : > { %v4153_v20 = vrot.slane %v7644_v19, 1  ;;  %v4162_v15 = vrot.slane %v7644_v19, 2  ;;  %v4171_v61 = vrot.slane %v7644_v19, 3  ;;  %v4180_v27 = vrot.slane %v7644_v19, 4 }
 0x688   : > { %4097 = vrot.lane.b32.xlu0 %v4096_v12, %s7945_s19  ;;  %v4189_v35 = vrot.slane %v7644_v19, 5  ;;  %v4198_v49 = vrot.slane %v7644_v19, 6  ;;  %v4197_v21 = vrot.slane %v7641_v0, 6 }
 0x689   : > { %4120 = vrot.lane.b32.xlu1 %v4117_v47, %s7963_s28 }
 0x68c   : > { %4102 = vrot.lane.b32.xlu0 %v4101_v59, %s7965_s17 }
 0x68d   : > { %4129 = vrot.lane.b32.xlu1 %v4126_v37, %s7966_s9 }
 0x690   : > { %4109 = vrot.lane.b32.xlu0 %v4107_v6, %s7964_s0 }
 0x691   : > { %4138 = vrot.lane.b32.xlu1 %v4135_v10, %s7967_s4 }
 0x694   : > { %4118 = vrot.lane.b32.xlu0 %v4116_v11, %s7963_s28 }
 0x695   : > { %4147 = vrot.lane.b32.xlu1 %v7644_v19, %s7968_s5 }
 0x698   : > { %4127 = vrot.lane.b32.xlu0 %v4125_v57, %s7966_s9 }
 0x699   : > { %4156 = vrot.lane.b32.xlu1 %v4153_v20, %s7980_s21 }
 0x69c   : > { %4136 = vrot.lane.b32.xlu0 %v4134_v62, %s7967_s4 }
 0x69d   : > { %4165 = vrot.lane.b32.xlu1 %v4162_v15, %s7930_s26 }
 0x6a0   : > { %4145 = vrot.lane.b32.xlu0 %v7641_v0, %s7968_s5 }
 0x6a1   : > { %v5416_v51 = vpop.f32.mrb[96].mxu1  ;;  %4174 = vrot.lane.b32.xlu1 %v4171_v61, %s7948_s1 }
 0x6a2   : > { %v5417_v25 = vpop.f32.mrb[97].mxu1 }
 0x6a3   : > { %v5418_v56 = vadd.f32 %v5417_v25, %v5416_v51 }
 0x6a4   : > { %4154 = vrot.lane.b32.xlu0 %v4152_v46, %s7980_s21 }
 0x6a5   : > { %v4368_v2 = vadd.f32 %v5418_v56, %v5156_v26  ;;  %4183 = vrot.lane.b32.xlu1 %v4180_v27, %s7949_s6  ;;  %v5419_v22 = vpop.f32.mrb[98].mxu1 }
 0x6a6   : > { %v5420_v3 = vpop.f32.mrb[99].mxu1 }
 0x6a7   : > { %v4443_v34 = vadd.f32 %v7613_v41, %v4368_v2  ;;  %v3785_v7 = vpop.permute.xlu0 %3784  ;;  %v3781_v58 = vpop.permute.xlu1 %3780  ;;  %v5421_v31 = vadd.f32 %v5420_v3, %v5419_v22  ;;  %v4206_v41 = vrot.slane %v7641_v0, 7 }
 0x6a8   : > { %4163 = vrot.lane.b32.xlu0 %v4161_v5, %s7930_s26  ;;  %3783 = vst.msk [vmem:[%s7416_s23 + $0x1] sm:$0x1] %vm7981_vm7, %v3781_v58  ;;  %vm7985_vm7 = vcmask 809984  }
 0x6a9   : > { %5159 = vmatmul.mubr.msk.f32.vlgmr.msra.gmra.mrb[100].mxu0 %vm7982_vm8, %v4443_v34  ;;  %3787 = vst.msk [vmem:[%s7416_s23 + $0x1] sm:$0x1] %vm2455_vm9, %v3785_v7  ;;  %4192 = vrot.lane.b32.xlu1 %v4189_v35, %s7932_s30  ;;  %v4373_v9 = vadd.f32 %v5421_v31, %v5156_v26  ;;  %vm7986_vm8 = vcmask 801792  }
 0x6aa   : > { %4527 = vmatprep.mubr.f32.mxu0 %v5884_v23  ;;  %v4207_v23 = vrot.slane %v7644_v19, 7 }
 0x6ab   : > { %v3793_v38 = vpop.permute.xlu0 %3792  ;;  %v3789_v1 = vpop.permute.xlu1 %3788  ;;  %v4448_v18 = vadd.f32 %v7611_v45, %v4373_v9  ;;  %v4188_v45 = vrot.slane %v7641_v0, 5 }
 0x6ac   : > { %4172 = vrot.lane.b32.xlu0 %v4170_v36, %s7948_s1  ;;  %3791 = vst.msk [vmem:[%s7416_s23 + $0x1] sm:$0x1] %vm2460_vm0, %v3789_v1 }
 0x6ad   : > { %3795 = vst.msk [vmem:[%s7416_s23 + $0x1] sm:$0x1] %vm2465_vm1, %v3793_v38  ;;  %4201 = vrot.lane.b32.xlu1 %v4198_v49, %s7933_s13  ;;  %5160 = vmatmul.mubr.msk.f32.gmra.mrb[102].mxu0 %vm7983_vm10, %v4448_v18  ;;  %vm7987_vm10 = vcmask 793600  }
 0x6af   : > { %v3797_v29 = vpop.permute.xlu1 %3796 }
 0x6b0   : > { %4181 = vrot.lane.b32.xlu0 %v4179_v28, %s7949_s6  ;;  %3799 = vst.msk [vmem:[%s7416_s23 + $0x1] sm:$0x1] %vm2470_vm15, %v3797_v29 }
 0x6b1   : > { %4210 = vrot.lane.b32.xlu1 %v4207_v23, %s7934_s22 }
 0x6b4   : > { %4190 = vrot.lane.b32.xlu0 %v4188_v45, %s7932_s30 }
 0x6b8   : > { %4199 = vrot.lane.b32.xlu0 %v4197_v21, %s7933_s13 }
 0x6bc   : > { %4208 = vrot.lane.b32.xlu0 %v4206_v41, %s7934_s22 }
 0x6f6   : > { %v4093_v40 = vpop.permute.xlu0 %4092 }
 0x6f7   : > { %v4112_v42 = vpop.permute.xlu1 %4111  ;;  %v4095_v60 = vadd.f32 %v4093_v40, %v7636_v13 }
 0x6fa   : > { %v4098_v4 = vpop.permute.xlu0 %4097 }
 0x6fb   : > { %v4121_v43 = vpop.permute.xlu1 %4120  ;;  %v4100_v50 = vadd.f32 %v4098_v4, %v4095_v60 }
 0x6fe   : > { %v4103_v17 = vpop.permute.xlu0 %4102 }
 0x6ff   : > { %v4130_v32 = vpop.permute.xlu1 %4129  ;;  %v4105_v12 = vadd.f32 %v4103_v17, %v4100_v50 }
 0x702   : > { %v4110_v30 = vpop.permute.xlu0 %4109 }
 0x703   : > { %v4139_v63 = vpop.permute.xlu1 %4138  ;;  %v4113_v0 = vsel %vm882_vm3, %v4110_v30, %v4112_v42 }
 0x704   : > { %v4115_v47 = vadd.f32 %v4113_v0, %v4105_v12 }
 0x706   : > { %v4119_v33 = vpop.permute.xlu0 %4118 }
 0x707   : > { %v4148_v44 = vpop.permute.xlu1 %4147  ;;  %v4122_v19 = vsel %vm1059_vm4, %v4119_v33, %v4121_v43 }
 0x708   : > { %v4124_v6 = vadd.f32 %v4122_v19, %v4115_v47 }
 0x70a   : > { %v4128_v52 = vpop.permute.xlu0 %4127 }
 0x70b   : > { %v4157_v53 = vpop.permute.xlu1 %4156  ;;  %v4131_v37 = vsel %vm1236_vm5, %v4128_v52, %v4130_v32 }
 0x70c   : > { %v4133_v57 = vadd.f32 %v4131_v37, %v4124_v6 }
 0x70e   : > { %v4137_v48 = vpop.permute.xlu0 %4136 }
 0x70f   : > { %v4166_v54 = vpop.permute.xlu1 %4165  ;;  %v4140_v11 = vsel %vm7984_vm11, %v4137_v48, %v4139_v63  ;;  %vm7988_vm11 = vcmask 695296  }
 0x710   : > { %v4142_v62 = vadd.f32 %v4140_v11, %v4133_v57 }
 0x712   : > { %v4146_v55 = vpop.permute.xlu0 %4145 }
 0x713   : > { %v4175_v24 = vpop.permute.xlu1 %4174  ;;  %v4149_v13 = vsel %vm1413_vm6, %v4146_v55, %v4148_v44 }
 0x714   : > { %v4151_v61 = vadd.f32 %v4149_v13, %v4142_v62 }
 0x716   : > { %v4155_v39 = vpop.permute.xlu0 %4154 }
 0x717   : > { %v4184_v10 = vpop.permute.xlu1 %4183  ;;  %v4158_v15 = vsel %vm7985_vm7, %v4155_v39, %v4157_v53  ;;  %vm7989_vm7 = vcmask 687104  }
 0x718   : > { %v4160_v26 = vadd.f32 %v4158_v15, %v4151_v61 }
 0x71a   : > { %v4164_v59 = vpop.permute.xlu0 %4163 }
 0x71b   : > { %v4193_v51 = vpop.permute.xlu1 %4192  ;;  %v4167_v46 = vsel %vm7986_vm8, %v4164_v59, %v4166_v54  ;;  %vm7990_vm8 = vcmask 678912  }
 0x71c   : > { %v4169_v27 = vadd.f32 %v4167_v46, %v4160_v26 }
 0x71e   : > { %v4173_v20 = vpop.permute.xlu0 %4172 }
 0x71f   : > { %v4176_v56 = vsel %vm7987_vm10, %v4173_v20, %v4175_v24  ;;  %v4202_v3 = vpop.permute.xlu1 %4201  ;;  %vm7991_vm10 = vcmask 65536  }
 0x720   : > { %v4178_v5 = vadd.f32 %v4176_v56, %v4169_v27 }
 0x722   : > { %v4182_v25 = vpop.permute.xlu0 %4181 }
 0x723   : > { %v4185_v22 = vsel %vm2410_vm12, %v4182_v25, %v4184_v10  ;;  %v4211_v9 = vpop.permute.xlu1 %4210 }
 0x724   : > { %v4187_v7 = vadd.f32 %v4185_v22, %v4178_v5 }
 0x726   : > { %v4191_v2 = vpop.permute.xlu0 %4190 }
 0x727   : > { %v4194_v34 = vsel %vm7988_vm11, %v4191_v2, %v4193_v51  ;;  %vm7994_vm11 = vcmask 908288  }
 0x728   : > { %v4196_v31 = vadd.f32 %v4194_v34, %v4187_v7 }
 0x72a   : > { %v4200_v58 = vpop.permute.xlu0 %4199 }
 0x72b   : > { %v4203_v35 = vsel %vm7989_vm7, %v4200_v58, %v4202_v3  ;;  %vm7996_vm7 = vcmask 801792  }
 0x72c   : > { %v4205_v36 = vadd.f32 %v4203_v35, %v4196_v31 }
 0x72e   : > { %v4209_v38 = vpop.permute.xlu0 %4208 }
 0x72f   : > { %v4212_v1 = vsel %vm7990_vm8, %v4209_v38, %v4211_v9  ;;  %vm8000_vm8 = vcmask 687104  }
 0x730   : > { %v4214_v49 = vadd.f32 %v4212_v1, %v4205_v36 }
 0x732   : > { %v7724_v18 = vadd.f32 %v6917_v16, %v4214_v49 }
 0x734   : > { %4222 = vst.msk [vmem:[%s7416_s23 + $0x2] sm:$0x1] %vm7991_vm10, %v7724_v18 }
 0x77c   : > { %v7729_v28 = vpop.f32.mrb[100].mxu0 }
 0x77d   : > { %v4551_v29 = vrot.slane %v7729_v28, 4  ;;  %v4535_v23 = vrot.slane %v7729_v28, 1  ;;  %v4525_v45 = vpop.f32.mrb[101].mxu0  ;;  %v4560_v41 = vrot.slane %v7729_v28, 5  ;;  %v4540_v16 = vrot.slane %v7729_v28, 2 }
 0x77e   : > { %v4569_v42 = vrot.slane %v7729_v28, 6  ;;  %v4545_v4 = vrot.slane %v7729_v28, 3  ;;  %v4552_v43 = vrot.slane %v4525_v45, 4  ;;  %v4578_v17 = vrot.slane %v7729_v28, 7 }
 0x77f   : > { %4553 = vrot.lane.b32.xlu0 %v4551_v29, %s7964_s0  ;;  %4536 = vrot.lane.b32.xlu1 %v4535_v23, %s7946_s25  ;;  %v4561_v32 = vrot.slane %v4525_v45, 5  ;;  %v4570_v30 = vrot.slane %v4525_v45, 6  ;;  %v4579_v33 = vrot.slane %v4525_v45, 7  ;;  %s7993_s25 = smov 88  }
 0x780   : > { %v4529_v21 = vpop.f32.mrb[102].mxu0 }
 0x781   : > { %v4531_v40 = vpop.f32.mrb[103].mxu0  ;;  %v4596_v63 = vrot.slane %v4529_v21, 1  ;;  %v4605_v44 = vrot.slane %v4529_v21, 2  ;;  %v4614_v52 = vrot.slane %v4529_v21, 3  ;;  %v4623_v53 = vrot.slane %v4529_v21, 4 }
 0x782   : > { %v4632_v48 = vrot.slane %v4529_v21, 5  ;;  %v4641_v54 = vrot.slane %v4529_v21, 6  ;;  %v4597_v55 = vrot.slane %v4531_v40, 1  ;;  %v4633_v60 = vrot.slane %v4531_v40, 5 }
 0x783   : > { %4562 = vrot.lane.b32.xlu0 %v4560_v41, %s7963_s28  ;;  %4541 = vrot.lane.b32.xlu1 %v4540_v16, %s7945_s19  ;;  %v4606_v50 = vrot.slane %v4531_v40, 2  ;;  %v4650_v24 = vrot.slane %v4529_v21, 7  ;;  %v4615_v39 = vrot.slane %v4531_v40, 3  ;;  %v4624_v0 = vrot.slane %v4531_v40, 4 }
 0x784   : > { %v4642_v12 = vrot.slane %v4531_v40, 6  ;;  %v4651_v19 = vrot.slane %v4531_v40, 7 }
 0x787   : > { %4571 = vrot.lane.b32.xlu0 %v4569_v42, %s7966_s9  ;;  %4546 = vrot.lane.b32.xlu1 %v4545_v4, %s7965_s17 }
 0x78b   : > { %4580 = vrot.lane.b32.xlu0 %v4578_v17, %s7967_s4  ;;  %4555 = vrot.lane.b32.xlu1 %v4552_v43, %s7964_s0 }
 0x78f   : > { %4589 = vrot.lane.b32.xlu0 %v4529_v21, %s7968_s5  ;;  %4564 = vrot.lane.b32.xlu1 %v4561_v32, %s7963_s28 }
 0x793   : > { %4598 = vrot.lane.b32.xlu0 %v4596_v63, %s7980_s21  ;;  %4573 = vrot.lane.b32.xlu1 %v4570_v30, %s7966_s9 }
 0x797   : > { %4607 = vrot.lane.b32.xlu0 %v4605_v44, %s7930_s26  ;;  %4582 = vrot.lane.b32.xlu1 %v4579_v33, %s7967_s4 }
 0x79b   : > { %4616 = vrot.lane.b32.xlu0 %v4614_v52, %s7948_s1  ;;  %4591 = vrot.lane.b32.xlu1 %v4531_v40, %s7968_s5 }
 0x79f   : > { %4625 = vrot.lane.b32.xlu0 %v4623_v53, %s7949_s6  ;;  %4634 = vrot.lane.b32.xlu1 %v4632_v48, %s7932_s30 }
 0x7a3   : > { %4643 = vrot.lane.b32.xlu0 %v4641_v54, %s7933_s13  ;;  %4600 = vrot.lane.b32.xlu1 %v4597_v55, %s7980_s21 }
 0x7a7   : > { %4636 = vrot.lane.b32.xlu0 %v4633_v60, %s7932_s30  ;;  %4609 = vrot.lane.b32.xlu1 %v4606_v50, %s7930_s26 }
 0x7ab   : > { %4652 = vrot.lane.b32.xlu0 %v4650_v24, %s7934_s22  ;;  %4618 = vrot.lane.b32.xlu1 %v4615_v39, %s7948_s1  ;;  %s7992_s1 = smov 93  }
 0x7af   : > { %4627 = vrot.lane.b32.xlu1 %v4624_v0, %s7949_s6  ;;  %4224 = vrot.lane.b32.xlu0 %v7724_v18, %s7940_s29 }
 0x7b3   : > { %4645 = vrot.lane.b32.xlu1 %v4642_v12, %s7933_s13  ;;  %4228 = vrot.lane.b32.xlu0 %v7724_v18, %s7939_s14 }
 0x7b7   : > { %4654 = vrot.lane.b32.xlu1 %v4651_v19, %s7934_s22  ;;  %4232 = vrot.lane.b32.xlu0 %v7724_v18, %s7963_s28 }
 0x7bb   : > { %4244 = vrot.lane.b32.xlu1 %v7724_v18, %s7930_s26  ;;  %4236 = vrot.lane.b32.xlu0 %v7724_v18, %s7941_s15 }
 0x7bf   : > { %3804 = vrot.lane.b32.xlu1 %v7621_v8, %s7992_s1  ;;  %4240 = vrot.lane.b32.xlu0 %v7724_v18, %s7942_s16 }
 0x7c3   : > { %3800 = vrot.lane.b32.xlu0 %v7621_v8, %s7930_s26 }
 0x7c7   : > { %4248 = vrot.lane.b32.xlu0 %v7724_v18, %s7992_s1 }
 0x7cb   : > { %3808 = vrot.lane.b32.xlu0 %v7621_v8, %s7993_s25 }
 0x7f1   : > { %v4554_v47 = vpop.permute.xlu0 %4553  ;;  %v4537_v59 = vpop.permute.xlu1 %4536 }
 0x7f2   : > { %v4539_v46 = vadd.f32 %v4537_v59, %v7729_v28 }
 0x7f5   : > { %v4563_v37 = vpop.permute.xlu0 %4562  ;;  %v4542_v6 = vpop.permute.xlu1 %4541 }
 0x7f6   : > { %v4544_v27 = vadd.f32 %v4542_v6, %v4539_v46 }
 0x7f9   : > { %v4572_v10 = vpop.permute.xlu0 %4571  ;;  %v4547_v11 = vpop.permute.xlu1 %4546 }
 0x7fa   : > { %v4549_v2 = vadd.f32 %v4547_v11, %v4544_v27 }
 0x7fd   : > { %v4581_v57 = vpop.permute.xlu0 %4580  ;;  %v4556_v20 = vpop.permute.xlu1 %4555 }
 0x7fe   : > { %v4557_v8 = vsel %vm882_vm3, %v4554_v47, %v4556_v20  ;;  %vm7995_vm3 = vcmask 809984  }
 0x7ff   : > { %v4559_v34 = vadd.f32 %v4557_v8, %v4549_v2 }
 0x801   : > { %v4590_v13 = vpop.permute.xlu0 %4589  ;;  %v4565_v62 = vpop.permute.xlu1 %4564 }
 0x802   : > { %v4566_v3 = vsel %vm1059_vm4, %v4563_v37, %v4565_v62  ;;  %vm7997_vm4 = vcmask 793600  }
 0x803   : > { %v4568_v58 = vadd.f32 %v4566_v3, %v4559_v34 }
 0x805   : > { %v4599_v15 = vpop.permute.xlu0 %4598  ;;  %v4574_v61 = vpop.permute.xlu1 %4573 }
 0x806   : > { %v4575_v7 = vsel %vm1236_vm5, %v4572_v10, %v4574_v61  ;;  %vm7998_vm5 = vcmask 139336  }
 0x807   : > { %v4577_v36 = vadd.f32 %v4575_v7, %v4568_v58 }
 0x809   : > { %v4608_v51 = vpop.permute.xlu0 %4607  ;;  %v4583_v25 = vpop.permute.xlu1 %4582 }
 0x80a   : > { %v4584_v9 = vsel %vm7994_vm11, %v4581_v57, %v4583_v25  ;;  %vm8002_vm11 = vmmov %vm7998_vm5 }
 0x80b   : > { %v4586_v1 = vadd.f32 %v4584_v9, %v4577_v36 }
 0x80d   : > { %v4617_v26 = vpop.permute.xlu0 %4616  ;;  %v4592_v56 = vpop.permute.xlu1 %4591 }
 0x80e   : > { %v4593_v38 = vsel %vm1413_vm6, %v4590_v13, %v4592_v56  ;;  %vm7999_vm6 = vcmask 695296  }
 0x80f   : > { %v4595_v23 = vadd.f32 %v4593_v38, %v4586_v1 }
 0x811   : > { %v4626_v22 = vpop.permute.xlu0 %4625  ;;  %v4635_v5 = vpop.permute.xlu1 %4634 }
 0x815   : > { %v4644_v35 = vpop.permute.xlu0 %4643  ;;  %v4601_v31 = vpop.permute.xlu1 %4600 }
 0x816   : > { %v4602_v29 = vsel %vm7995_vm3, %v4599_v15, %v4601_v31 }
 0x817   : > { %v4604_v21 = vadd.f32 %v4602_v29, %v4595_v23 }
 0x819   : > { %v4637_v49 = vpop.permute.xlu0 %4636  ;;  %v4610_v28 = vpop.permute.xlu1 %4609 }
 0x81a   : > { %v4611_v45 = vsel %vm7996_vm7, %v4608_v51, %v4610_v28  ;;  %v4638_v63 = vsel %vm7999_vm6, %v4635_v5, %v4637_v49 }
 0x81b   : > { %v4613_v42 = vadd.f32 %v4611_v45, %v4604_v21 }
 0x81d   : > { %v4653_v41 = vpop.permute.xlu0 %4652  ;;  %v4619_v16 = vpop.permute.xlu1 %4618 }
 0x81e   : > { %v4620_v40 = vsel %vm7997_vm4, %v4617_v26, %v4619_v16 }
 0x81f   : > { %v4622_v4 = vadd.f32 %v4620_v40, %v4613_v42 }
 0x821   : > { %v4225_v43 = vpop.permute.xlu0 %4224  ;;  %v4628_v17 = vpop.permute.xlu1 %4627 }
 0x822   : > { %4227 = vst.msk [vmem:[%s7416_s23 + $0x2] sm:$0x1] %vm7998_vm5, %v4225_v43  ;;  %v4629_v32 = vsel %vm2410_vm12, %v4626_v22, %v4628_v17  ;;  %vm8001_vm12 = vcmask 678912  }
 0x823   : > { %v4631_v30 = vadd.f32 %v4629_v32, %v4622_v4 }
 0x825   : > { %v4229_v33 = vpop.permute.xlu0 %4228  ;;  %v4640_v44 = vadd.f32 %v4638_v63, %v4631_v30  ;;  %v4646_v52 = vpop.permute.xlu1 %4645 }
 0x826   : > { %4231 = vst.msk [vmem:[%s7416_s23 + $0x2] sm:$0x1] %vm2455_vm9, %v4229_v33  ;;  %v4647_v53 = vsel %vm8000_vm8, %v4644_v35, %v4646_v52 }
 0x827   : > { %v4649_v48 = vadd.f32 %v4647_v53, %v4640_v44 }
 0x829   : > { %v4233_v54 = vpop.permute.xlu0 %4232  ;;  %v4655_v55 = vpop.permute.xlu1 %4654 }
 0x82a   : > { %4235 = vst.msk [vmem:[%s7416_s23 + $0x2] sm:$0x1] %vm2460_vm0, %v4233_v54  ;;  %v4656_v60 = vsel %vm8001_vm12, %v4653_v41, %v4655_v55 }
 0x82b   : > { %v4658_v50 = vadd.f32 %v4656_v60, %v4649_v48 }
 0x82d   : > { %v4665_v24 = vadd.f32 %v6915_v14, %v4658_v50  ;;  %v4237_v39 = vpop.permute.xlu0 %4236  ;;  %v4245_v0 = vpop.permute.xlu1 %4244 }
 0x82e   : > { %4239 = vst.msk [vmem:[%s7416_s23 + $0x2] sm:$0x1] %vm2465_vm1, %v4237_v39 }
 0x82f   : > { %4666 = vst.msk [vmem:[%s7416_s23 + $0x3] sm:$0x1] %vm7991_vm10, %v4665_v24  ;;  %4688 = vrot.lane.b32.xlu0 %v4665_v24, %s7930_s26  ;;  %4668 = vrot.lane.b32.xlu1 %v4665_v24, %s7940_s29 }
 0x831   : > { %v4241_v12 = vpop.permute.xlu0 %4240  ;;  %v3805_v19 = vpop.permute.xlu1 %3804 }
 0x832   : > { %4243 = vst.msk [vmem:[%s7416_s23 + $0x2] sm:$0x1] %vm2470_vm15, %v4241_v12 }
 0x833   : > { %4247 = vst.msk [vmem:[%s7416_s23 + $0x2] sm:$0x1] %vm2475_vm14, %v4245_v0  ;;  %4696 = vrot.lane.b32.xlu0 %v4665_v24, %s7993_s25  ;;  %4672 = vrot.lane.b32.xlu1 %v4665_v24, %s7939_s14 }
 0x835   : > { %v3801_v14 = vpop.permute.xlu0 %3800 }
 0x836   : > { %3803 = vst.msk [vmem:[%s7416_s23 + $0x1] sm:$0x1] %vm2475_vm14, %v3801_v14 }
 0x837   : > { %3807 = vst.msk [vmem:[%s7416_s23 + $0x1] sm:$0x1] %vm2480_vm13, %v3805_v19  ;;  %4676 = vrot.lane.b32.xlu1 %v4665_v24, %s7963_s28 }
 0x839   : > { %v4249_v47 = vpop.permute.xlu0 %4248 }
 0x83a   : > { %4251 = vst.msk [vmem:[%s7416_s23 + $0x2] sm:$0x1] %vm2480_vm13, %v4249_v47 }
 0x83b   : > { %4680 = vrot.lane.b32.xlu1 %v4665_v24, %s7941_s15 }
 0x83d   : > { %v3809_v59 = vpop.permute.xlu0 %3808 }
 0x83e   : > { %3811 = vst.msk [vmem:[%s7416_s23 + $0x1] sm:$0x1] %vm2485_vm2, %v3809_v59 }
 0x83f   : > { %4684 = vrot.lane.b32.xlu1 %v4665_v24, %s7942_s16 }
 0x843   : > { %4692 = vrot.lane.b32.xlu1 %v4665_v24, %s7992_s1 }
 0x847   : > { %4252 = vrot.lane.b32.xlu1 %v7724_v18, %s7993_s25 }
 0x8a1   : > { %v4669_v37 = vpop.permute.xlu1 %4668  ;;  %v4689_v57 = vpop.permute.xlu0 %4688 }
 0x8a2   : > { %4671 = vst.msk [vmem:[%s7416_s23 + $0x3] sm:$0x1] %vm8002_vm11, %v4669_v37 }
 0x8a5   : > { %v4673_v6 = vpop.permute.xlu1 %4672  ;;  %v4697_v13 = vpop.permute.xlu0 %4696 }
 0x8a6   : > { %4675 = vst.msk [vmem:[%s7416_s23 + $0x3] sm:$0x1] %vm2455_vm9, %v4673_v6 }
 0x8a9   : > { %v4677_v10 = vpop.permute.xlu1 %4676 }
 0x8aa   : > { %4679 = vst.msk [vmem:[%s7416_s23 + $0x3] sm:$0x1] %vm2460_vm0, %v4677_v10 }
 0x8ad   : > { %v4681_v11 = vpop.permute.xlu1 %4680 }
 0x8ae   : > { %4683 = vst.msk [vmem:[%s7416_s23 + $0x3] sm:$0x1] %vm2465_vm1, %v4681_v11 }
 0x8b1   : > { %v4685_v20 = vpop.permute.xlu1 %4684 }
 0x8b2   : > { %4687 = vst.msk [vmem:[%s7416_s23 + $0x3] sm:$0x1] %vm2470_vm15, %v4685_v20 }
 0x8b3   : > { %4691 = vst.msk [vmem:[%s7416_s23 + $0x3] sm:$0x1] %vm2475_vm14, %v4689_v57 }
 0x8b5   : > { %v4693_v18 = vpop.permute.xlu1 %4692 }
 0x8b6   : > { %4695 = vst.msk [vmem:[%s7416_s23 + $0x3] sm:$0x1] %vm2480_vm13, %v4693_v18 }
 0x8b7   : > { %4699 = vst.msk [vmem:[%s7416_s23 + $0x3] sm:$0x1] %vm2485_vm2, %v4697_v13 }
 0x8b9   : > { %v4253_v62 = vpop.permute.xlu1 %4252 }
 0x8ba   : > { %4255 = vst.msk [vmem:[%s7416_s23 + $0x2] sm:$0x1] %vm2485_vm2, %v4253_v62 }
 0x8bb PF: > { %s8003_s26 = sld [smem:[#allocation3_spill]] }
 0x8c1   : > { %s19_s27 = sadd.s32 1, %s8003_s26  }
 0x8c2   : > { %p16_p4 = scmp.ge.s32.totalorder %s19_s27, 4  }
 0x8c4   :  { %18 = sbr.rel (!%p16_p4) target bundleno = 8 (0x8), region = 111 }

</bundles_post_ra>
